<compile_context>
chip_gen: v7x
topology: tpu7x:2x2x1
jax: 0.10.0
libtpu: 0.0.40
codegen_flags: <defaults>
</compile_context>

<pallas_src>
import functools

import jax
import jax.numpy as jnp
from jax import lax
from jax.experimental import pallas as pl
from jax.experimental.pallas import tpu as pltpu

# ---------------- model configuration (mirrors AuxDrop_ODL.__init__) ---------
FEATURES_SIZE = 16      # features_size
MAX_HIDDEN    = 6       # max_num_hidden_layers
HIDDEN        = 32      # qtd_neuron_per_hidden_layer
N_CLASSES     = 8       # n_classes
AUX_LAYER     = 3       # aux_layer (1-indexed; hidden_layers[AUX_LAYER-1] is aux)
N_AUX_NEURON  = 128     # n_neuron_aux_layer
N_AUX_FEAT    = 4       # n_aux_feat
DROPOUT_P     = 0.5     # dropout_p
NUM_HEADS     = MAX_HIDDEN - 2          # 4 output heads (h1, h3, h4, h5)

# ---------------- kernel tiling ----------------------------------------------
TILE_M      = 128       # samples per grid step (fits MXU rows / f32 sublanes)
TOTAL_BATCH = 256       # total samples per forward call -> grid = (2,)
AUX_IN_PAD  = 8         # aux_feat padded 4 -> 8 (sublane-aligned w2a block)

# packed weight buffer: rows = concatenated (in_features) blocks, 128 lanes wide
OFF_W0  = 0                               # (F,  H)   hidden_layers[0]
OFF_W1  = OFF_W0 + FEATURES_SIZE          # (H,  H)   hidden_layers[1]
OFF_W2A = OFF_W1 + HIDDEN                 # (8,  NA)  aux-layer weight, aux-feat rows
OFF_W2B = OFF_W2A + AUX_IN_PAD            # (H,  NA)  aux-layer weight, h1 rows
OFF_W3  = OFF_W2B + HIDDEN                # (NA, H)   hidden_layers[3]
OFF_W4  = OFF_W3 + N_AUX_NEURON           # (H,  H)   hidden_layers[4]
OFF_W5  = OFF_W4 + HIDDEN                 # (H,  H)   hidden_layers[5]
OFF_WH  = OFF_W5 + HIDDEN                 # (4H, 4C)  block-diagonal fused heads
W_ROWS  = OFF_WH + NUM_HEADS * HIDDEN     # = 408 (multiple of 8)
W_COLS  = 128


# ---------------- kernel ------------------------------------------------------
def auxdrop_kernel(x_ref, af_ref, rm_ref, w_ref, b_ref, out_ref):
    f32 = jnp.float32
    dot = functools.partial(jnp.dot, preferred_element_type=f32)
    relu = lambda v: jnp.maximum(v, 0.0)

    x = x_ref[...]                 # (M, F)
    af = af_ref[...]               # (M, 8)   aux feats zero-padded 4 -> 8
    rm = rm_ref[...]               # (M, NA)  cols<NAF: aux mask, else uniform[0,1)

    # hidden layers 0, 1
    h0 = relu(dot(x, w_ref[OFF_W0:OFF_W0 + FEATURES_SIZE, :HIDDEN])
              + b_ref[0:1, :HIDDEN])
    h1 = relu(dot(h0, w_ref[OFF_W1:OFF_W1 + HIDDEN, :HIDDEN])
              + b_ref[1:2, :HIDDEN])

    # aux layer (hidden_layers[2]): Linear(cat(aux_feat, h1)) as two matmuls
    lin2 = (dot(af, w_ref[OFF_W2A:OFF_W2A + AUX_IN_PAD, :N_AUX_NEURON])
            + dot(h1, w_ref[OFF_W2B:OFF_W2B + HIDDEN, :N_AUX_NEURON])
            + b_ref[2:3, :N_AUX_NEURON])
    r2 = relu(lin2)

    # AuxDrop mask:
    #   aux_p = (p*NA - (NAF - sum(aux_mask))) / (NA - NAF)   (per sample row)
    #   first NAF neurons masked by aux_mask, rest ~ Bernoulli(1 - aux_p)
    col = lax.broadcasted_iota(jnp.int32, (TILE_M, N_AUX_NEURON), 1)
    is_aux = col < N_AUX_FEAT
    aux_mask = jnp.where(is_aux, rm, 0.0)
    sum_mask = jnp.sum(aux_mask, axis=1, keepdims=True)                 # (M, 1)
    aux_p = (DROPOUT_P * N_AUX_NEURON - (N_AUX_FEAT - sum_mask)) / (
        N_AUX_NEURON - N_AUX_FEAT)
    keep = (rm < (1.0 - aux_p)).astype(f32)          # uses uniform lanes only
    mask = jnp.where(is_aux, rm, keep)
    h2 = r2 * mask * (1.0 / (1.0 - DROPOUT_P))

    # hidden layers 3, 4, 5
    h3 = relu(dot(h2, w_ref[OFF_W3:OFF_W3 + N_AUX_NEURON, :HIDDEN])
              + b_ref[3:4, :HIDDEN])
    h4 = relu(dot(h3, w_ref[OFF_W4:OFF_W4 + HIDDEN, :HIDDEN])
              + b_ref[4:5, :HIDDEN])
    h5 = relu(dot(h4, w_ref[OFF_W5:OFF_W5 + HIDDEN, :HIDDEN])
              + b_ref[5:6, :HIDDEN])

    # fused output heads: one (M,128) @ (128, 4C) block-diagonal matmul
    hcat = jnp.concatenate([h1, h3, h4, h5], axis=1)                    # (M, 4H)
    logits = (dot(hcat, w_ref[OFF_WH:OFF_WH + NUM_HEADS * HIDDEN,
                              :NUM_HEADS * N_CLASSES])
              + b_ref[6:7, :NUM_HEADS * N_CLASSES])                     # (M, 4C)

    # per-head softmax over each 8-class segment; single lane-dense store
    heads = []
    for k in range(NUM_HEADS):
        lg = logits[:, k * N_CLASSES:(k + 1) * N_CLASSES]
        m = jnp.max(lg, axis=1, keepdims=True)
        e = jnp.exp(lg - m)
        heads.append(e / jnp.sum(e, axis=1, keepdims=True))
    out_ref[...] = jnp.concatenate(heads, axis=1)


# ---------------- params ------------------------------------------------------
def init_params(key):
    """PyTorch nn.Linear-style init; weights stored transposed as (in, out)."""
    def linear(k, fan_in, fan_out):
        k1, k2 = jax.random.split(k)
        bound = 1.0 / float(fan_in) ** 0.5
        w = jax.random.uniform(k1, (fan_in, fan_out), jnp.float32, -bound, bound)
        b = jax.random.uniform(k2, (fan_out,), jnp.float32, -bound, bound)
        return w, b

    keys = jax.random.split(key, 6 + NUM_HEADS)
    p = {}
    p["w0"], p["b0"] = linear(keys[0], FEATURES_SIZE, HIDDEN)
    p["w1"], p["b1"] = linear(keys[1], HIDDEN, HIDDEN)
    p["w2"], p["b2"] = linear(keys[2], N_AUX_FEAT + HIDDEN, N_AUX_NEURON)
    p["w3"], p["b3"] = linear(keys[3], N_AUX_NEURON, HIDDEN)
    p["w4"], p["b4"] = linear(keys[4], HIDDEN, HIDDEN)
    p["w5"], p["b5"] = linear(keys[5], HIDDEN, HIDDEN)
    p["head_w"], p["head_b"] = [], []
    for k in range(NUM_HEADS):
        hw, hb = linear(keys[6 + k], HIDDEN, N_CLASSES)
        p["head_w"].append(hw)
        p["head_b"].append(hb)
    return p


def pack_params(p):
    """Pack all 21 weight/bias tensors into one weight slab + one bias slab."""
    W = jnp.zeros((W_ROWS, W_COLS), jnp.float32)
    W = W.at[OFF_W0:OFF_W0 + FEATURES_SIZE, :HIDDEN].set(p["w0"])
    W = W.at[OFF_W1:OFF_W1 + HIDDEN, :HIDDEN].set(p["w1"])
    W = W.at[OFF_W2A:OFF_W2A + N_AUX_FEAT, :N_AUX_NEURON].set(p["w2"][:N_AUX_FEAT])
    W = W.at[OFF_W2B:OFF_W2B + HIDDEN, :N_AUX_NEURON].set(p["w2"][N_AUX_FEAT:])
    W = W.at[OFF_W3:OFF_W3 + N_AUX_NEURON, :HIDDEN].set(p["w3"])
    W = W.at[OFF_W4:OFF_W4 + HIDDEN, :HIDDEN].set(p["w4"])
    W = W.at[OFF_W5:OFF_W5 + HIDDEN, :HIDDEN].set(p["w5"])
    for k in range(NUM_HEADS):   # block-diagonal fused head weight
        W = W.at[OFF_WH + k * HIDDEN:OFF_WH + (k + 1) * HIDDEN,
                 k * N_CLASSES:(k + 1) * N_CLASSES].set(p["head_w"][k])

    B = jnp.zeros((8, W_COLS), jnp.float32)
    B = B.at[0, :HIDDEN].set(p["b0"])
    B = B.at[1, :HIDDEN].set(p["b1"])
    B = B.at[2, :N_AUX_NEURON].set(p["b2"])
    B = B.at[3, :HIDDEN].set(p["b3"])
    B = B.at[4, :HIDDEN].set(p["b4"])
    B = B.at[5, :HIDDEN].set(p["b5"])
    B = B.at[6, :NUM_HEADS * N_CLASSES].set(jnp.concatenate(p["head_b"]))
    return W, B


# ---------------- wrapper -----------------------------------------------------
@jax.jit
def auxdrop_forward(X, aux_feat, aux_mask, rand_u, W_packed, B_packed):
    M = X.shape[0]
    grid = (M // TILE_M,)

    # aux feats zero-padded 4 -> 8 columns (matches the padded w2a block rows)
    af = jnp.zeros((M, AUX_IN_PAD), jnp.float32).at[:, :N_AUX_FEAT].set(
        aux_feat.astype(jnp.float32))
    # one (M, NA) array: cols < N_AUX_FEAT carry the aux mask, the rest carry
    # uniform[0,1) draws for the Bernoulli keep decision (host-side jax.random;
    # the TPU HW PRNG has no interpret lowering and never matches torch anyway).
    rm = jnp.concatenate(
        [aux_mask.astype(jnp.float32), rand_u[:, N_AUX_FEAT:]], axis=1)

    out_flat = pl.pallas_call(
        auxdrop_kernel,
        out_shape=jax.ShapeDtypeStruct((M, NUM_HEADS * N_CLASSES), jnp.float32),
        grid=grid,
        in_specs=[
            pl.BlockSpec((TILE_M, FEATURES_SIZE), lambda i: (i, 0)),
            pl.BlockSpec((TILE_M, AUX_IN_PAD), lambda i: (i, 0)),
            pl.BlockSpec((TILE_M, N_AUX_NEURON), lambda i: (i, 0)),
            pl.BlockSpec((W_ROWS, W_COLS), lambda i: (0, 0)),
            pl.BlockSpec((8, W_COLS), lambda i: (0, 0)),
        ],
        out_specs=pl.BlockSpec((TILE_M, NUM_HEADS * N_CLASSES), lambda i: (i, 0)),
        compiler_params=pltpu.CompilerParams(
            dimension_semantics=("parallel",)),
    )(X.astype(jnp.float32), af, rm, W_packed, B_packed)

    # lane-dense (M, 4C) slab -> (4, M, C), matching torch.stack(output_class)
    return jnp.transpose(out_flat.reshape(M, NUM_HEADS, N_CLASSES), (1, 0, 2))


# ---------------- pure-JAX reference (correctness check) ----------------------
def reference_forward(X, aux_feat, aux_mask, rand_u, p):
    hp = functools.partial(jnp.dot, precision=lax.Precision.HIGHEST)
    X = X.astype(jnp.float32)
    h0 = jax.nn.relu(hp(X, p["w0"]) + p["b0"])
    h1 = jax.nn.relu(hp(h0, p["w1"]) + p["b1"])
    cat = jnp.concatenate([aux_feat.astype(jnp.float32), h1], axis=1)
    r2 = jax.nn.relu(hp(cat, p["w2"]) + p["b2"])
    sum_mask = jnp.sum(aux_mask, axis=1, keepdims=True)
    aux_p = (DROPOUT_P * N_AUX_NEURON - (N_AUX_FEAT - sum_mask)) / (
        N_AUX_NEURON - N_AUX_FEAT)
    keep = (rand_u[:, N_AUX_FEAT:] < (1.0 - aux_p)).astype(jnp.float32)
    mask = jnp.concatenate([aux_mask.astype(jnp.float32), keep], axis=1)
    h2 = r2 * mask * (1.0 / (1.0 - DROPOUT_P))
    h3 = jax.nn.relu(hp(h2, p["w3"]) + p["b3"])
    h4 = jax.nn.relu(hp(h3, p["w4"]) + p["b4"])
    h5 = jax.nn.relu(hp(h4, p["w5"]) + p["b5"])
    hs = [h1, h3, h4, h5]
    outs = [jax.nn.softmax(hp(hs[k], p["head_w"][k]) + p["head_b"][k], axis=1)
            for k in range(NUM_HEADS)]
    return jnp.stack(outs)


if __name__ == "__main__":
    key = jax.random.PRNGKey(0)
    kx, ka, km, kr, kp = jax.random.split(key, 5)

    X = jax.random.normal(kx, (TOTAL_BATCH, FEATURES_SIZE), jnp.float32)
    aux_feat = jax.random.normal(ka, (TOTAL_BATCH, N_AUX_FEAT), jnp.float32)
    # which aux features are observed for each sample (0/1), as in the reference
    aux_mask = (jax.random.uniform(km, (TOTAL_BATCH, N_AUX_FEAT)) < 0.75
                ).astype(jnp.float32)
    # host-side uniform draws standing in for torch's Binomial sample
    rand_u = jax.random.uniform(kr, (TOTAL_BATCH, N_AUX_NEURON), jnp.float32)

    params = init_params(kp)
    W_packed, B_packed = pack_params(params)

    preds = auxdrop_forward(X, aux_feat, aux_mask, rand_u, W_packed, B_packed)
    preds = jax.block_until_ready(preds)

    assert preds.shape == (NUM_HEADS, TOTAL_BATCH, N_CLASSES)
    assert bool(jnp.all(jnp.isfinite(preds)))
    # each head output is a softmax over classes -> rows sum to 1
    row_sums = jnp.sum(preds, axis=-1)
    assert bool(jnp.all(jnp.abs(row_sums - 1.0) < 1e-3))

    # compare against the pure-JAX reference using the same random draws
    ref = reference_forward(X, aux_feat, aux_mask, rand_u, params)
    max_err = float(jnp.max(jnp.abs(preds - ref)))
    assert max_err < 1e-2, f"kernel/reference mismatch: {max_err}"

    # TODO(synk): update_weights / partial_fit (per-head CE losses, manual grad
    # accumulation, alpha hedging) is the online-training loop, not forward();
    # only forward() is implemented as a kernel.
    print("KERNEL_OK")
</pallas_src>

<mosaic_0001>
module attributes {stable_mosaic.version = 11 : i64} {
  func.func @auxdrop_kernel(%arg0: i32, %arg1: memref<128x16xf32, #tpu.memory_space<vmem>>, %arg2: memref<128x8xf32, #tpu.memory_space<vmem>>, %arg3: memref<128x128xf32, #tpu.memory_space<vmem>>, %arg4: memref<408x128xf32, #tpu.memory_space<vmem>>, %arg5: memref<8x128xf32, #tpu.memory_space<vmem>>, %arg6: memref<128x32xf32, #tpu.memory_space<vmem>>) attributes {dimension_semantics = [#tpu.dimension_semantics<parallel>], iteration_bounds = array<i64: 2>, scalar_prefetch = 0 : i64, scratch_operands = 0 : i64, tpu.core_type = #tpu.core_type<tc>, window_params = [{transform_indices = @transform_0, window_bounds = array<i64: 128, 16>}, {transform_indices = @transform_1, window_bounds = array<i64: 128, 8>}, {transform_indices = @transform_2, window_bounds = array<i64: 128, 128>}, {pipeline_mode = #tpu.pipeline_mode<synchronous>, transform_indices = @transform_3, window_bounds = array<i64: 408, 128>}, {pipeline_mode = #tpu.pipeline_mode<synchronous>, transform_indices = @transform_4, window_bounds = array<i64: 8, 128>}, {transform_indices = @transform_5, window_bounds = array<i64: 128, 32>}]} {
    %c0 = arith.constant 0 : index
    %c0_0 = arith.constant 0 : index
    %0 = vector.load %arg1[%c0, %c0_0] : memref<128x16xf32, #tpu.memory_space<vmem>>, vector<128x16xf32>
    %c0_1 = arith.constant 0 : index
    %c0_2 = arith.constant 0 : index
    %1 = vector.load %arg2[%c0_1, %c0_2] : memref<128x8xf32, #tpu.memory_space<vmem>>, vector<128x8xf32>
    %c0_3 = arith.constant 0 : index
    %c0_4 = arith.constant 0 : index
    %2 = vector.load %arg3[%c0_3, %c0_4] : memref<128x128xf32, #tpu.memory_space<vmem>>, vector<128x128xf32>
    %c0_5 = arith.constant 0 : index
    %c0_6 = arith.constant 0 : index
    %3 = vector.load %arg4[%c0_5, %c0_6] : memref<408x128xf32, #tpu.memory_space<vmem>>, vector<16x32xf32>
    %cst = arith.constant dense<0.000000e+00> : vector<128x32xf32>
    %4 = tpu.matmul %0, %3, %cst {dimension_numbers = #tpu.dot_dimension_numbers<[1], [0], [0], [1], [0, 0, 1, 1], [], []>} : vector<128x16xf32>, vector<16x32xf32>, vector<128x32xf32> -> vector<128x32xf32>
    %c0_7 = arith.constant 0 : index
    %c0_8 = arith.constant 0 : index
    %5 = vector.load %arg5[%c0_7, %c0_8] : memref<8x128xf32, #tpu.memory_space<vmem>>, vector<1x32xf32>
    %6 = vector.broadcast %5 : vector<1x32xf32> to vector<128x32xf32>
    %7 = arith.addf %4, %6 : vector<128x32xf32>
    %cst_9 = arith.constant 0.000000e+00 : f32
    %8 = vector.broadcast %cst_9 : f32 to vector<128x32xf32>
    %9 = arith.maximumf %7, %8 : vector<128x32xf32>
    %c16 = arith.constant 16 : index
    %c0_10 = arith.constant 0 : index
    %10 = vector.load %arg4[%c16, %c0_10] : memref<408x128xf32, #tpu.memory_space<vmem>>, vector<32x32xf32>
    %cst_11 = arith.constant dense<0.000000e+00> : vector<128x32xf32>
    %11 = tpu.matmul %9, %10, %cst_11 {dimension_numbers = #tpu.dot_dimension_numbers<[1], [0], [0], [1], [0, 0, 1, 1], [], []>} : vector<128x32xf32>, vector<32x32xf32>, vector<128x32xf32> -> vector<128x32xf32>
    %c1 = arith.constant 1 : index
    %c0_12 = arith.constant 0 : index
    %12 = vector.load %arg5[%c1, %c0_12] : memref<8x128xf32, #tpu.memory_space<vmem>>, vector<1x32xf32>
    %13 = vector.broadcast %12 : vector<1x32xf32> to vector<128x32xf32>
    %14 = arith.addf %11, %13 : vector<128x32xf32>
    %cst_13 = arith.constant 0.000000e+00 : f32
    %15 = vector.broadcast %cst_13 : f32 to vector<128x32xf32>
    %16 = arith.maximumf %14, %15 : vector<128x32xf32>
    %c48 = arith.constant 48 : index
    %c0_14 = arith.constant 0 : index
    %17 = vector.load %arg4[%c48, %c0_14] : memref<408x128xf32, #tpu.memory_space<vmem>>, vector<8x128xf32>
    %cst_15 = arith.constant dense<0.000000e+00> : vector<128x128xf32>
    %18 = tpu.matmul %1, %17, %cst_15 {dimension_numbers = #tpu.dot_dimension_numbers<[1], [0], [0], [1], [0, 0, 1, 1], [], []>} : vector<128x8xf32>, vector<8x128xf32>, vector<128x128xf32> -> vector<128x128xf32>
    %c56 = arith.constant 56 : index
    %c0_16 = arith.constant 0 : index
    %19 = vector.load %arg4[%c56, %c0_16] : memref<408x128xf32, #tpu.memory_space<vmem>>, vector<32x128xf32>
    %cst_17 = arith.constant dense<0.000000e+00> : vector<128x128xf32>
    %20 = tpu.matmul %16, %19, %cst_17 {dimension_numbers = #tpu.dot_dimension_numbers<[1], [0], [0], [1], [0, 0, 1, 1], [], []>} : vector<128x32xf32>, vector<32x128xf32>, vector<128x128xf32> -> vector<128x128xf32>
    %21 = arith.addf %18, %20 : vector<128x128xf32>
    %c2 = arith.constant 2 : index
    %c0_18 = arith.constant 0 : index
    %22 = vector.load %arg5[%c2, %c0_18] : memref<8x128xf32, #tpu.memory_space<vmem>>, vector<1x128xf32>
    %23 = vector.broadcast %22 : vector<1x128xf32> to vector<128x128xf32>
    %24 = arith.addf %21, %23 : vector<128x128xf32>
    %cst_19 = arith.constant 0.000000e+00 : f32
    %25 = vector.broadcast %cst_19 : f32 to vector<128x128xf32>
    %26 = arith.maximumf %24, %25 : vector<128x128xf32>
    %27 = tpu.iota {dimensions = array<i32: 1>} : vector<128x128xi32>
    %c4_i32 = arith.constant 4 : i32
    %28 = vector.broadcast %c4_i32 : i32 to vector<128x128xi32>
    %29 = arith.cmpi slt, %27, %28 : vector<128x128xi32>
    %cst_20 = arith.constant 0.000000e+00 : f32
    %30 = vector.broadcast %cst_20 : f32 to vector<128x128xf32>
    %31 = arith.select %29, %2, %30 : vector<128x128xi1>, vector<128x128xf32>
    %cst_21 = arith.constant dense<0.000000e+00> : vector<128xf32>
    %32 = vector.multi_reduction <add>, %31, %cst_21 [1] : vector<128x128xf32> to vector<128xf32>
    %33 = vector.shape_cast %32 : vector<128xf32> to vector<128x1xf32>
    %cst_22 = arith.constant 4.000000e+00 : f32
    %34 = vector.broadcast %cst_22 : f32 to vector<128x1xf32>
    %35 = arith.subf %34, %33 : vector<128x1xf32>
    %cst_23 = arith.constant 6.400000e+01 : f32
    %36 = vector.broadcast %cst_23 : f32 to vector<128x1xf32>
    %37 = arith.subf %36, %35 : vector<128x1xf32>
    %cst_24 = arith.constant 1.240000e+02 : f32
    %38 = vector.broadcast %cst_24 : f32 to vector<128x1xf32>
    %39 = arith.divf %37, %38 : vector<128x1xf32>
    %cst_25 = arith.constant 1.000000e+00 : f32
    %40 = vector.broadcast %cst_25 : f32 to vector<128x1xf32>
    %41 = arith.subf %40, %39 : vector<128x1xf32>
    %42 = vector.broadcast %41 : vector<128x1xf32> to vector<128x128xf32>
    %43 = arith.cmpf olt, %2, %42 : vector<128x128xf32>
    %44 = arith.extui %43 : vector<128x128xi1> to vector<128x128xi32>
    %45 = arith.sitofp %44 : vector<128x128xi32> to vector<128x128xf32>
    %46 = arith.select %29, %2, %45 : vector<128x128xi1>, vector<128x128xf32>
    %47 = arith.mulf %26, %46 : vector<128x128xf32>
    %cst_26 = arith.constant 2.000000e+00 : f32
    %48 = vector.broadcast %cst_26 : f32 to vector<128x128xf32>
    %49 = arith.mulf %47, %48 : vector<128x128xf32>
    %c88 = arith.constant 88 : index
    %c0_27 = arith.constant 0 : index
    %50 = vector.load %arg4[%c88, %c0_27] : memref<408x128xf32, #tpu.memory_space<vmem>>, vector<128x32xf32>
    %cst_28 = arith.constant dense<0.000000e+00> : vector<128x32xf32>
    %51 = tpu.matmul %49, %50, %cst_28 {dimension_numbers = #tpu.dot_dimension_numbers<[1], [0], [0], [1], [0, 0, 1, 1], [], []>} : vector<128x128xf32>, vector<128x32xf32>, vector<128x32xf32> -> vector<128x32xf32>
    %c3 = arith.constant 3 : index
    %c0_29 = arith.constant 0 : index
    %52 = vector.load %arg5[%c3, %c0_29] : memref<8x128xf32, #tpu.memory_space<vmem>>, vector<1x32xf32>
    %53 = vector.broadcast %52 : vector<1x32xf32> to vector<128x32xf32>
    %54 = arith.addf %51, %53 : vector<128x32xf32>
    %cst_30 = arith.constant 0.000000e+00 : f32
    %55 = vector.broadcast %cst_30 : f32 to vector<128x32xf32>
    %56 = arith.maximumf %54, %55 : vector<128x32xf32>
    %c216 = arith.constant 216 : index
    %c0_31 = arith.constant 0 : index
    %57 = vector.load %arg4[%c216, %c0_31] : memref<408x128xf32, #tpu.memory_space<vmem>>, vector<32x32xf32>
    %cst_32 = arith.constant dense<0.000000e+00> : vector<128x32xf32>
    %58 = tpu.matmul %56, %57, %cst_32 {dimension_numbers = #tpu.dot_dimension_numbers<[1], [0], [0], [1], [0, 0, 1, 1], [], []>} : vector<128x32xf32>, vector<32x32xf32>, vector<128x32xf32> -> vector<128x32xf32>
    %c4 = arith.constant 4 : index
    %c0_33 = arith.constant 0 : index
    %59 = vector.load %arg5[%c4, %c0_33] : memref<8x128xf32, #tpu.memory_space<vmem>>, vector<1x32xf32>
    %60 = vector.broadcast %59 : vector<1x32xf32> to vector<128x32xf32>
    %61 = arith.addf %58, %60 : vector<128x32xf32>
    %cst_34 = arith.constant 0.000000e+00 : f32
    %62 = vector.broadcast %cst_34 : f32 to vector<128x32xf32>
    %63 = arith.maximumf %61, %62 : vector<128x32xf32>
    %c248 = arith.constant 248 : index
    %c0_35 = arith.constant 0 : index
    %64 = vector.load %arg4[%c248, %c0_35] : memref<408x128xf32, #tpu.memory_space<vmem>>, vector<32x32xf32>
    %cst_36 = arith.constant dense<0.000000e+00> : vector<128x32xf32>
    %65 = tpu.matmul %63, %64, %cst_36 {dimension_numbers = #tpu.dot_dimension_numbers<[1], [0], [0], [1], [0, 0, 1, 1], [], []>} : vector<128x32xf32>, vector<32x32xf32>, vector<128x32xf32> -> vector<128x32xf32>
    %c5 = arith.constant 5 : index
    %c0_37 = arith.constant 0 : index
    %66 = vector.load %arg5[%c5, %c0_37] : memref<8x128xf32, #tpu.memory_space<vmem>>, vector<1x32xf32>
    %67 = vector.broadcast %66 : vector<1x32xf32> to vector<128x32xf32>
    %68 = arith.addf %65, %67 : vector<128x32xf32>
    %cst_38 = arith.constant 0.000000e+00 : f32
    %69 = vector.broadcast %cst_38 : f32 to vector<128x32xf32>
    %70 = arith.maximumf %68, %69 : vector<128x32xf32>
    %71 = tpu.concatenate %16, %56, %63, %70 in 1 : vector<128x32xf32>, vector<128x32xf32>, vector<128x32xf32>, vector<128x32xf32> -> vector<128x128xf32>
    %c280 = arith.constant 280 : index
    %c0_39 = arith.constant 0 : index
    %72 = vector.load %arg4[%c280, %c0_39] : memref<408x128xf32, #tpu.memory_space<vmem>>, vector<128x32xf32>
    %cst_40 = arith.constant dense<0.000000e+00> : vector<128x32xf32>
    %73 = tpu.matmul %71, %72, %cst_40 {dimension_numbers = #tpu.dot_dimension_numbers<[1], [0], [0], [1], [0, 0, 1, 1], [], []>} : vector<128x128xf32>, vector<128x32xf32>, vector<128x32xf32> -> vector<128x32xf32>
    %c6 = arith.constant 6 : index
    %c0_41 = arith.constant 0 : index
    %74 = vector.load %arg5[%c6, %c0_41] : memref<8x128xf32, #tpu.memory_space<vmem>>, vector<1x32xf32>
    %75 = vector.broadcast %74 : vector<1x32xf32> to vector<128x32xf32>
    %76 = arith.addf %73, %75 : vector<128x32xf32>
    %77 = vector.extract_strided_slice %76 {offsets = [0, 0], sizes = [128, 8], strides = [1, 1]} : vector<128x32xf32> to vector<128x8xf32>
    %cst_42 = arith.constant dense<0xFF800000> : vector<128xf32>
    %78 = vector.multi_reduction <maximumf>, %77, %cst_42 [1] : vector<128x8xf32> to vector<128xf32>
    %79 = vector.shape_cast %78 : vector<128xf32> to vector<128x1xf32>
    %80 = vector.broadcast %79 : vector<128x1xf32> to vector<128x8xf32>
    %81 = arith.subf %77, %80 : vector<128x8xf32>
    %82 = math.exp %81 : vector<128x8xf32>
    %cst_43 = arith.constant dense<0.000000e+00> : vector<128xf32>
    %83 = vector.multi_reduction <add>, %82, %cst_43 [1] : vector<128x8xf32> to vector<128xf32>
    %84 = vector.shape_cast %83 : vector<128xf32> to vector<128x1xf32>
    %85 = vector.broadcast %84 : vector<128x1xf32> to vector<128x8xf32>
    %86 = arith.divf %82, %85 : vector<128x8xf32>
    %87 = vector.extract_strided_slice %76 {offsets = [0, 8], sizes = [128, 8], strides = [1, 1]} : vector<128x32xf32> to vector<128x8xf32>
    %cst_44 = arith.constant dense<0xFF800000> : vector<128xf32>
    %88 = vector.multi_reduction <maximumf>, %87, %cst_44 [1] : vector<128x8xf32> to vector<128xf32>
    %89 = vector.shape_cast %88 : vector<128xf32> to vector<128x1xf32>
    %90 = vector.broadcast %89 : vector<128x1xf32> to vector<128x8xf32>
    %91 = arith.subf %87, %90 : vector<128x8xf32>
    %92 = math.exp %91 : vector<128x8xf32>
    %cst_45 = arith.constant dense<0.000000e+00> : vector<128xf32>
    %93 = vector.multi_reduction <add>, %92, %cst_45 [1] : vector<128x8xf32> to vector<128xf32>
    %94 = vector.shape_cast %93 : vector<128xf32> to vector<128x1xf32>
    %95 = vector.broadcast %94 : vector<128x1xf32> to vector<128x8xf32>
    %96 = arith.divf %92, %95 : vector<128x8xf32>
    %97 = vector.extract_strided_slice %76 {offsets = [0, 16], sizes = [128, 8], strides = [1, 1]} : vector<128x32xf32> to vector<128x8xf32>
    %cst_46 = arith.constant dense<0xFF800000> : vector<128xf32>
    %98 = vector.multi_reduction <maximumf>, %97, %cst_46 [1] : vector<128x8xf32> to vector<128xf32>
    %99 = vector.shape_cast %98 : vector<128xf32> to vector<128x1xf32>
    %100 = vector.broadcast %99 : vector<128x1xf32> to vector<128x8xf32>
    %101 = arith.subf %97, %100 : vector<128x8xf32>
    %102 = math.exp %101 : vector<128x8xf32>
    %cst_47 = arith.constant dense<0.000000e+00> : vector<128xf32>
    %103 = vector.multi_reduction <add>, %102, %cst_47 [1] : vector<128x8xf32> to vector<128xf32>
    %104 = vector.shape_cast %103 : vector<128xf32> to vector<128x1xf32>
    %105 = vector.broadcast %104 : vector<128x1xf32> to vector<128x8xf32>
    %106 = arith.divf %102, %105 : vector<128x8xf32>
    %107 = vector.extract_strided_slice %76 {offsets = [0, 24], sizes = [128, 8], strides = [1, 1]} : vector<128x32xf32> to vector<128x8xf32>
    %cst_48 = arith.constant dense<0xFF800000> : vector<128xf32>
    %108 = vector.multi_reduction <maximumf>, %107, %cst_48 [1] : vector<128x8xf32> to vector<128xf32>
    %109 = vector.shape_cast %108 : vector<128xf32> to vector<128x1xf32>
    %110 = vector.broadcast %109 : vector<128x1xf32> to vector<128x8xf32>
    %111 = arith.subf %107, %110 : vector<128x8xf32>
    %112 = math.exp %111 : vector<128x8xf32>
    %cst_49 = arith.constant dense<0.000000e+00> : vector<128xf32>
    %113 = vector.multi_reduction <add>, %112, %cst_49 [1] : vector<128x8xf32> to vector<128xf32>
    %114 = vector.shape_cast %113 : vector<128xf32> to vector<128x1xf32>
    %115 = vector.broadcast %114 : vector<128x1xf32> to vector<128x8xf32>
    %116 = arith.divf %112, %115 : vector<128x8xf32>
    %117 = tpu.concatenate %86, %96, %106, %116 in 1 : vector<128x8xf32>, vector<128x8xf32>, vector<128x8xf32>, vector<128x8xf32> -> vector<128x32xf32>
    %c0_50 = arith.constant 0 : index
    %c0_51 = arith.constant 0 : index
    %118 = vector.load %arg6[%c0_50, %c0_51] : memref<128x32xf32, #tpu.memory_space<vmem>>, vector<128x32xf32>
    tpu.vector_store %arg6[%c0_50, %c0_51], %117 {strides = array<i32>} : memref<128x32xf32, #tpu.memory_space<vmem>>, vector<128x32xf32>,
    return
  }
  func.func @transform_0(%arg0: i32) -> (i32, i32) {
    %c0_i32 = arith.constant 0 : i32
    %c0_i32_0 = arith.constant 0 : i32
    return %arg0, %c0_i32 : i32, i32
  }
  func.func @transform_1(%arg0: i32) -> (i32, i32) {
    %c0_i32 = arith.constant 0 : i32
    %c0_i32_0 = arith.constant 0 : i32
    return %arg0, %c0_i32 : i32, i32
  }
  func.func @transform_2(%arg0: i32) -> (i32, i32) {
    %c0_i32 = arith.constant 0 : i32
    %c0_i32_0 = arith.constant 0 : i32
    return %arg0, %c0_i32 : i32, i32
  }
  func.func @transform_3(%arg0: i32) -> (i32, i32) {
    %c0_i32 = arith.constant 0 : i32
    %c0_i32_0 = arith.constant 0 : i32
    %c0_i32_1 = arith.constant 0 : i32
    return %c0_i32, %c0_i32_0 : i32, i32
  }
  func.func @transform_4(%arg0: i32) -> (i32, i32) {
    %c0_i32 = arith.constant 0 : i32
    %c0_i32_0 = arith.constant 0 : i32
    %c0_i32_1 = arith.constant 0 : i32
    return %c0_i32, %c0_i32_0 : i32, i32
  }
  func.func @transform_5(%arg0: i32) -> (i32, i32) {
    %c0_i32 = arith.constant 0 : i32
    %c0_i32_0 = arith.constant 0 : i32
    return %arg0, %c0_i32 : i32, i32
  }
}

</mosaic_0001>

<bundles_post_ra>
// kernel: auxdrop_forward.1
= control target key start
LH: loop header
LB: loop body
LE: loop exit
PB: predicated region body
PF: predicated region fallthrough
CT: control target
= control target key end

     0   :  { %s4594_s18 = smov 0   ;;  %s6217_s0 = inlined_call_operand.vmem [shape: f32[256,16], index: 0, kind: input, shape index: {}]   ;;  %s6218_s1 = inlined_call_operand.vmem [shape: f32[256,8], index: 1, kind: input, shape index: {}]   ;;  %s6219_s2 = inlined_call_operand.vmem [shape: f32[256,128], index: 2, kind: input, shape index: {}]   ;;  %s6220_s3 = inlined_call_operand.vmem [shape: f32[408,128], index: 3, kind: input, shape index: {}]   ;;  %s6221_s4 = inlined_call_operand.vmem [shape: f32[8,128], index: 4, kind: input, shape index: {}]   ;;  %s6222_s5 = inlined_call_operand.vmem [shape: f32[256,32], index: 5, kind: output, shape index: {}]  }
   0x1 LB: > { %s3435_s19 = sadd.s32 4294967295, %s4555_s18   ;;  %p3439_p0 = scmp.ge.s32.totalorder %s4555_s18, 1  ;;  %s4555_s18 = sphi %s4594_s18, %s15_s18  }
   0x2   : > { %p210_p1 = scmp.lt.s32.totalorder %s4555_s18, 3 }
   0x4   : > { %p211_p2 = pnand %p3439_p0, %p210_p1 }
   0x6   : > { %214 = sbr.rel (%p211_p2) target bundleno = 2591 (0xa1f), region = 40 }
   0xd   : > { %v320_v0 = vld [vmem:[%s6220_s3] sm:$0xff]  ;;  %v321_v1 = vld [vmem:[%s6220_s3 + $0x8] sm:$0xff]  ;;  %s3440_s24 = sshll.u32 %s3435_s19, 4  ;;  %v537_v2 = vld [vmem:[%s6220_s3 + $0x10] sm:$0xff]  ;;  %vm327_vm0 = vcmask 130048   ;;  %vm546_vm1 = vcmask 261120  }
   0xe   : > { %v4042_v3 = vpack.c.bf16 %v321_v1, %v320_v0  ;;  %p249_p3 = scmp.lt.s32.totalorder %s3440_s24, 31  ;;  %v538_v4 = vld [vmem:[%s6220_s3 + $0x18] sm:$0xff]  ;;  %v539_v22 = vld [vmem:[%s6220_s3 + $0x20] sm:$0xff]  ;;  %v540_v23 = vld [vmem:[%s6220_s3 + $0x28] sm:$0xff]  ;;  %vm954_vm3 = vcmask 64512   ;;  %s4559_s19 = smov 64  }
   0xf   : > { %v4046_v5 = vpack.c.bf16 %v538_v4, %v537_v2  ;;  %v4050_v24 = vpack.c.bf16 %v540_v23, %v539_v22  ;;  %v757_v25 = vld [vmem:[%s6220_s3 + $0x38] sm:$0xff]  ;;  %v758_v26 = vld [vmem:[%s6220_s3 + $0x40] sm:$0xff]  ;;  %v759_v27 = vld [vmem:[%s6220_s3 + $0x48] sm:$0xff]  ;;  %s4561_s10 = smov 120   ;;  %s4562_s11 = smov 112  }
  0x10   : > { %4043 = vmatprep.subr.bf16.mxu0 %v4042_v3  ;;  %s6381_s24 = smov (!%p249_p3, %s3440_s24), 31  ;;  %v4054_v28 = vpack.c.bf16 %v758_v26, %v757_v25  ;;  %v760_v29 = vld [vmem:[%s6220_s3 + $0x50] sm:$0xff]  ;;  %v3448_v31 = vld [vmem:[%s6221_s4] ss:$0 sm:$0xff]  ;;  %s4563_s12 = smov 104  }
  0x11   : > { %4045 = vmatpush3.bf16.msra.mxu0 %v4042_v3  ;;  %4047 = vmatprep.subr.bf16.mxu1 %v4046_v5  ;;  %s4614_s29 = sshll.u32 %s6381_s24, 3  ;;  %v4058_v30 = vpack.c.bf16 %v760_v29, %v759_v27 }
  0x12   : > { %4049 = vmatpush3.bf16.msra.mxu1 %v4046_v5  ;;  %s4620_s7 = scalar_lea.vmem %s6217_s0, %s4614_s29  ;;  %4055 = vmatprep.subr.bf16.mxu0 %v4054_v28  ;;  %s4701_s27 = scalar_lea.vmem %s6219_s2, %s4614_s29 }
  0x13   : > { %v272_v6 = vld [vmem:[%s4620_s7] sm:$0xff]  ;;  %v273_v7 = vld [vmem:[%s4620_s7 + $0x8] sm:$0xff]  ;;  %v274_v8 = vld [vmem:[%s4620_s7 + $0x10] sm:$0xff]  ;;  %4051 = vmatprep.subr.bf16.mxu1 %v4050_v24  ;;  %s4931_s9 = scalar_lea.vmem %s6218_s1, %s4614_s29  ;;  %s6056_s15 = scalar_lea.vmem %s6222_s5, %s4614_s29 }
  0x14   : > { %3752 = vmatprep.mubr.msk.f32.mxu0 %vm327_vm0, %v272_v6  ;;  %v275_v9 = vld [vmem:[%s4620_s7 + $0x18] sm:$0xff]  ;;  %v276_v10 = vld [vmem:[%s4620_s7 + $0x20] sm:$0xff]  ;;  %v277_v11 = vld [vmem:[%s4620_s7 + $0x28] sm:$0xff] }
  0x15   : > { %3753 = vmatmul.mubr.msk.f32.vlgmr.msra.gmra.mrb[0].mxu0 %vm327_vm0, %v273_v7  ;;  %v278_v12 = vld [vmem:[%s4620_s7 + $0x30] sm:$0xff]  ;;  %v279_v13 = vld [vmem:[%s4620_s7 + $0x38] sm:$0xff]  ;;  %v280_v14 = vld [vmem:[%s4620_s7 + $0x40] sm:$0xff] }
  0x16   : > { %3755 = vmatprep.mubr.msk.f32.mxu0 %vm327_vm0, %v274_v8  ;;  %v281_v15 = vld [vmem:[%s4620_s7 + $0x48] sm:$0xff]  ;;  %v282_v16 = vld [vmem:[%s4620_s7 + $0x50] sm:$0xff]  ;;  %v283_v17 = vld [vmem:[%s4620_s7 + $0x58] sm:$0xff]  ;;  %4053 = vmatpush3.bf16.msra.mxu1 %v4050_v24 }
  0x17   : > { %v284_v18 = vld [vmem:[%s4620_s7 + $0x60] sm:$0xff]  ;;  %v285_v19 = vld [vmem:[%s4620_s7 + $0x68] sm:$0xff]  ;;  %v286_v20 = vld [vmem:[%s4620_s7 + $0x70] sm:$0xff]  ;;  %4057 = vmatpush3.bf16.msra.mxu0 %v4054_v28 }
  0x18   : > { %v287_v21 = vld [vmem:[%s4620_s7 + $0x78] sm:$0xff]  ;;  %4059 = vmatprep.subr.bf16.mxu0 %v4058_v30  ;;  %v4715_v23 = vld [vmem:[%s4701_s27 + $0x10] sm:$0xff]  ;;  %v4719_v24 = vld [vmem:[%s4701_s27 + $0x8] sm:$0xff]  ;;  %s4558_s7 = smov 32  }
  0x19   : > { %3756 = vmatmul.mubr.msk.f32.gmra.mrb[2].mxu0 %vm327_vm0, %v275_v9  ;;  %v4722_v25 = vld [vmem:[%s4701_s27 + $0x18] sm:$0xff]  ;;  %v1399_v28 = vld [vmem:[%s6220_s3 + $0x68] sm:$0xff] }
  0x1a   : > { %3758 = vmatprep.mubr.msk.f32.mxu0 %vm327_vm0, %v276_v10 }
  0x1b   : > { %4061 = vmatpush3.bf16.msra.mxu0 %v4058_v30 }
  0x1d   : > { %3759 = vmatmul.mubr.msk.f32.gmra.mrb[4].mxu0 %vm327_vm0, %v277_v11 }
  0x1e   : > { %3761 = vmatprep.mubr.msk.f32.mxu0 %vm327_vm0, %v278_v12 }
  0x21   : > { %3762 = vmatmul.mubr.msk.f32.gmra.mrb[6].mxu0 %vm327_vm0, %v279_v13 }
  0x22   : > { %3764 = vmatprep.mubr.msk.f32.mxu0 %vm327_vm0, %v280_v14 }
  0x25   : > { %3765 = vmatmul.mubr.msk.f32.gmra.mrb[8].mxu0 %vm327_vm0, %v281_v15 }
  0x26   : > { %3767 = vmatprep.mubr.msk.f32.mxu0 %vm327_vm0, %v282_v16  ;;  %v4694_v16 = vld [vmem:[%s6220_s3 + $0x30] sm:$0xff] }
  0x27   : > { %3840 = vmatprep.subr.mxu0 %v4694_v16 }
  0x29   : > { %3768 = vmatmul.mubr.msk.f32.gmra.mrb[10].mxu0 %vm327_vm0, %v283_v17  ;;  %v1185_v17 = vlaneseq }
  0x2a   : > { %3770 = vmatprep.mubr.msk.f32.mxu0 %vm327_vm0, %v284_v18  ;;  %v1397_v18 = vld [vmem:[%s6220_s3 + $0x58] sm:$0xff] }
  0x2b   : > { %v4712_v22 = vand.u32 127, %v1185_v17 }
  0x2d   : > { %3771 = vmatmul.mubr.msk.f32.gmra.mrb[12].mxu0 %vm327_vm0, %v285_v19  ;;  %v1398_v19 = vld [vmem:[%s6220_s3 + $0x60] sm:$0xff]  ;;  %vm1187_vm2 = vcmp.lt.s32.totalorder %v4712_v22, 4 }
  0x2e   : > { %3773 = vmatprep.mubr.msk.f32.mxu0 %vm327_vm0, %v286_v20  ;;  %v4062_v20 = vpack.c.bf16 %v1398_v19, %v1397_v18  ;;  %v1190_v27 = vsel %vm1187_vm2, %v4715_v23, 0.0  ;;  %v1189_v29 = vsel %vm1187_vm2, %v4719_v24, 0.0  ;;  %v1191_v30 = vsel %vm1187_vm2, %v4722_v25, 0.0 }
  0x2f   : > { %1208 = vadd.xlane.f32.xlu1 %v1190_v27 }
  0x30   : > { %4063 = vmatprep.subr.bf16.mxu1 %v4062_v20 }
  0x31   : > { %3774 = vmatmul.mubr.msk.f32.gmra.mrb[14].mxu0 %vm327_vm0, %v287_v21  ;;  %v4710_v21 = vld [vmem:[%s4701_s27] sm:$0xff] }
  0x32   : > { %v1188_v26 = vsel %vm1187_vm2, %v4710_v21, 0.0 }
  0x33   : > { %1204 = vadd.xlane.f32.xlu0 %v1188_v26  ;;  %1210 = vadd.xlane.f32.xlu1 %v1191_v30 }
  0x37   : > { %1206 = vadd.xlane.f32.xlu0 %v1189_v29 }
  0xe8   : > { %v3754_v32 = vpop.f32.mrb[0].mxu0 }
  0xe9   : > { %v448_v33 = vadd.f32 %v3754_v32, %v3448_v31  ;;  %v442_v34 = vpop.f32.mrb[1].mxu0  ;;  %v1401_v32 = vld [vmem:[%s6220_s3 + $0x78] sm:$0xff] }
  0xea   : > { %v443_v35 = vadd.f32 %v3448_v31, %v442_v34  ;;  %v4749_v34 = vld [vmem:[%s4701_s27 + $0x20] sm:$0xff] }
  0xeb   : > { %v522_v38 = vmax.f32 %v448_v33, 0.0  ;;  %v4746_v33 = vld [vmem:[%s4701_s27 + $0x28] sm:$0xff] }
  0xec   : > { %v521_v36 = vmax.f32 %v443_v35, 0.0  ;;  %v3757_v37 = vpop.f32.mrb[2].mxu0  ;;  %v1402_v35 = vld [vmem:[%s6220_s3 + $0x80] sm:$0xff] }
  0xed   : > { %v458_v39 = vadd.f32 %v3757_v37, %v3448_v31  ;;  %v452_v40 = vpop.f32.mrb[3].mxu0  ;;  %v4070_v37 = vpack.c.bf16 %v1402_v35, %v1401_v32 }
  0xee   : > { %v453_v41 = vadd.f32 %v3448_v31, %v452_v40  ;;  %3784 = vmatprep.mubr.msk.f32.mxu1 %vm546_vm1, %v521_v36  ;;  %v4761_v40 = vld [vmem:[%s4701_s27 + $0x38] sm:$0xff] }
  0xef   : > { %3785 = vmatmul.mubr.msk.f32.vlgmr.msra.gmra.mrb[0].mxu1 %vm546_vm1, %v522_v38  ;;  %v524_v44 = vmax.f32 %v458_v39, 0.0  ;;  %v1193_v38 = vsel %vm1187_vm2, %v4746_v33, 0.0  ;;  %v1192_v39 = vsel %vm1187_vm2, %v4749_v34, 0.0 }
  0xf0   : > { %v523_v42 = vmax.f32 %v453_v41, 0.0  ;;  %v3760_v43 = vpop.f32.mrb[4].mxu0  ;;  %4065 = vmatpush3.bf16.msra.mxu1 %v4062_v20  ;;  %v4764_v41 = vld [vmem:[%s4701_s27 + $0x30] sm:$0xff]  ;;  %1214 = vadd.xlane.f32.xlu1 %v1193_v38 }
  0xf1   : > { %v468_v45 = vadd.f32 %v3760_v43, %v3448_v31  ;;  %v462_v46 = vpop.f32.mrb[5].mxu0  ;;  %1212 = vadd.xlane.f32.xlu0 %v1192_v39  ;;  %v1194_v43 = vsel %vm1187_vm2, %v4764_v41, 0.0 }
  0xf2   : > { %v463_v47 = vadd.f32 %v3448_v31, %v462_v46  ;;  %3787 = vmatprep.mubr.msk.f32.mxu1 %vm546_vm1, %v523_v42  ;;  %v1195_v42 = vsel %vm1187_vm2, %v4761_v40, 0.0 }
  0xf3   : > { %3788 = vmatmul.mubr.msk.f32.gmra.mrb[2].mxu1 %vm546_vm1, %v524_v44  ;;  %v526_v50 = vmax.f32 %v468_v45, 0.0  ;;  %v4773_v44 = vld [vmem:[%s4701_s27 + $0x48] sm:$0xff]  ;;  %v4776_v45 = vld [vmem:[%s4701_s27 + $0x40] sm:$0xff] }
  0xf4   : > { %v525_v48 = vmax.f32 %v463_v47, 0.0  ;;  %v3763_v49 = vpop.f32.mrb[6].mxu0  ;;  %1218 = vadd.xlane.f32.xlu1 %v1195_v42  ;;  %v1197_v46 = vsel %vm1187_vm2, %v4773_v44, 0.0  ;;  %v1196_v47 = vsel %vm1187_vm2, %v4776_v45, 0.0 }
  0xf5   : > { %v478_v51 = vadd.f32 %v3763_v49, %v3448_v31  ;;  %v472_v52 = vpop.f32.mrb[7].mxu0  ;;  %1216 = vadd.xlane.f32.xlu0 %v1194_v43  ;;  %v4788_v49 = vld [vmem:[%s4701_s27 + $0x50] sm:$0xff] }
  0xf6   : > { %v473_v53 = vadd.f32 %v3448_v31, %v472_v52  ;;  %3790 = vmatprep.mubr.msk.f32.mxu1 %vm546_vm1, %v525_v48  ;;  %v4785_v48 = vld [vmem:[%s4701_s27 + $0x58] sm:$0xff]  ;;  %v4797_v52 = vld [vmem:[%s4701_s27 + $0x68] sm:$0xff] }
  0xf7   : > { %3791 = vmatmul.mubr.msk.f32.gmra.mrb[4].mxu1 %vm546_vm1, %v526_v50  ;;  %v528_v56 = vmax.f32 %v478_v51, 0.0  ;;  %v1199_v50 = vsel %vm1187_vm2, %v4785_v48, 0.0  ;;  %v1198_v51 = vsel %vm1187_vm2, %v4788_v49, 0.0 }
  0xf8   : > { %v527_v54 = vmax.f32 %v473_v53, 0.0  ;;  %v3766_v55 = vpop.f32.mrb[8].mxu0  ;;  %1222 = vadd.xlane.f32.xlu1 %v1197_v46  ;;  %v4800_v53 = vld [vmem:[%s4701_s27 + $0x60] sm:$0xff] }
  0xf9   : > { %v488_v57 = vadd.f32 %v3766_v55, %v3448_v31  ;;  %v482_v58 = vpop.f32.mrb[9].mxu0  ;;  %1220 = vadd.xlane.f32.xlu0 %v1196_v47  ;;  %v1200_v55 = vsel %vm1187_vm2, %v4800_v53, 0.0 }
  0xfa   : > { %v483_v59 = vadd.f32 %v3448_v31, %v482_v58  ;;  %3793 = vmatprep.mubr.msk.f32.mxu1 %vm546_vm1, %v527_v54  ;;  %v1201_v54 = vsel %vm1187_vm2, %v4797_v52, 0.0  ;;  %v1403_v58 = vld [vmem:[%s6220_s3 + $0x88] sm:$0xff] }
  0xfb   : > { %3794 = vmatmul.mubr.msk.f32.gmra.mrb[6].mxu1 %vm546_vm1, %v528_v56  ;;  %v530_v62 = vmax.f32 %v488_v57, 0.0  ;;  %v4809_v56 = vld [vmem:[%s4701_s27 + $0x78] sm:$0xff]  ;;  %v4812_v57 = vld [vmem:[%s4701_s27 + $0x70] sm:$0xff] }
  0xfc   : > { %v529_v60 = vmax.f32 %v483_v59, 0.0  ;;  %v3769_v61 = vpop.f32.mrb[10].mxu0  ;;  %1226 = vadd.xlane.f32.xlu1 %v1199_v50  ;;  %v1404_v59 = vld [vmem:[%s6220_s3 + $0x90] sm:$0xff] }
  0xfd   : > { %v498_v63 = vadd.f32 %v3769_v61, %v3448_v31  ;;  %v492_v0 = vpop.f32.mrb[11].mxu0  ;;  %1224 = vadd.xlane.f32.xlu0 %v1198_v51  ;;  %v1203_v61 = vsel %vm1187_vm2, %v4809_v56, 0.0 }
  0xfe   : > { %v493_v1 = vadd.f32 %v3448_v31, %v492_v0  ;;  %3796 = vmatprep.mubr.msk.f32.mxu1 %vm546_vm1, %v529_v60  ;;  %v4074_v60 = vpack.c.bf16 %v1404_v59, %v1403_v58  ;;  %v1406_v0 = vld [vmem:[%s6220_s3 + $0xa0] sm:$0xff] }
  0xff   : > { %3797 = vmatmul.mubr.msk.f32.gmra.mrb[8].mxu1 %vm546_vm1, %v530_v62  ;;  %v532_v4 = vmax.f32 %v498_v63, 0.0  ;;  %v1202_v62 = vsel %vm1187_vm2, %v4812_v57, 0.0  ;;  %v1405_v63 = vld [vmem:[%s6220_s3 + $0x98] sm:$0xff] }
 0x100   : > { %v531_v2 = vmax.f32 %v493_v1, 0.0  ;;  %v3772_v3 = vpop.f32.mrb[12].mxu0  ;;  %1230 = vadd.xlane.f32.xlu1 %v1201_v54  ;;  %v1407_v1 = vld [vmem:[%s6220_s3 + $0xa8] sm:$0xff] }
 0x101   : > { %v508_v5 = vadd.f32 %v3772_v3, %v3448_v31  ;;  %v502_v6 = vpop.f32.mrb[13].mxu0  ;;  %1228 = vadd.xlane.f32.xlu0 %v1200_v55  ;;  %v1408_v3 = vld [vmem:[%s6220_s3 + $0xb0] sm:$0xff] }
 0x102   : > { %v503_v7 = vadd.f32 %v3448_v31, %v502_v6  ;;  %3799 = vmatprep.mubr.msk.f32.mxu1 %vm546_vm1, %v531_v2  ;;  %v4078_v2 = vpack.c.bf16 %v1406_v0, %v1405_v63 }
 0x103   : > { %3800 = vmatmul.mubr.msk.f32.gmra.mrb[10].mxu1 %vm546_vm1, %v532_v4  ;;  %v534_v10 = vmax.f32 %v508_v5, 0.0  ;;  %v4082_v4 = vpack.c.bf16 %v1408_v3, %v1407_v1  ;;  %v3465_v5 = vld [vmem:[%s6221_s4 + $0x1] ss:$0 sm:$0xff] }
 0x104   : > { %v533_v8 = vmax.f32 %v503_v7, 0.0  ;;  %v3775_v9 = vpop.f32.mrb[14].mxu0  ;;  %1234 = vadd.xlane.f32.xlu1 %v1203_v61 }
 0x105   : > { %v518_v11 = vadd.f32 %v3775_v9, %v3448_v31  ;;  %v512_v12 = vpop.f32.mrb[15].mxu0  ;;  %1232 = vadd.xlane.f32.xlu0 %v1202_v62 }
 0x106   : > { %v513_v13 = vadd.f32 %v3448_v31, %v512_v12  ;;  %3802 = vmatprep.mubr.msk.f32.mxu1 %vm546_vm1, %v533_v8  ;;  %v1400_v31 = vld [vmem:[%s6220_s3 + $0x70] sm:$0xff] }
 0x107   : > { %3803 = vmatmul.mubr.msk.f32.gmra.mrb[12].mxu1 %vm546_vm1, %v534_v10  ;;  %v536_v15 = vmax.f32 %v518_v11, 0.0  ;;  %v4066_v36 = vpack.c.bf16 %v1400_v31, %v1399_v28 }
 0x108   : > { %v535_v14 = vmax.f32 %v513_v13, 0.0 }
 0x109   : > { %4067 = vmatprep.subr.bf16.mxu1 %v4066_v36 }
 0x10a   : > { %3805 = vmatprep.mubr.msk.f32.mxu1 %vm546_vm1, %v535_v14  ;;  %4069 = vmatpush3.bf16.msra.mxu1 %v4066_v36 }
 0x10b   : > { %3806 = vmatmul.mubr.msk.f32.gmra.mrb[14].mxu1 %vm546_vm1, %v536_v15  ;;  %4071 = vmatprep.subr.bf16.mxu1 %v4070_v37 }
 0x10e   : > { %4073 = vmatpush3.bf16.msra.mxu1 %v4070_v37 }
 0x10f   : > { %4075 = vmatprep.subr.bf16.mxu1 %v4074_v60 }
 0x112   : > { %4077 = vmatpush3.bf16.msra.mxu1 %v4074_v60 }
 0x113   : > { %4079 = vmatprep.subr.bf16.mxu1 %v4078_v2 }
 0x116   : > { %4081 = vmatpush3.bf16.msra.mxu1 %v4078_v2 }
 0x117   : > { %4083 = vmatprep.subr.bf16.mxu1 %v4082_v4 }
 0x11a   : > { %4085 = vmatpush3.bf16.msra.mxu1 %v4082_v4 }
 0x1c2   : > { %v3786_v6 = vpop.f32.mrb[0].mxu1 }
 0x1c3   : > { %v4841_v7 = vadd.f32 %v3786_v6, %v3465_v5  ;;  %v661_v8 = vpop.f32.mrb[1].mxu1 }
 0x1c4   : > { %v4843_v9 = vadd.f32 %v3465_v5, %v661_v8  ;;  %v288_v8 = vld [vmem:[%s4931_s9] sm:$0xff] }
 0x1c5   : > { %v6238_v12 = vmax.f32 %v4841_v7, 0.0 }
 0x1c6   : > { %v6237_v10 = vmax.f32 %v4843_v9, 0.0  ;;  %v3789_v11 = vpop.f32.mrb[2].mxu1 }
 0x1c7   : > { %v4847_v13 = vadd.f32 %v3789_v11, %v3465_v5  ;;  %v671_v14 = vpop.f32.mrb[3].mxu1  ;;  %v289_v11 = vld [vmem:[%s4931_s9 + $0x8] sm:$0xff] }
 0x1c8   : > { %v4849_v15 = vadd.f32 %v3465_v5, %v671_v14  ;;  %3816 = vmatprep.mubr.msk.f32.mxu0 %vm546_vm1, %v6237_v10  ;;  %v290_v14 = vld [vmem:[%s4931_s9 + $0x10] sm:$0xff] }
 0x1c9   : > { %3817 = vmatmul.mubr.msk.f32.vlgmr.msra.gmra.mrb[16].mxu0 %vm546_vm1, %v6238_v12  ;;  %v6235_v19 = vmax.f32 %v4847_v13, 0.0 }
 0x1ca   : > { %v6236_v17 = vmax.f32 %v4849_v15, 0.0  ;;  %3841 = vmatpush3.msra.mxu0 %v4694_v16  ;;  %v3792_v18 = vpop.f32.mrb[4].mxu1 }
 0x1cb   : > { %v4860_v20 = vadd.f32 %v3792_v18, %v3465_v5  ;;  %v681_v26 = vpop.f32.mrb[5].mxu1  ;;  %v291_v18 = vld [vmem:[%s4931_s9 + $0x18] sm:$0xff] }
 0x1cc   : > { %v4862_v27 = vadd.f32 %v3465_v5, %v681_v26  ;;  %3819 = vmatprep.mubr.msk.f32.mxu0 %vm546_vm1, %v6236_v17  ;;  %v292_v26 = vld [vmem:[%s4931_s9 + $0x20] sm:$0xff] }
 0x1cd   : > { %3820 = vmatmul.mubr.msk.f32.gmra.mrb[18].mxu0 %vm546_vm1, %v6235_v19  ;;  %v6233_v16 = vmax.f32 %v4860_v20, 0.0 }
 0x1ce   : > { %v6234_v28 = vmax.f32 %v4862_v27, 0.0  ;;  %v3795_v29 = vpop.f32.mrb[6].mxu1 }
 0x1cf   : > { %v4872_v30 = vadd.f32 %v3795_v29, %v3465_v5  ;;  %v691_v31 = vpop.f32.mrb[7].mxu1  ;;  %v293_v29 = vld [vmem:[%s4931_s9 + $0x28] sm:$0xff] }
 0x1d0   : > { %v4874_v32 = vadd.f32 %v3465_v5, %v691_v31  ;;  %3822 = vmatprep.mubr.msk.f32.mxu0 %vm546_vm1, %v6234_v28  ;;  %v294_v31 = vld [vmem:[%s4931_s9 + $0x30] sm:$0xff] }
 0x1d1   : > { %3823 = vmatmul.mubr.msk.f32.gmra.mrb[20].mxu0 %vm546_vm1, %v6233_v16  ;;  %v6231_v37 = vmax.f32 %v4872_v30, 0.0 }
 0x1d2   : > { %v6232_v35 = vmax.f32 %v4874_v32, 0.0  ;;  %v3798_v36 = vpop.f32.mrb[8].mxu1 }
 0x1d3   : > { %v4884_v38 = vadd.f32 %v3798_v36, %v3465_v5  ;;  %v701_v39 = vpop.f32.mrb[9].mxu1  ;;  %v295_v36 = vld [vmem:[%s4931_s9 + $0x38] sm:$0xff] }
 0x1d4   : > { %v4886_v42 = vadd.f32 %v3465_v5, %v701_v39  ;;  %3825 = vmatprep.mubr.msk.f32.mxu0 %vm546_vm1, %v6232_v35  ;;  %v296_v39 = vld [vmem:[%s4931_s9 + $0x40] sm:$0xff] }
 0x1d5   : > { %3826 = vmatmul.mubr.msk.f32.gmra.mrb[22].mxu0 %vm546_vm1, %v6231_v37  ;;  %v6229_v47 = vmax.f32 %v4884_v38, 0.0 }
 0x1d6   : > { %v6230_v43 = vmax.f32 %v4886_v42, 0.0  ;;  %v3801_v46 = vpop.f32.mrb[10].mxu1 }
 0x1d7   : > { %v4896_v50 = vadd.f32 %v3801_v46, %v3465_v5  ;;  %v711_v51 = vpop.f32.mrb[11].mxu1  ;;  %v297_v46 = vld [vmem:[%s4931_s9 + $0x48] sm:$0xff] }
 0x1d8   : > { %v4898_v54 = vadd.f32 %v3465_v5, %v711_v51  ;;  %3828 = vmatprep.mubr.msk.f32.mxu0 %vm546_vm1, %v6230_v43  ;;  %v298_v51 = vld [vmem:[%s4931_s9 + $0x50] sm:$0xff] }
 0x1d9   : > { %3829 = vmatmul.mubr.msk.f32.gmra.mrb[24].mxu0 %vm546_vm1, %v6229_v47  ;;  %v6227_v59 = vmax.f32 %v4896_v50, 0.0 }
 0x1da   : > { %v6228_v55 = vmax.f32 %v4898_v54, 0.0  ;;  %v3804_v58 = vpop.f32.mrb[12].mxu1 }
 0x1db   : > { %v4908_v60 = vadd.f32 %v3804_v58, %v3465_v5  ;;  %v721_v61 = vpop.f32.mrb[13].mxu1  ;;  %v299_v58 = vld [vmem:[%s4931_s9 + $0x58] sm:$0xff] }
 0x1dc   : > { %v4910_v62 = vadd.f32 %v3465_v5, %v721_v61  ;;  %3831 = vmatprep.mubr.msk.f32.mxu0 %vm546_vm1, %v6228_v55  ;;  %v300_v61 = vld [vmem:[%s4931_s9 + $0x60] sm:$0xff] }
 0x1dd   : > { %3832 = vmatmul.mubr.msk.f32.gmra.mrb[26].mxu0 %vm546_vm1, %v6227_v59  ;;  %v6225_v1 = vmax.f32 %v4908_v60, 0.0 }
 0x1de   : > { %v6226_v63 = vmax.f32 %v4910_v62, 0.0  ;;  %v3807_v0 = vpop.f32.mrb[14].mxu1 }
 0x1df   : > { %v4920_v2 = vadd.f32 %v3807_v0, %v3465_v5  ;;  %v731_v3 = vpop.f32.mrb[15].mxu1  ;;  %v301_v0 = vld [vmem:[%s4931_s9 + $0x68] sm:$0xff] }
 0x1e0   : > { %v4922_v4 = vadd.f32 %v3465_v5, %v731_v3  ;;  %3834 = vmatprep.mubr.msk.f32.mxu0 %vm546_vm1, %v6226_v63  ;;  %v302_v3 = vld [vmem:[%s4931_s9 + $0x70] sm:$0xff] }
 0x1e1   : > { %3835 = vmatmul.mubr.msk.f32.gmra.mrb[28].mxu0 %vm546_vm1, %v6225_v1  ;;  %v6223_v6 = vmax.f32 %v4920_v2, 0.0 }
 0x1e2   : > { %v6224_v5 = vmax.f32 %v4922_v4, 0.0 }
 0x1e4   : > { %3837 = vmatprep.mubr.msk.f32.mxu0 %vm546_vm1, %v6224_v5 }
 0x1e5   : > { %3838 = vmatmul.mubr.msk.f32.gmra.mrb[30].mxu0 %vm546_vm1, %v6223_v6 }
 0x1e6   : > { %3842 = vmatprep.mubr.msk.f32.mxu0 %vm954_vm3, %v288_v8  ;;  %v303_v8 = vld [vmem:[%s4931_s9 + $0x78] sm:$0xff] }
 0x1e9   : > { %3843 = vmatmul.mubr.msk.f32.vlgmr.msra.gmra.mrb[16].mxu0 %vm954_vm3, %v289_v11  ;;  %v1409_v11 = vld [vmem:[%s6220_s3 + $0xb8] sm:$0xff] }
 0x1ea   : > { %3845 = vmatprep.mubr.msk.f32.mxu0 %vm954_vm3, %v290_v14  ;;  %v1410_v14 = vld [vmem:[%s6220_s3 + $0xc0] sm:$0xff] }
 0x1ed   : > { %3846 = vmatmul.mubr.msk.f32.gmra.mrb[18].mxu0 %vm954_vm3, %v291_v18  ;;  %v4086_v18 = vpack.c.bf16 %v1410_v14, %v1409_v11 }
 0x1ee   : > { %3848 = vmatprep.mubr.msk.f32.mxu0 %vm954_vm3, %v292_v26  ;;  %v1411_v26 = vld [vmem:[%s6220_s3 + $0xc8] sm:$0xff] }
 0x1ef   : > { %4087 = vmatprep.subr.bf16.mxu1 %v4086_v18 }
 0x1f0   : > { %4089 = vmatpush3.bf16.msra.mxu1 %v4086_v18 }
 0x1f1   : > { %3849 = vmatmul.mubr.msk.f32.gmra.mrb[20].mxu0 %vm954_vm3, %v293_v29  ;;  %v1412_v29 = vld [vmem:[%s6220_s3 + $0xd0] sm:$0xff] }
 0x1f2   : > { %3851 = vmatprep.mubr.msk.f32.mxu0 %vm954_vm3, %v294_v31  ;;  %v4090_v31 = vpack.c.bf16 %v1412_v29, %v1411_v26 }
 0x1f4   : > { %4091 = vmatprep.subr.bf16.mxu1 %v4090_v31 }
 0x1f5   : > { %3852 = vmatmul.mubr.msk.f32.gmra.mrb[22].mxu0 %vm954_vm3, %v295_v36  ;;  %4093 = vmatpush3.bf16.msra.mxu1 %v4090_v31  ;;  %v1579_v36 = vld [vmem:[%s6220_s3 + $0xd8] sm:$0xff] }
 0x1f6   : > { %3854 = vmatprep.mubr.msk.f32.mxu0 %vm954_vm3, %v296_v39  ;;  %v1580_v39 = vld [vmem:[%s6220_s3 + $0xe0] sm:$0xff] }
 0x1f9   : > { %3855 = vmatmul.mubr.msk.f32.gmra.mrb[24].mxu0 %vm954_vm3, %v297_v46  ;;  %v4994_v46 = vpack.c.bf16 %v1580_v39, %v1579_v36 }
 0x1fa   : > { %3857 = vmatprep.mubr.msk.f32.mxu0 %vm954_vm3, %v298_v51  ;;  %v1209_v51 = vpop.xlane.xlu1 %1208 }
 0x1fb   : > { %4095 = vmatprep.subr.bf16.mxu1 %v4994_v46  ;;  %v1238_v14 = vsub.f32 4.0, %v1209_v51 }
 0x1fd   : > { %3858 = vmatmul.mubr.msk.f32.gmra.mrb[26].mxu0 %vm954_vm3, %v299_v58  ;;  %v1205_v58 = vpop.xlane.xlu0 %1204  ;;  %v1254_v5 = vsub.f32 64.0, %v1238_v14 }
 0x1fe   : > { %3860 = vmatprep.mubr.msk.f32.mxu0 %vm954_vm3, %v300_v61  ;;  %v1211_v61 = vpop.xlane.xlu1 %1210  ;;  %v1236_v11 = vsub.f32 4.0, %v1205_v58 }
 0x1ff   : > { %v1239_v26 = vsub.f32 4.0, %v1211_v61  ;;  %v1271_v43 = vmul.f32 0.008064516, %v1254_v5 }
 0x200   : > { %v1252_v6 = vsub.f32 64.0, %v1236_v11 }
 0x201   : > { %3861 = vmatmul.mubr.msk.f32.gmra.mrb[28].mxu0 %vm954_vm3, %v301_v0  ;;  %v1207_v0 = vpop.xlane.xlu0 %1206  ;;  %v1255_v63 = vsub.f32 64.0, %v1239_v26  ;;  %v1287_v17 = vsub.f32 1.0, %v1271_v43 }
 0x202   : > { %3863 = vmatprep.mubr.msk.f32.mxu0 %vm954_vm3, %v302_v3  ;;  %v1215_v3 = vpop.xlane.xlu1 %1214  ;;  %v1237_v18 = vsub.f32 4.0, %v1207_v0  ;;  %v1269_v47 = vmul.f32 0.008064516, %v1252_v6  ;;  %v5008_v6 = vld [vmem:[%s6221_s4 + $0x2] ss:$0 sm:$0xff] }
 0x203   : > { %v1241_v36 = vsub.f32 4.0, %v1215_v3  ;;  %v1272_v35 = vmul.f32 0.008064516, %v1255_v63  ;;  %vm1303_vm5 = vcmp.lt.f32.partialorder %v4715_v23, %v1287_v17 }
 0x204   : > { %v1253_v1 = vsub.f32 64.0, %v1237_v18  ;;  %v1285_v19 = vsub.f32 1.0, %v1269_v47 }
 0x205   : > { %3864 = vmatmul.mubr.msk.f32.gmra.mrb[30].mxu0 %vm954_vm3, %v303_v8  ;;  %v1213_v8 = vpop.xlane.xlu0 %1212  ;;  %v1257_v16 = vsub.f32 64.0, %v1241_v36  ;;  %v1288_v14 = vsub.f32 1.0, %v1272_v35 }
 0x206   : > { %v1219_v29 = vpop.xlane.xlu1 %1218  ;;  %v1240_v39 = vsub.f32 4.0, %v1213_v8  ;;  %v1270_v37 = vmul.f32 0.008064516, %v1253_v1  ;;  %vm1301_vm4 = vcmp.lt.f32.partialorder %v4710_v21, %v1285_v19 }
 0x207   : > { %v1243_v59 = vsub.f32 4.0, %v1219_v29  ;;  %v1274_v18 = vmul.f32 0.008064516, %v1257_v16  ;;  %vm1304_vm7 = vcmp.lt.f32.partialorder %v4722_v25, %v1288_v14  ;;  %v4557_v16 = vmov 0.0  }
 0x208   : > { %v1256_v28 = vsub.f32 64.0, %v1240_v39  ;;  %v1286_v11 = vsub.f32 1.0, %v1270_v37  ;;  %v3518_v19 = vsel %vm1304_vm7, 1.0, %v4557_v16  ;;  %v3517_v17 = vsel %vm1303_vm5, 1.0, %v4557_v16 }
 0x209   : > { %v1217_v31 = vpop.xlane.xlu0 %1216  ;;  %v1259_v51 = vsub.f32 64.0, %v1243_v59  ;;  %v1290_v47 = vsub.f32 1.0, %v1274_v18 }
 0x20a   : > { %v1242_v55 = vsub.f32 4.0, %v1217_v31  ;;  %v1223_v58 = vpop.xlane.xlu1 %1222  ;;  %v1273_v26 = vmul.f32 0.008064516, %v1256_v28  ;;  %vm1302_vm6 = vcmp.lt.f32.partialorder %v4719_v24, %v1286_v11  ;;  %v3515_v28 = vsel %vm1301_vm4, 1.0, %v4557_v16 }
 0x20b   : > { %v1276_v3 = vmul.f32 0.008064516, %v1259_v51  ;;  %v1245_v29 = vsub.f32 4.0, %v1223_v58  ;;  %v3516_v59 = vsel %vm1302_vm6, 1.0, %v4557_v16  ;;  %vm5011_vm8 = vcmp.lt.f32.partialorder %v4746_v33, %v1290_v47 }
 0x20c   : > { %v1258_v0 = vsub.f32 64.0, %v1242_v55  ;;  %v1289_v43 = vsub.f32 1.0, %v1273_v26  ;;  %v1350_v26 = vsel %vm1187_vm2, %v4719_v24, %v3516_v59 }
 0x20d   : > { %v1221_v61 = vpop.xlane.xlu0 %1220  ;;  %v1292_v37 = vsub.f32 1.0, %v1276_v3  ;;  %v1261_v55 = vsub.f32 64.0, %v1245_v29  ;;  %v1352_v3 = vsel %vm1187_vm2, %v4722_v25, %v3518_v19 }
 0x20e   : > { %v1275_v8 = vmul.f32 0.008064516, %v1258_v0  ;;  %v1227_v31 = vpop.xlane.xlu1 %1226  ;;  %v1244_v63 = vsub.f32 4.0, %v1221_v61  ;;  %vm5016_vm9 = vcmp.lt.f32.partialorder %v4749_v34, %v1289_v43  ;;  %v1349_v0 = vsel %vm1187_vm2, %v4710_v21, %v3515_v28 }
 0x20f   : > { %v1247_v58 = vsub.f32 4.0, %v1227_v31  ;;  %vm1308_vm10 = vcmp.lt.f32.partialorder %v4761_v40, %v1292_v37  ;;  %v1351_v21 = vsel %vm1187_vm2, %v4715_v23, %v3517_v17  ;;  %v3519_v24 = vsel %vm5016_vm9, 1.0, %v4557_v16 }
 0x210   : > { %v1291_v35 = vsub.f32 1.0, %v1275_v8  ;;  %v1260_v5 = vsub.f32 64.0, %v1244_v63  ;;  %v1278_v8 = vmul.f32 0.008064516, %v1261_v55  ;;  %v3520_v63 = vsel %vm5011_vm8, 1.0, %v4557_v16 }
 0x211   : > { %v1225_v1 = vpop.xlane.xlu0 %1224  ;;  %v3522_v25 = vsel %vm1308_vm10, 1.0, %v4557_v16  ;;  %v1263_v43 = vsub.f32 64.0, %v1247_v58  ;;  %v1354_v17 = vsel %vm1187_vm2, %v4746_v33, %v3520_v63  ;;  %v1353_v36 = vsel %vm1187_vm2, %v4749_v34, %v3519_v24  ;;  %v1581_v34 = vld [vmem:[%s6220_s3 + $0xe8] sm:$0xff] }
 0x212   : > { %v1231_v51 = vpop.xlane.xlu1 %1230  ;;  %vm5025_vm11 = vcmp.lt.f32.partialorder %v4764_v41, %v1291_v35  ;;  %v1246_v11 = vsub.f32 4.0, %v1225_v1  ;;  %v1277_v1 = vmul.f32 0.008064516, %v1260_v5  ;;  %v1294_v5 = vsub.f32 1.0, %v1278_v8 }
 0x213   : > { %v3521_v23 = vsel %vm5025_vm11, 1.0, %v4557_v16  ;;  %v1249_v28 = vsub.f32 4.0, %v1231_v51  ;;  %v1356_v51 = vsel %vm1187_vm2, %v4761_v40, %v3522_v25  ;;  %v1280_v33 = vmul.f32 0.008064516, %v1263_v43 }
 0x214   : > { %v1262_v35 = vsub.f32 64.0, %v1246_v11  ;;  %v1355_v8 = vsel %vm1187_vm2, %v4764_v41, %v3521_v23  ;;  %vm5072_vm12 = vcmp.lt.f32.partialorder %v4773_v44, %v1294_v5  ;;  %vm2208_vm8 = vcmask 785408  }
 0x215   : > { %v1229_v14 = vpop.xlane.xlu0 %1228  ;;  %v1265_v40 = vsub.f32 64.0, %v1249_v28  ;;  %vm2567_vm9 = vcmask 130112   ;;  %vm2808_vm10 = vcmask 195712   ;;  %vm3049_vm11 = vcmask 261312  }
 0x216   : > { %v1248_v55 = vsub.f32 4.0, %v1229_v14  ;;  %v1235_v39 = vpop.xlane.xlu1 %1234  ;;  %v1279_v24 = vmul.f32 0.008064516, %v1262_v35 }
 0x217   : > { %v1251_v43 = vsub.f32 4.0, %v1235_v39 }
 0x218   : > { %v1295_v39 = vsub.f32 1.0, %v1279_v24 }
 0x219   : > { %v1233_v11 = vpop.xlane.xlu0 %1232 }
 0x21a   : > { %vm5097_vm15 = vcmp.lt.f32.partialorder %v4788_v49, %v1295_v39 }
 0x2bc   : > { %v3844_v18 = vpop.f32.mrb[16].mxu0 }
 0x2bd   : > { %v1154_v29 = vadd.f32 %v3844_v18, %v5008_v6  ;;  %v1069_v31 = vpop.f32.mrb[17].mxu0 }
 0x2be   : > { %v1153_v47 = vadd.f32 %v5008_v6, %v1069_v31 }
 0x2bf   : > { %v1170_v37 = vmax.f32 %v1154_v29, 0.0  ;;  %v1293_v29 = vsub.f32 1.0, %v1277_v1  ;;  %v1264_v1 = vsub.f32 64.0, %v1248_v55 }
 0x2c0   : > { %v1169_v59 = vmax.f32 %v1153_v47, 0.0  ;;  %v3847_v19 = vpop.f32.mrb[18].mxu0 }
 0x2c1   : > { %v1366_v58 = vmul.f32 %v1350_v26, %v1170_v37  ;;  %v1156_v61 = vadd.f32 %v3847_v19, %v5008_v6  ;;  %v1079_v18 = vpop.f32.mrb[19].mxu0  ;;  %v1582_v26 = vld [vmem:[%s6220_s3 + $0xf0] sm:$0xff]  ;;  %v1250_v37 = vsub.f32 4.0, %v1233_v11  ;;  %vm5078_vm13 = vcmp.lt.f32.partialorder %v4776_v45, %v1293_v29 }
 0x2c2   : > { %v1365_v14 = vmul.f32 %v1349_v0, %v1169_v59  ;;  %v1155_v31 = vadd.f32 %v5008_v6, %v1079_v18  ;;  %v4098_v18 = vpack.c.bf16 %v1582_v26, %v1581_v34  ;;  %v1281_v5 = vmul.f32 0.008064516, %v1264_v1 }
 0x2c3   : > { %v1172_v63 = vmax.f32 %v1156_v61, 0.0  ;;  %v1382_v59 = vmul.f32 2.0, %v1366_v58  ;;  %v1282_v58 = vmul.f32 0.008064516, %v1265_v40 }
 0x2c4   : > { %v1381_v0 = vmul.f32 2.0, %v1365_v14  ;;  %v1171_v47 = vmax.f32 %v1155_v31, 0.0  ;;  %v3850_v25 = vpop.f32.mrb[20].mxu0  ;;  %v1267_v14 = vsub.f32 64.0, %v1251_v43 }
 0x2c5   : > { %v1368_v19 = vmul.f32 %v1352_v3, %v1172_v63  ;;  %v1158_v41 = vadd.f32 %v3850_v25, %v5008_v6  ;;  %v1089_v23 = vpop.f32.mrb[21].mxu0  ;;  %v1296_v3 = vsub.f32 1.0, %v1280_v33  ;;  %v1266_v63 = vsub.f32 64.0, %v1250_v37 }
 0x2c6   : > { %v1367_v10 = vmul.f32 %v1351_v21, %v1171_v47  ;;  %v1157_v35 = vadd.f32 %v5008_v6, %v1089_v23  ;;  %3898 = vmatprep.mubr.f32.mxu1 %v1381_v0  ;;  %v3523_v33 = vsel %vm5078_vm13, 1.0, %v4557_v16  ;;  %v1298_v24 = vsub.f32 1.0, %v1282_v58 }
 0x2c7   : > { %v1174_v55 = vmax.f32 %v1158_v41, 0.0  ;;  %3899 = vmatmul.mubr.f32.vlgmr.msra.gmra.mrb[16].mxu1 %v1382_v59  ;;  %v1384_v31 = vmul.f32 2.0, %v1368_v19  ;;  %vm5092_vm14 = vcmp.lt.f32.partialorder %v4785_v48, %v1296_v3  ;;  %v1297_v25 = vsub.f32 1.0, %v1281_v5 }
 0x2c8   : > { %v1383_v61 = vmul.f32 2.0, %v1367_v10  ;;  %v1173_v21 = vmax.f32 %v1157_v35, 0.0  ;;  %v3853_v11 = vpop.f32.mrb[22].mxu0  ;;  %4097 = vmatpush3.bf16.msra.mxu1 %v4994_v46  ;;  %v3524_v10 = vsel %vm5072_vm12, 1.0, %v4557_v16  ;;  %v1284_v43 = vmul.f32 0.008064516, %v1267_v14 }
 0x2c9   : > { %v1370_v34 = vmul.f32 %v1354_v17, %v1174_v55  ;;  %v1160_v29 = vadd.f32 %v3853_v11, %v5008_v6  ;;  %v1099_v26 = vpop.f32.mrb[23].mxu0  ;;  %4099 = vmatprep.subr.bf16.mxu1 %v4098_v18  ;;  %v1283_v23 = vmul.f32 0.008064516, %v1266_v63  ;;  %v1358_v28 = vsel %vm1187_vm2, %v4773_v44, %v3524_v10 }
 0x2ca   : > { %v1369_v0 = vmul.f32 %v1353_v36, %v1173_v21  ;;  %v1159_v47 = vadd.f32 %v5008_v6, %v1099_v26  ;;  %3901 = vmatprep.mubr.f32.mxu1 %v1383_v61  ;;  %v1357_v3 = vsel %vm1187_vm2, %v4776_v45, %v3523_v33  ;;  %vm5110_vm4 = vcmp.lt.f32.partialorder %v4797_v52, %v1298_v24 }
 0x2cb   : > { %v1176_v46 = vmax.f32 %v1160_v29, 0.0  ;;  %3902 = vmatmul.mubr.f32.gmra.mrb[18].mxu1 %v1384_v31  ;;  %v1386_v37 = vmul.f32 2.0, %v1370_v34  ;;  %v3525_v44 = vsel %vm5097_vm15, 1.0, %v4557_v16  ;;  %vm5121_vm5 = vcmp.lt.f32.partialorder %v4800_v53, %v1297_v25 }
 0x2cc   : > { %v1385_v40 = vmul.f32 2.0, %v1369_v0  ;;  %v1175_v12 = vmax.f32 %v1159_v47, 0.0  ;;  %v3856_v1 = vpop.f32.mrb[24].mxu0  ;;  %4101 = vmatpush3.bf16.msra.mxu1 %v4098_v18  ;;  %v1300_v21 = vsub.f32 1.0, %v1284_v43  ;;  %v1299_v34 = vsub.f32 1.0, %v1283_v23 }
 0x2cd   : > { %v1372_v59 = vmul.f32 %v1356_v51, %v1176_v46  ;;  %v1162_v19 = vadd.f32 %v3856_v1, %v5008_v6  ;;  %v1109_v41 = vpop.f32.mrb[25].mxu0  ;;  %v1359_v47 = vsel %vm1187_vm2, %v4788_v49, %v3525_v44  ;;  %v3528_v10 = vsel %vm5110_vm4, 1.0, %v4557_v16 }
 0x2ce   : > { %v1371_v35 = vmul.f32 %v1355_v8, %v1175_v12  ;;  %v1161_v55 = vadd.f32 %v5008_v6, %v1109_v41  ;;  %3904 = vmatprep.mubr.f32.mxu1 %v1385_v40  ;;  %v3526_v8 = vsel %vm5092_vm14, 1.0, %v4557_v16  ;;  %vm5137_vm6 = vcmp.lt.f32.partialorder %v4809_v56, %v1300_v21 }
 0x2cf   : > { %v1178_v39 = vmax.f32 %v1162_v19, 0.0  ;;  %3905 = vmatmul.mubr.f32.gmra.mrb[20].mxu1 %v1386_v37  ;;  %v1388_v11 = vmul.f32 2.0, %v1372_v59  ;;  %v1360_v26 = vsel %vm1187_vm2, %v4785_v48, %v3526_v8  ;;  %v3527_v36 = vsel %vm5121_vm5, 1.0, %v4557_v16 }
 0x2d0   : > { %v1387_v18 = vmul.f32 2.0, %v1371_v35  ;;  %v1177_v58 = vmax.f32 %v1161_v55, 0.0  ;;  %v3859_v61 = vpop.f32.mrb[26].mxu0  ;;  %vm1315_vm7 = vcmp.lt.f32.partialorder %v4812_v57, %v1299_v34  ;;  %v1362_v25 = vsel %vm1187_vm2, %v4797_v52, %v3528_v10 }
 0x2d1   : > { %v1374_v5 = vmul.f32 %v1358_v28, %v1178_v39  ;;  %v1164_v14 = vadd.f32 %v3859_v61, %v5008_v6  ;;  %v1119_v31 = vpop.f32.mrb[27].mxu0  ;;  %v1361_v59 = vsel %vm1187_vm2, %v4800_v53, %v3527_v36  ;;  %v3530_v19 = vsel %vm5137_vm6, 1.0, %v4557_v16 }
 0x2d2   : > { %v1373_v29 = vmul.f32 %v1357_v3, %v1177_v58  ;;  %v1163_v63 = vadd.f32 %v5008_v6, %v1119_v31  ;;  %3907 = vmatprep.mubr.f32.mxu1 %v1387_v18  ;;  %v3529_v28 = vsel %vm1315_vm7, 1.0, %v4557_v16  ;;  %v1364_v53 = vsel %vm1187_vm2, %v4809_v56, %v3530_v19  ;;  %v5168_v56 = vld [vmem:[%s6221_s4 + $0x3] ss:$0 sm:$0xff] }
 0x2d3   : > { %v1180_v0 = vmax.f32 %v1164_v14, 0.0  ;;  %3908 = vmatmul.mubr.f32.gmra.mrb[22].mxu1 %v1388_v11  ;;  %v1390_v24 = vmul.f32 2.0, %v1374_v5  ;;  %v1363_v18 = vsel %vm1187_vm2, %v4812_v57, %v3529_v28  ;;  %vm2191_vm2 = vcmask 523264  }
 0x2d4   : > { %v1389_v33 = vmul.f32 2.0, %v1373_v29  ;;  %v1179_v48 = vmax.f32 %v1163_v63, 0.0  ;;  %v3862_v17 = vpop.f32.mrb[28].mxu0  ;;  %vm3322_vm12 = vcmask 195584  }
 0x2d5   : > { %v1376_v40 = vmul.f32 %v1360_v26, %v1180_v0  ;;  %v1166_v49 = vadd.f32 %v3862_v17, %v5008_v6  ;;  %v1129_v12 = vpop.f32.mrb[29].mxu0 }
 0x2d6   : > { %v1375_v1 = vmul.f32 %v1359_v47, %v1179_v48  ;;  %v1165_v43 = vadd.f32 %v5008_v6, %v1129_v12  ;;  %3910 = vmatprep.mubr.f32.mxu1 %v1389_v33 }
 0x2d7   : > { %v1182_v37 = vmax.f32 %v1166_v49, 0.0  ;;  %3911 = vmatmul.mubr.f32.gmra.mrb[24].mxu1 %v1390_v24  ;;  %v1392_v55 = vmul.f32 2.0, %v1376_v40 }
 0x2d8   : > { %v1391_v41 = vmul.f32 2.0, %v1375_v1  ;;  %v1181_v23 = vmax.f32 %v1165_v43, 0.0  ;;  %v3865_v35 = vpop.f32.mrb[30].mxu0 }
 0x2d9   : > { %v1378_v52 = vmul.f32 %v1362_v25, %v1182_v37  ;;  %v1168_v3 = vadd.f32 %v3865_v35, %v5008_v6  ;;  %v1139_v39 = vpop.f32.mrb[31].mxu0 }
 0x2da   : > { %v1377_v51 = vmul.f32 %v1361_v59, %v1181_v23  ;;  %v1167_v8 = vadd.f32 %v5008_v6, %v1139_v39  ;;  %3913 = vmatprep.mubr.f32.mxu1 %v1391_v41 }
 0x2db   : > { %v1184_v44 = vmax.f32 %v1168_v3, 0.0  ;;  %3914 = vmatmul.mubr.f32.gmra.mrb[26].mxu1 %v1392_v55  ;;  %v1394_v45 = vmul.f32 2.0, %v1378_v52 }
 0x2dc   : > { %v1393_v16 = vmul.f32 2.0, %v1377_v51  ;;  %v1183_v58 = vmax.f32 %v1167_v8, 0.0 }
 0x2dd   : > { %v1380_v61 = vmul.f32 %v1364_v53, %v1184_v44 }
 0x2de   : > { %v1379_v21 = vmul.f32 %v1363_v18, %v1183_v58  ;;  %3916 = vmatprep.mubr.f32.mxu1 %v1393_v16  ;;  %v1797_v16 = vld [vmem:[%s6220_s3 + $0xf8] sm:$0xff]  ;;  %v1798_v58 = vld [vmem:[%s6220_s3 + $0x100] sm:$0xff] }
 0x2df   : > { %3917 = vmatmul.mubr.f32.gmra.mrb[28].mxu1 %v1394_v45  ;;  %v1396_v5 = vmul.f32 2.0, %v1380_v61  ;;  %v1799_v45 = vld [vmem:[%s6220_s3 + $0x108] sm:$0xff] }
 0x2e0   : > { %v1395_v11 = vmul.f32 2.0, %v1379_v21 }
 0x2e2   : > { %3919 = vmatprep.mubr.f32.mxu1 %v1395_v11  ;;  %v4102_v11 = vpack.c.bf16 %v1798_v58, %v1797_v16 }
 0x2e3   : > { %3920 = vmatmul.mubr.f32.gmra.mrb[30].mxu1 %v1396_v5  ;;  %v1800_v5 = vld [vmem:[%s6220_s3 + $0x110] sm:$0xff] }
 0x2e4   : > { %4103 = vmatprep.subr.bf16.mxu0 %v4102_v11 }
 0x2e5   : > { %4105 = vmatpush3.bf16.msra.mxu0 %v4102_v11 }
 0x39a   : > { %v3900_v6 = vpop.f32.mrb[16].mxu1 }
 0x39b   : > { %v1490_v22 = vadd.f32 %v3900_v6, %v5168_v56  ;;  %v1484_v57 = vpop.f32.mrb[17].mxu1 }
 0x39c   : > { %v1485_v14 = vadd.f32 %v5168_v56, %v1484_v57  ;;  %v4106_v57 = vpack.c.bf16 %v1800_v5, %v1799_v45 }
 0x39d   : > { %v1564_v31 = vmax.f32 %v1490_v22, 0.0 }
 0x39e   : > { %v1563_v34 = vmax.f32 %v1485_v14, 0.0  ;;  %v3903_v29 = vpop.f32.mrb[18].mxu1  ;;  %4107 = vmatprep.subr.bf16.mxu0 %v4106_v57 }
 0x39f   : > { %v1500_v26 = vadd.f32 %v3903_v29, %v5168_v56  ;;  %v1494_v63 = vpop.f32.mrb[19].mxu1  ;;  %4109 = vmatpush3.bf16.msra.mxu0 %v4106_v57 }
 0x3a0   : > { %v4173_v0 = vpack.i.bf16 %v1564_v31, %v1563_v34  ;;  %v1495_v47 = vadd.f32 %v5168_v56, %v1494_v63  ;;  %3930 = vmatprep.mubr.msk.f32.mxu1 %vm546_vm1, %v1563_v34 }
 0x3a1   : > { %v1566_v10 = vmax.f32 %v1500_v26, 0.0  ;;  %3931 = vmatmul.mubr.msk.f32.vlgmr.msra.gmra.mrb[32].mxu1 %vm546_vm1, %v1564_v31 }
 0x3a2   : > { %v1565_v33 = vmax.f32 %v1495_v47, 0.0  ;;  %4174 = vrot.lane.b32.xlu0 %v4173_v0, %s4558_s7  ;;  %v3906_v46 = vpop.f32.mrb[20].mxu1 }
 0x3a3   : > { %v1510_v48 = vadd.f32 %v3906_v46, %v5168_v56  ;;  %v1504_v17 = vpop.f32.mrb[21].mxu1 }
 0x3a4   : > { %v4178_v36 = vpack.i.bf16 %v1566_v10, %v1565_v33  ;;  %v1505_v24 = vadd.f32 %v5168_v56, %v1504_v17  ;;  %3933 = vmatprep.mubr.msk.f32.mxu1 %vm546_vm1, %v1565_v33 }
 0x3a5   : > { %v1568_v40 = vmax.f32 %v1510_v48, 0.0  ;;  %3934 = vmatmul.mubr.msk.f32.gmra.mrb[34].mxu1 %vm546_vm1, %v1566_v10 }
 0x3a6   : > { %v1567_v49 = vmax.f32 %v1505_v24, 0.0  ;;  %4179 = vrot.lane.b32.xlu1 %v4178_v36, %s4558_s7  ;;  %v3909_v12 = vpop.f32.mrb[22].mxu1 }
 0x3a7   : > { %v1520_v1 = vadd.f32 %v3909_v12, %v5168_v56  ;;  %v1514_v25 = vpop.f32.mrb[23].mxu1 }
 0x3a8   : > { %v4183_v43 = vpack.i.bf16 %v1568_v40, %v1567_v49  ;;  %v1515_v37 = vadd.f32 %v5168_v56, %v1514_v25  ;;  %3936 = vmatprep.mubr.msk.f32.mxu1 %vm546_vm1, %v1567_v49 }
 0x3a9   : > { %v1570_v59 = vmax.f32 %v1520_v1, 0.0  ;;  %3937 = vmatmul.mubr.msk.f32.gmra.mrb[36].mxu1 %vm546_vm1, %v1568_v40 }
 0x3aa   : > { %v1569_v19 = vmax.f32 %v1515_v37, 0.0  ;;  %4184 = vrot.lane.b32.xlu0 %v4183_v43, %s4558_s7  ;;  %v3912_v41 = vpop.f32.mrb[24].mxu1 }
 0x3ab   : > { %v1530_v23 = vadd.f32 %v3912_v41, %v5168_v56  ;;  %v1524_v35 = vpop.f32.mrb[25].mxu1 }
 0x3ac   : > { %v4188_v28 = vpack.i.bf16 %v1570_v59, %v1569_v19  ;;  %v1525_v55 = vadd.f32 %v5168_v56, %v1524_v35  ;;  %3939 = vmatprep.mubr.msk.f32.mxu1 %vm546_vm1, %v1569_v19 }
 0x3ad   : > { %v1572_v52 = vmax.f32 %v1530_v23, 0.0  ;;  %3940 = vmatmul.mubr.msk.f32.gmra.mrb[38].mxu1 %vm546_vm1, %v1570_v59 }
 0x3ae   : > { %v1571_v3 = vmax.f32 %v1525_v55, 0.0  ;;  %4189 = vrot.lane.b32.xlu1 %v4188_v28, %s4558_s7  ;;  %v3915_v39 = vpop.f32.mrb[26].mxu1 }
 0x3af   : > { %v1540_v51 = vadd.f32 %v3915_v39, %v5168_v56  ;;  %v1534_v53 = vpop.f32.mrb[27].mxu1 }
 0x3b0   : > { %v4193_v8 = vpack.i.bf16 %v1572_v52, %v1571_v3  ;;  %v1535_v44 = vadd.f32 %v5168_v56, %v1534_v53  ;;  %3942 = vmatprep.mubr.msk.f32.mxu1 %vm546_vm1, %v1571_v3 }
 0x3b1   : > { %v1574_v18 = vmax.f32 %v1540_v51, 0.0  ;;  %3943 = vmatmul.mubr.msk.f32.gmra.mrb[40].mxu1 %vm546_vm1, %v1572_v52 }
 0x3b2   : > { %v1573_v61 = vmax.f32 %v1535_v44, 0.0  ;;  %4194 = vrot.lane.b32.xlu0 %v4193_v8, %s4558_s7  ;;  %v3918_v21 = vpop.f32.mrb[28].mxu1 }
 0x3b3   : > { %v1550_v6 = vadd.f32 %v3918_v21, %v5168_v56  ;;  %v1544_v22 = vpop.f32.mrb[29].mxu1 }
 0x3b4   : > { %v4198_v14 = vpack.i.bf16 %v1574_v18, %v1573_v61  ;;  %v1545_v31 = vadd.f32 %v5168_v56, %v1544_v22  ;;  %3945 = vmatprep.mubr.msk.f32.mxu1 %vm546_vm1, %v1573_v61 }
 0x3b5   : > { %v1576_v34 = vmax.f32 %v1550_v6, 0.0  ;;  %3946 = vmatmul.mubr.msk.f32.gmra.mrb[42].mxu1 %vm546_vm1, %v1574_v18 }
 0x3b6   : > { %v1575_v29 = vmax.f32 %v1545_v31, 0.0  ;;  %4199 = vrot.lane.b32.xlu1 %v4198_v14, %s4558_s7  ;;  %v3921_v26 = vpop.f32.mrb[30].mxu1 }
 0x3b7   : > { %v1560_v63 = vadd.f32 %v3921_v26, %v5168_v56  ;;  %v1554_v0 = vpop.f32.mrb[31].mxu1 }
 0x3b8   : > { %v4203_v47 = vpack.i.bf16 %v1576_v34, %v1575_v29  ;;  %v1555_v10 = vadd.f32 %v5168_v56, %v1554_v0  ;;  %3948 = vmatprep.mubr.msk.f32.mxu1 %vm546_vm1, %v1575_v29  ;;  %v5225_v56 = vld [vmem:[%s6221_s4 + $0x4] ss:$0 sm:$0xff] }
 0x3b9   : > { %v1578_v33 = vmax.f32 %v1560_v63, 0.0  ;;  %3949 = vmatmul.mubr.msk.f32.gmra.mrb[44].mxu1 %vm546_vm1, %v1576_v34 }
 0x3ba   : > { %v1577_v46 = vmax.f32 %v1555_v10, 0.0  ;;  %4204 = vrot.lane.b32.xlu0 %v4203_v47, %s4558_s7 }
 0x3bc   : > { %v4208_v48 = vpack.i.bf16 %v1578_v33, %v1577_v46  ;;  %3951 = vmatprep.mubr.msk.f32.mxu1 %vm546_vm1, %v1577_v46 }
 0x3bd   : > { %3952 = vmatmul.mubr.msk.f32.gmra.mrb[46].mxu1 %vm546_vm1, %v1578_v33 }
 0x3be   : > { %4209 = vrot.lane.b32.xlu1 %v4208_v48, %s4558_s7  ;;  %s4560_s7 = smov 96  }
 0x474   : > { %v3932_v17 = vpop.f32.mrb[32].mxu1 }
 0x475   : > { %v1708_v36 = vadd.f32 %v3932_v17, %v5225_v56  ;;  %v1702_v24 = vpop.f32.mrb[33].mxu1 }
 0x476   : > { %v1703_v40 = vadd.f32 %v5225_v56, %v1702_v24 }
 0x477   : > { %v1782_v49 = vmax.f32 %v1708_v36, 0.0 }
 0x478   : > { %v1781_v12 = vmax.f32 %v1703_v40, 0.0  ;;  %v3935_v1 = vpop.f32.mrb[34].mxu1 }
 0x479   : > { %v1718_v25 = vadd.f32 %v3935_v1, %v5225_v56  ;;  %v1712_v43 = vpop.f32.mrb[35].mxu1 }
 0x47a   : > { %v4213_v37 = vpack.i.bf16 %v1782_v49, %v1781_v12  ;;  %v1713_v59 = vadd.f32 %v5225_v56, %v1712_v43  ;;  %3962 = vmatprep.mubr.msk.f32.mxu0 %vm546_vm1, %v1781_v12 }
 0x47b   : > { %v1784_v19 = vmax.f32 %v1718_v25, 0.0  ;;  %3963 = vmatmul.mubr.msk.f32.vlgmr.msra.gmra.mrb[32].mxu0 %vm546_vm1, %v1782_v49 }
 0x47c   : > { %v1783_v41 = vmax.f32 %v1713_v59, 0.0  ;;  %v3938_v23 = vpop.f32.mrb[36].mxu1  ;;  %4214 = vrot.lane.b32.xlu1 %v4213_v37, %s4559_s19  ;;  %v2225_v37 = vld [vmem:[%s6220_s3 + $0x118] sm:$0xff]  ;;  %v2227_v59 = vld [vmem:[%s6220_s3 + $0x128] sm:$0xff] }
 0x47d   : > { %v1728_v35 = vadd.f32 %v3938_v23, %v5225_v56  ;;  %v1722_v28 = vpop.f32.mrb[37].mxu1 }
 0x47e   : > { %v4218_v55 = vpack.i.bf16 %v1784_v19, %v1783_v41  ;;  %v1723_v52 = vadd.f32 %v5225_v56, %v1722_v28  ;;  %3965 = vmatprep.mubr.msk.f32.mxu0 %vm546_vm1, %v1783_v41  ;;  %v2228_v41 = vld [vmem:[%s6220_s3 + $0x130] sm:$0xff]  ;;  %v2230_v28 = vld [vmem:[%s6220_s3 + $0x140] sm:$0xff] }
 0x47f   : > { %v1786_v3 = vmax.f32 %v1728_v35, 0.0  ;;  %3966 = vmatmul.mubr.msk.f32.gmra.mrb[34].mxu0 %vm546_vm1, %v1784_v19  ;;  %v4114_v23 = vpack.c.bf16 %v2228_v41, %v2227_v59  ;;  %v2229_v35 = vld [vmem:[%s6220_s3 + $0x138] sm:$0xff] }
 0x480   : > { %v1785_v39 = vmax.f32 %v1723_v52, 0.0  ;;  %v3941_v51 = vpop.f32.mrb[38].mxu1  ;;  %4219 = vrot.lane.b32.xlu0 %v4218_v55, %s4559_s19  ;;  %v4118_v55 = vpack.c.bf16 %v2230_v28, %v2229_v35  ;;  %v2231_v52 = vld [vmem:[%s6220_s3 + $0x148] sm:$0xff] }
 0x481   : > { %v1738_v53 = vadd.f32 %v3941_v51, %v5225_v56  ;;  %v1732_v8 = vpop.f32.mrb[39].mxu1  ;;  %v2233_v51 = vld [vmem:[%s6220_s3 + $0x158] sm:$0xff] }
 0x482   : > { %v4223_v44 = vpack.i.bf16 %v1786_v3, %v1785_v39  ;;  %v1733_v18 = vadd.f32 %v5225_v56, %v1732_v8  ;;  %3968 = vmatprep.mubr.msk.f32.mxu0 %vm546_vm1, %v1785_v39 }
 0x483   : > { %v1788_v16 = vmax.f32 %v1738_v53, 0.0  ;;  %3969 = vmatmul.mubr.msk.f32.gmra.mrb[36].mxu0 %vm546_vm1, %v1786_v3  ;;  %v2232_v3 = vld [vmem:[%s6220_s3 + $0x150] sm:$0xff]  ;;  %v2234_v53 = vld [vmem:[%s6220_s3 + $0x160] sm:$0xff] }
 0x484   : > { %v1787_v58 = vmax.f32 %v1733_v18, 0.0  ;;  %v3944_v45 = vpop.f32.mrb[40].mxu1  ;;  %4224 = vrot.lane.b32.xlu1 %v4223_v44, %s4559_s19  ;;  %v4122_v39 = vpack.c.bf16 %v2232_v3, %v2231_v52  ;;  %v4126_v8 = vpack.c.bf16 %v2234_v53, %v2233_v51  ;;  %v2235_v44 = vld [vmem:[%s6220_s3 + $0x168] sm:$0xff]  ;;  %v2236_v18 = vld [vmem:[%s6220_s3 + $0x170] sm:$0xff] }
 0x485   : > { %v1748_v61 = vadd.f32 %v3944_v45, %v5225_v56  ;;  %v1742_v21 = vpop.f32.mrb[41].mxu1  ;;  %v2238_v45 = vld [vmem:[%s6220_s3 + $0x180] sm:$0xff] }
 0x486   : > { %v4228_v11 = vpack.i.bf16 %v1788_v16, %v1787_v58  ;;  %v1743_v5 = vadd.f32 %v5225_v56, %v1742_v21  ;;  %3971 = vmatprep.mubr.msk.f32.mxu0 %vm546_vm1, %v1787_v58  ;;  %v2237_v58 = vld [vmem:[%s6220_s3 + $0x178] sm:$0xff]  ;;  %v2239_v21 = vld [vmem:[%s6220_s3 + $0x188] sm:$0xff] }
 0x487   : > { %v1790_v6 = vmax.f32 %v1748_v61, 0.0  ;;  %3972 = vmatmul.mubr.msk.f32.gmra.mrb[38].mxu0 %vm546_vm1, %v1788_v16  ;;  %v4130_v16 = vpack.c.bf16 %v2236_v18, %v2235_v44  ;;  %v4134_v61 = vpack.c.bf16 %v2238_v45, %v2237_v58 }
 0x488   : > { %v1789_v22 = vmax.f32 %v1743_v5, 0.0  ;;  %v3947_v57 = vpop.f32.mrb[42].mxu1  ;;  %4229 = vrot.lane.b32.xlu0 %v4228_v11, %s4559_s19  ;;  %v2240_v11 = vld [vmem:[%s6220_s3 + $0x190] sm:$0xff] }
 0x489   : > { %v1758_v14 = vadd.f32 %v3947_v57, %v5225_v56  ;;  %v1752_v31 = vpop.f32.mrb[43].mxu1  ;;  %v4138_v5 = vpack.c.bf16 %v2240_v11, %v2239_v21 }
 0x48a   : > { %v4233_v34 = vpack.i.bf16 %v1790_v6, %v1789_v22  ;;  %v1753_v29 = vadd.f32 %v5225_v56, %v1752_v31  ;;  %3974 = vmatprep.mubr.msk.f32.mxu0 %vm546_vm1, %v1789_v22 }
 0x48b   : > { %v1792_v26 = vmax.f32 %v1758_v14, 0.0  ;;  %3975 = vmatmul.mubr.msk.f32.gmra.mrb[40].mxu0 %vm546_vm1, %v1790_v6  ;;  %v3549_v6 = vld [vmem:[%s6221_s4 + $0x5] ss:$0 sm:$0xff] }
 0x48c   : > { %v1791_v63 = vmax.f32 %v1753_v29, 0.0  ;;  %v3950_v0 = vpop.f32.mrb[44].mxu1  ;;  %4234 = vrot.lane.b32.xlu1 %v4233_v34, %s4559_s19 }
 0x48d   : > { %v1768_v47 = vadd.f32 %v3950_v0, %v5225_v56  ;;  %v1762_v10 = vpop.f32.mrb[45].mxu1 }
 0x48e   : > { %v4238_v33 = vpack.i.bf16 %v1792_v26, %v1791_v63  ;;  %v1763_v46 = vadd.f32 %v5225_v56, %v1762_v10  ;;  %3977 = vmatprep.mubr.msk.f32.mxu0 %vm546_vm1, %v1791_v63 }
 0x48f   : > { %v1794_v48 = vmax.f32 %v1768_v47, 0.0  ;;  %3978 = vmatmul.mubr.msk.f32.gmra.mrb[42].mxu0 %vm546_vm1, %v1792_v26 }
 0x490   : > { %v1793_v17 = vmax.f32 %v1763_v46, 0.0  ;;  %4239 = vrot.lane.b32.xlu0 %v4238_v33, %s4559_s19  ;;  %v3953_v36 = vpop.f32.mrb[46].mxu1 }
 0x491   : > { %v1778_v24 = vadd.f32 %v3953_v36, %v5225_v56  ;;  %v1772_v40 = vpop.f32.mrb[47].mxu1 }
 0x492   : > { %v4243_v49 = vpack.i.bf16 %v1794_v48, %v1793_v17  ;;  %v1773_v12 = vadd.f32 %v5225_v56, %v1772_v40  ;;  %3980 = vmatprep.mubr.msk.f32.mxu0 %vm546_vm1, %v1793_v17  ;;  %v2226_v56 = vld [vmem:[%s6220_s3 + $0x120] sm:$0xff] }
 0x493   : > { %v1796_v1 = vmax.f32 %v1778_v24, 0.0  ;;  %3981 = vmatmul.mubr.msk.f32.gmra.mrb[44].mxu0 %vm546_vm1, %v1794_v48  ;;  %v4110_v19 = vpack.c.bf16 %v2226_v56, %v2225_v37 }
 0x494   : > { %v1795_v25 = vmax.f32 %v1773_v12, 0.0  ;;  %4244 = vrot.lane.b32.xlu1 %v4243_v49, %s4559_s19 }
 0x495   : > { %4111 = vmatprep.subr.bf16.mxu1 %v4110_v19 }
 0x496   : > { %v4248_v43 = vpack.i.bf16 %v1796_v1, %v1795_v25  ;;  %3983 = vmatprep.mubr.msk.f32.mxu0 %vm546_vm1, %v1795_v25  ;;  %4113 = vmatpush3.bf16.msra.mxu1 %v4110_v19 }
 0x497   : > { %3984 = vmatmul.mubr.msk.f32.gmra.mrb[46].mxu0 %vm546_vm1, %v1796_v1  ;;  %4115 = vmatprep.subr.bf16.mxu1 %v4114_v23 }
 0x498   : > { %4249 = vrot.lane.b32.xlu0 %v4248_v43, %s4559_s19 }
 0x49a   : > { %4117 = vmatpush3.bf16.msra.mxu1 %v4114_v23 }
 0x49b   : > { %4119 = vmatprep.subr.bf16.mxu1 %v4118_v55 }
 0x49e   : > { %4121 = vmatpush3.bf16.msra.mxu1 %v4118_v55 }
 0x49f   : > { %4123 = vmatprep.subr.bf16.mxu1 %v4122_v39 }
 0x4a2   : > { %4125 = vmatpush3.bf16.msra.mxu1 %v4122_v39 }
 0x4a3   : > { %4127 = vmatprep.subr.bf16.mxu1 %v4126_v8 }
 0x4a6   : > { %4129 = vmatpush3.bf16.msra.mxu1 %v4126_v8 }
 0x4a7   : > { %4131 = vmatprep.subr.bf16.mxu1 %v4130_v16 }
 0x4aa   : > { %4133 = vmatpush3.bf16.msra.mxu1 %v4130_v16 }
 0x4ab   : > { %4135 = vmatprep.subr.bf16.mxu1 %v4134_v61 }
 0x4ae   : > { %4137 = vmatpush3.bf16.msra.mxu1 %v4134_v61 }
 0x4af   : > { %4139 = vmatprep.subr.bf16.mxu1 %v4138_v5 }
 0x4b2   : > { %4141 = vmatpush3.bf16.msra.mxu1 %v4138_v5 }
 0x54e   : > { %v3964_v22 = vpop.f32.mrb[32].mxu0 }
 0x54f   : > { %v1926_v57 = vadd.f32 %v3964_v22, %v3549_v6  ;;  %v1920_v14 = vpop.f32.mrb[33].mxu0 }
 0x550   : > { %v1921_v31 = vadd.f32 %v3549_v6, %v1920_v14 }
 0x551   : > { %v2000_v34 = vmax.f32 %v1926_v57, 0.0 }
 0x552   : > { %v1999_v29 = vmax.f32 %v1921_v31, 0.0  ;;  %v3967_v26 = vpop.f32.mrb[34].mxu0 }
 0x553   : > { %v1936_v63 = vadd.f32 %v3967_v26, %v3549_v6  ;;  %v1930_v0 = vpop.f32.mrb[35].mxu0 }
 0x554   : > { %v4253_v47 = vpack.i.bf16 %v2000_v34, %v1999_v29  ;;  %v1931_v10 = vadd.f32 %v3549_v6, %v1930_v0 }
 0x555   : > { %v2002_v33 = vmax.f32 %v1936_v63, 0.0 }
 0x556   : > { %v2001_v46 = vmax.f32 %v1931_v10, 0.0  ;;  %v3970_v48 = vpop.f32.mrb[36].mxu0  ;;  %4254 = vrot.lane.b32.xlu1 %v4253_v47, %s4560_s7  ;;  %v4180_v47 = vpop.permute.xlu1 %4179 }
 0x557   : > { %v1946_v17 = vadd.f32 %v3970_v48, %v3549_v6  ;;  %v1940_v36 = vpop.f32.mrb[37].mxu0 }
 0x558   : > { %v4258_v24 = vpack.i.bf16 %v2002_v33, %v2001_v46  ;;  %v1941_v40 = vadd.f32 %v3549_v6, %v1940_v36  ;;  %v4175_v33 = vpop.permute.xlu0 %4174 }
 0x559   : > { %v2004_v49 = vmax.f32 %v1946_v17, 0.0 }
 0x55a   : > { %v2003_v12 = vmax.f32 %v1941_v40, 0.0  ;;  %v3973_v1 = vpop.f32.mrb[38].mxu0  ;;  %4259 = vrot.lane.b32.xlu1 %v4258_v24, %s4560_s7  ;;  %v5326_v10 = vpop.permute.xlu1 %4189 }
 0x55b   : > { %v1956_v25 = vadd.f32 %v3973_v1, %v3549_v6  ;;  %v1950_v43 = vpop.f32.mrb[39].mxu0  ;;  %v4177_v1 = vunpack.i.h.bf16 %v4175_v33 }
 0x55c   : > { %v4263_v37 = vpack.i.bf16 %v2004_v49, %v2003_v12  ;;  %v1951_v56 = vadd.f32 %v3549_v6, %v1950_v43  ;;  %v4185_v48 = vpop.permute.xlu0 %4184 }
 0x55d   : > { %v2006_v59 = vmax.f32 %v1956_v25, 0.0  ;;  %v4176_v25 = vunpack.i.l.bf16 %v4175_v33 }
 0x55e   : > { %v2005_v19 = vmax.f32 %v1951_v56, 0.0  ;;  %v3976_v41 = vpop.f32.mrb[40].mxu0  ;;  %4264 = vrot.lane.b32.xlu0 %v4263_v37, %s4560_s7  ;;  %v5328_v46 = vpop.permute.xlu1 %4199 }
 0x55f   : > { %v1966_v23 = vadd.f32 %v3976_v41, %v3549_v6  ;;  %v1960_v35 = vpop.f32.mrb[41].mxu0 }
 0x560   : > { %v4268_v28 = vpack.i.bf16 %v2006_v59, %v2005_v19  ;;  %v1961_v55 = vadd.f32 %v3549_v6, %v1960_v35  ;;  %v5332_v36 = vpop.permute.xlu0 %4194  ;;  %v6294_v19 = vmax.f32 %v4841_v7, 0.0 }
 0x561   : > { %v2008_v52 = vmax.f32 %v1966_v23, 0.0 }
 0x562   : > { %v2007_v3 = vmax.f32 %v1961_v55, 0.0  ;;  %v3979_v39 = vpop.f32.mrb[42].mxu0  ;;  %4269 = vrot.lane.b32.xlu1 %v4268_v28, %s4560_s7  ;;  %v5330_v17 = vpop.permute.xlu1 %4209  ;;  %v2176_v41 = vsel %vm546_vm1, %v6294_v19, %v4177_v1  ;;  %v6295_v28 = vmax.f32 %v4843_v9, 0.0 }
 0x563   : > { %v1976_v51 = vadd.f32 %v3979_v39, %v3549_v6  ;;  %v1970_v53 = vpop.f32.mrb[43].mxu0 }
 0x564   : > { %v4273_v8 = vpack.i.bf16 %v2008_v52, %v2007_v3  ;;  %v1971_v44 = vadd.f32 %v3549_v6, %v1970_v53  ;;  %v2175_v55 = vsel %vm546_vm1, %v6295_v28, %v4176_v25  ;;  %v4182_v52 = vunpack.i.h.bf16 %v4180_v47 }
 0x565   : > { %v2010_v18 = vmax.f32 %v1976_v51, 0.0  ;;  %v4181_v3 = vunpack.i.l.bf16 %v4180_v47 }
 0x566   : > { %v2009_v16 = vmax.f32 %v1971_v44, 0.0  ;;  %v3982_v58 = vpop.f32.mrb[44].mxu0  ;;  %4274 = vrot.lane.b32.xlu0 %v4273_v8, %s4560_s7  ;;  %v4215_v24 = vpop.permute.xlu1 %4214 }
 0x567   : > { %v1986_v45 = vadd.f32 %v3982_v58, %v3549_v6  ;;  %v1980_v61 = vpop.f32.mrb[45].mxu0  ;;  %v4217_v56 = vunpack.i.h.bf16 %v4215_v24  ;;  %v4216_v59 = vunpack.i.l.bf16 %v4215_v24  ;;  %v4187_v58 = vunpack.i.h.bf16 %v4185_v48 }
 0x568   : > { %v4278_v21 = vpack.i.bf16 %v2010_v18, %v2009_v16  ;;  %v1981_v11 = vadd.f32 %v3549_v6, %v1980_v61  ;;  %v4192_v24 = vunpack.i.h.bf16 %v5326_v10 }
 0x569   : > { %v2012_v5 = vmax.f32 %v1986_v45, 0.0  ;;  %v2192_v44 = vsel %vm2191_vm2, %v2175_v55, %v4216_v59  ;;  %v2193_v7 = vsel %vm2191_vm2, %v2176_v41, %v4217_v56  ;;  %v4186_v45 = vunpack.i.l.bf16 %v4185_v48 }
 0x56a   : > { %v2011_v22 = vmax.f32 %v1981_v11, 0.0  ;;  %4279 = vrot.lane.b32.xlu1 %v4278_v21, %s4560_s7  ;;  %v3985_v57 = vpop.f32.mrb[46].mxu0  ;;  %v4225_v40 = vpop.permute.xlu1 %4224  ;;  %v4197_v41 = vunpack.i.h.bf16 %v5332_v36 }
 0x56b   : > { %v1996_v14 = vadd.f32 %v3985_v57, %v3549_v6  ;;  %v1990_v31 = vpop.f32.mrb[47].mxu0  ;;  %v6297_v57 = vmax.f32 %v4847_v13, 0.0  ;;  %v6299_v13 = vmax.f32 %v4860_v20, 0.0 }
 0x56c   : > { %v4283_v34 = vpack.i.bf16 %v2012_v5, %v2011_v22  ;;  %v1991_v29 = vadd.f32 %v3549_v6, %v1990_v31  ;;  %v5334_v6 = vpop.permute.xlu0 %4204  ;;  %v6296_v5 = vmax.f32 %v4849_v15, 0.0  ;;  %v4227_v31 = vunpack.i.h.bf16 %v4225_v40 }
 0x56d   : > { %v2014_v26 = vmax.f32 %v1996_v14, 0.0  ;;  %v2178_v14 = vsel %vm546_vm1, %v6297_v57, %v4182_v52  ;;  %v6298_v15 = vmax.f32 %v4862_v27, 0.0  ;;  %v2180_v48 = vsel %vm546_vm1, %v6299_v13, %v4187_v58 }
 0x56e   : > { %v2013_v63 = vmax.f32 %v1991_v29, 0.0  ;;  %4284 = vrot.lane.b32.xlu0 %v4283_v34, %s4560_s7  ;;  %v5336_v12 = vpop.permute.xlu1 %4234  ;;  %v2177_v22 = vsel %vm546_vm1, %v6296_v5, %v4181_v3  ;;  %v4226_v34 = vunpack.i.l.bf16 %v4225_v40  ;;  %v4191_v40 = vunpack.i.l.bf16 %v5326_v10 }
 0x56f   : > { %v2179_v33 = vsel %vm546_vm1, %v6298_v15, %v4186_v45  ;;  %v2197_v27 = vsel %vm2191_vm2, %v2180_v48, %v4227_v31  ;;  %v6300_v52 = vmax.f32 %v4874_v32, 0.0  ;;  %v6301_v3 = vmax.f32 %v4872_v30, 0.0 }
 0x570   : > { %v4288_v0 = vpack.i.bf16 %v2014_v26, %v2013_v63  ;;  %v4220_v49 = vpop.permute.xlu0 %4219  ;;  %v2196_v59 = vsel %vm2191_vm2, %v2179_v33, %v4226_v34  ;;  %v6302_v32 = vmax.f32 %v4886_v42, 0.0  ;;  %v4201_v45 = vunpack.i.l.bf16 %v5328_v46 }
 0x571   : > { %v4222_v53 = vunpack.i.h.bf16 %v4220_v49  ;;  %v4221_v8 = vunpack.i.l.bf16 %v4220_v49  ;;  %v4206_v31 = vunpack.i.l.bf16 %v5334_v6 }
 0x572   : > { %4289 = vrot.lane.b32.xlu1 %v4288_v0, %s4560_s7  ;;  %v5340_v37 = vpop.permute.xlu1 %4244 }
 0x573   : > { %v2194_v29 = vsel %vm2191_vm2, %v2177_v22, %v4221_v8  ;;  %v2195_v26 = vsel %vm2191_vm2, %v2178_v14, %v4222_v53  ;;  %v4236_v53 = vunpack.i.l.bf16 %v5336_v12  ;;  %v4207_v14 = vunpack.i.h.bf16 %v5334_v6 }
 0x574   : > { %v5338_v43 = vpop.permute.xlu0 %4229  ;;  %v4246_v15 = vunpack.i.l.bf16 %v5340_v37 }
 0x575   : > { %v4232_v25 = vunpack.i.h.bf16 %v5338_v43  ;;  %v4231_v56 = vunpack.i.l.bf16 %v5338_v43  ;;  %v2181_v43 = vsel %vm546_vm1, %v6300_v52, %v4191_v40  ;;  %v6307_v40 = vmax.f32 %v4908_v60, 0.0 }
 0x577   : > { %v2198_v8 = vsel %vm2191_vm2, %v2181_v43, %v4231_v56 }
 0x578   : > { %v5345_v23 = vpop.permute.xlu0 %4239 }
 0x579   : > { %v4241_v5 = vunpack.i.l.bf16 %v5345_v23 }
 0x57c   : > { %v5354_v9 = vpop.permute.xlu0 %4249 }
 0x5c8   : > { %v4255_v35 = vpop.permute.xlu1 %4254 }
 0x5c9   : > { %v4257_v39 = vunpack.i.h.bf16 %v4255_v35  ;;  %v4256_v51 = vunpack.i.l.bf16 %v4255_v35  ;;  %v4196_v35 = vunpack.i.l.bf16 %v5332_v36 }
 0x5cb   : > { %v2209_v18 = vsel %vm2208_vm8, %v2192_v44, %v4256_v51  ;;  %v2210_v16 = vsel %vm2208_vm8, %v2193_v7, %v4257_v39  ;;  %v2182_v39 = vsel %vm546_vm1, %v6301_v3, %v4192_v24  ;;  %v4237_v51 = vunpack.i.h.bf16 %v5336_v12 }
 0x5cc   : > { %v4260_v61 = vpop.permute.xlu1 %4259  ;;  %4018 = vmatprep.mubr.f32.mxu1 %v2209_v18  ;;  %v2199_v36 = vsel %vm2191_vm2, %v2182_v39, %v4232_v25  ;;  %v2183_v30 = vsel %vm546_vm1, %v6302_v32, %v4196_v35  ;;  %v4202_v12 = vunpack.i.h.bf16 %v5328_v46 }
 0x5cd   : > { %v4262_v21 = vunpack.i.h.bf16 %v4260_v61  ;;  %v4261_v11 = vunpack.i.l.bf16 %v4260_v61  ;;  %4019 = vmatmul.mubr.f32.vlgmr.msra.gmra.mrb[48].mxu1 %v2210_v16  ;;  %v6303_v16 = vmax.f32 %v4884_v38, 0.0  ;;  %v2200_v22 = vsel %vm2191_vm2, %v2183_v30, %v4236_v53 }
 0x5cf   : > { %v2211_v63 = vsel %vm2208_vm8, %v2194_v29, %v4261_v11  ;;  %v2212_v0 = vsel %vm2208_vm8, %v2195_v26, %v4262_v21  ;;  %v2184_v58 = vsel %vm546_vm1, %v6303_v16, %v4197_v41  ;;  %v4242_v11 = vunpack.i.h.bf16 %v5345_v23 }
 0x5d0   : > { %4021 = vmatprep.mubr.f32.mxu1 %v2211_v63  ;;  %v4265_v47 = vpop.permute.xlu0 %4264  ;;  %v2201_v42 = vsel %vm2191_vm2, %v2184_v58, %v4237_v51  ;;  %v6304_v26 = vmax.f32 %v4898_v54, 0.0  ;;  %v6305_v63 = vmax.f32 %v4896_v50, 0.0  ;;  %v6306_v54 = vmax.f32 %v4910_v62, 0.0 }
 0x5d1   : > { %v4267_v49 = vunpack.i.h.bf16 %v4265_v47  ;;  %v4266_v1 = vunpack.i.l.bf16 %v4265_v47  ;;  %4022 = vmatmul.mubr.f32.gmra.mrb[50].mxu1 %v2212_v0  ;;  %v4247_v47 = vunpack.i.h.bf16 %v5340_v37  ;;  %v4212_v37 = vunpack.i.h.bf16 %v5330_v17 }
 0x5d2   : > { %v2185_v23 = vsel %vm546_vm1, %v6304_v26, %v4201_v45  ;;  %v2186_v0 = vsel %vm546_vm1, %v6305_v63, %v4202_v12  ;;  %v2187_v50 = vsel %vm546_vm1, %v6306_v54, %v4206_v31 }
 0x5d3   : > { %v2213_v19 = vsel %vm2208_vm8, %v2196_v59, %v4266_v1  ;;  %v2214_v20 = vsel %vm2208_vm8, %v2197_v27, %v4267_v49  ;;  %v2202_v33 = vsel %vm2191_vm2, %v2185_v23, %v4241_v5  ;;  %v2203_v6 = vsel %vm2191_vm2, %v2186_v0, %v4242_v11 }
 0x5d4   : > { %v4270_v10 = vpop.permute.xlu1 %4269  ;;  %4024 = vmatprep.mubr.f32.mxu1 %v2213_v19  ;;  %v2188_v49 = vsel %vm546_vm1, %v6307_v40, %v4207_v14  ;;  %v4211_v1 = vunpack.i.l.bf16 %v5330_v17  ;;  %v4252_v59 = vunpack.i.h.bf16 %v5354_v9  ;;  %v4251_v27 = vunpack.i.l.bf16 %v5354_v9 }
 0x5d5   : > { %v4272_v28 = vunpack.i.h.bf16 %v4270_v10  ;;  %v4271_v55 = vunpack.i.l.bf16 %v4270_v10  ;;  %4025 = vmatmul.mubr.f32.gmra.mrb[52].mxu1 %v2214_v20  ;;  %v2204_v19 = vsel %vm2191_vm2, %v2187_v50, %v4246_v15  ;;  %v2205_v62 = vsel %vm2191_vm2, %v2188_v49, %v4247_v47 }
 0x5d6   : > { %v6308_v17 = vmax.f32 %v4922_v4, 0.0  ;;  %v5449_v4 = vld [vmem:[%s6221_s4 + $0x6] ss:$0 sm:$0xff] }
 0x5d7   : > { %v2215_v44 = vsel %vm2208_vm8, %v2198_v8, %v4271_v55  ;;  %v2216_v7 = vsel %vm2208_vm8, %v2199_v36, %v4272_v28  ;;  %v6309_v55 = vmax.f32 %v4920_v2, 0.0 }
 0x5d8   : > { %v4275_v18 = vpop.permute.xlu0 %4274  ;;  %4027 = vmatprep.mubr.f32.mxu1 %v2215_v44  ;;  %v2189_v28 = vsel %vm546_vm1, %v6308_v17, %v4211_v1 }
 0x5d9   : > { %v4277_v61 = vunpack.i.h.bf16 %v4275_v18  ;;  %v4276_v21 = vunpack.i.l.bf16 %v4275_v18  ;;  %4028 = vmatmul.mubr.f32.gmra.mrb[54].mxu1 %v2216_v7  ;;  %v2190_v9 = vsel %vm546_vm1, %v6309_v55, %v4212_v37  ;;  %v2206_v52 = vsel %vm2191_vm2, %v2189_v28, %v4251_v27 }
 0x5da   : > { %v2207_v43 = vsel %vm2191_vm2, %v2190_v9, %v4252_v59 }
 0x5db   : > { %v2217_v57 = vsel %vm2208_vm8, %v2200_v22, %v4276_v21  ;;  %v2218_v38 = vsel %vm2208_vm8, %v2201_v42, %v4277_v61 }
 0x5dc   : > { %v4280_v46 = vpop.permute.xlu1 %4279  ;;  %4030 = vmatprep.mubr.f32.mxu1 %v2217_v57 }
 0x5dd   : > { %v4282_v34 = vunpack.i.h.bf16 %v4280_v46  ;;  %v4281_v29 = vunpack.i.l.bf16 %v4280_v46  ;;  %4031 = vmatmul.mubr.f32.gmra.mrb[56].mxu1 %v2218_v38 }
 0x5df   : > { %v2219_v13 = vsel %vm2208_vm8, %v2202_v33, %v4281_v29  ;;  %v2220_v48 = vsel %vm2208_vm8, %v2203_v6, %v4282_v34 }
 0x5e0   : > { %v4285_v24 = vpop.permute.xlu0 %4284  ;;  %4033 = vmatprep.mubr.f32.mxu1 %v2219_v13 }
 0x5e1   : > { %v4287_v25 = vunpack.i.h.bf16 %v4285_v24  ;;  %v4286_v56 = vunpack.i.l.bf16 %v4285_v24  ;;  %4034 = vmatmul.mubr.f32.gmra.mrb[58].mxu1 %v2220_v48 }
 0x5e3   : > { %v2221_v20 = vsel %vm2208_vm8, %v2204_v19, %v4286_v56  ;;  %v2222_v60 = vsel %vm2208_vm8, %v2205_v62, %v4287_v25 }
 0x5e4   : > { %4036 = vmatprep.mubr.f32.mxu1 %v2221_v20  ;;  %v4290_v41 = vpop.permute.xlu1 %4289 }
 0x5e5   : > { %v4292_v35 = vunpack.i.h.bf16 %v4290_v41  ;;  %v4291_v10 = vunpack.i.l.bf16 %v4290_v41  ;;  %4037 = vmatmul.mubr.f32.gmra.mrb[60].mxu1 %v2222_v60 }
 0x5e7   : > { %v2223_v3 = vsel %vm2208_vm8, %v2206_v52, %v4291_v10  ;;  %v2224_v39 = vsel %vm2208_vm8, %v2207_v43, %v4292_v35 }
 0x5e8   : > { %4039 = vmatprep.mubr.f32.mxu1 %v2223_v3 }
 0x5e9   : > { %4040 = vmatmul.mubr.f32.gmra.mrb[62].mxu1 %v2224_v39 }
 0x6a0   : > { %v4020_v51 = vpop.f32.mrb[48].mxu1 }
 0x6a1   : > { %v5452_v2 = vadd.f32 %v4020_v51, %v5449_v4  ;;  %v2312_v53 = vpop.f32.mrb[49].mxu1 }
 0x6a2   : > { %v5455_v8 = vadd.f32 %v5449_v4, %v2312_v53 }
 0x6a3   : > { %v2394_v36 = vsel %vm954_vm3, %v5452_v2, -inf  ;;  %v2571_v32 = vsel %vm2567_vm9, %v5452_v2, -inf  ;;  %v2812_v12 = vsel %vm2808_vm10, %v5452_v2, -inf  ;;  %v3053_v5 = vsel %vm3049_vm11, %v5452_v2, -inf }
 0x6a4   : > { %v4023_v44 = vpop.f32.mrb[50].mxu1  ;;  %2395 = vmax.xlane.f32.xlu1 %v2394_v36  ;;  %v2391_v7 = vsel %vm954_vm3, %v5455_v8, -inf  ;;  %v2568_v16 = vsel %vm2567_vm9, %v5455_v8, -inf  ;;  %v2809_v61 = vsel %vm2808_vm10, %v5455_v8, -inf  ;;  %v3050_v42 = vsel %vm3049_vm11, %v5455_v8, -inf }
 0x6a5   : > { %v2322_v18 = vpop.f32.mrb[51].mxu1  ;;  %2392 = vmax.xlane.f32.xlu0 %v2391_v7  ;;  %v5470_v11 = vadd.f32 %v4023_v44, %v5449_v4 }
 0x6a6   : > { %v5484_v31 = vadd.f32 %v5449_v4, %v2322_v18 }
 0x6a7   : > { %v2577_v14 = vsel %vm2567_vm9, %v5470_v11, -inf  ;;  %v2400_v34 = vsel %vm954_vm3, %v5470_v11, -inf  ;;  %v2818_v63 = vsel %vm2808_vm10, %v5470_v11, -inf  ;;  %v3059_v48 = vsel %vm3049_vm11, %v5470_v11, -inf }
 0x6a8   : > { %v4026_v30 = vpop.f32.mrb[52].mxu1  ;;  %2572 = vmax.xlane.f32.xlu1 %v2571_v32  ;;  %v2397_v47 = vsel %vm954_vm3, %v5484_v31, -inf  ;;  %v2574_v54 = vsel %vm2567_vm9, %v5484_v31, -inf  ;;  %v2815_v1 = vsel %vm2808_vm10, %v5484_v31, -inf  ;;  %v3056_v59 = vsel %vm3049_vm11, %v5484_v31, -inf }
 0x6a9   : > { %2569 = vmax.xlane.f32.xlu0 %v2568_v16  ;;  %v2332_v58 = vpop.f32.mrb[53].mxu1  ;;  %v5505_v13 = vadd.f32 %v4026_v30, %v5449_v4 }
 0x6aa   : > { %v5524_v56 = vadd.f32 %v5449_v4, %v2332_v58 }
 0x6ab   : > { %v2406_v37 = vsel %vm954_vm3, %v5505_v13, -inf  ;;  %v2583_v25 = vsel %vm2567_vm9, %v5505_v13, -inf  ;;  %v2824_v27 = vsel %vm2808_vm10, %v5505_v13, -inf  ;;  %v3065_v20 = vsel %vm3049_vm11, %v5505_v13, -inf }
 0x6ac   : > { %v4029_v45 = vpop.f32.mrb[54].mxu1  ;;  %2813 = vmax.xlane.f32.xlu1 %v2812_v12  ;;  %v2403_v19 = vsel %vm954_vm3, %v5524_v56, -inf  ;;  %v2580_v60 = vsel %vm2567_vm9, %v5524_v56, -inf  ;;  %v2821_v35 = vsel %vm2808_vm10, %v5524_v56, -inf  ;;  %v3062_v28 = vsel %vm3049_vm11, %v5524_v56, -inf }
 0x6ad   : > { %2810 = vmax.xlane.f32.xlu0 %v2809_v61  ;;  %v2342_v21 = vpop.f32.mrb[55].mxu1  ;;  %v5533_v62 = vadd.f32 %v4029_v45, %v5449_v4 }
 0x6ae   : > { %v5546_v17 = vadd.f32 %v5449_v4, %v2342_v21 }
 0x6af   : > { %v2412_v41 = vsel %vm954_vm3, %v5533_v62, -inf  ;;  %v2589_v10 = vsel %vm2567_vm9, %v5533_v62, -inf  ;;  %v2830_v55 = vsel %vm2808_vm10, %v5533_v62, -inf  ;;  %v3071_v43 = vsel %vm3049_vm11, %v5533_v62, -inf }
 0x6b0   : > { %v5474_v22 = vpop.f32.mrb[56].mxu1  ;;  %3054 = vmax.xlane.f32.xlu1 %v3053_v5  ;;  %v2409_v9 = vsel %vm954_vm3, %v5546_v17, -inf  ;;  %v2586_v3 = vsel %vm2567_vm9, %v5546_v17, -inf  ;;  %v2827_v51 = vsel %vm2808_vm10, %v5546_v17, -inf  ;;  %v3068_v53 = vsel %vm3049_vm11, %v5546_v17, -inf }
 0x6b1   : > { %3051 = vmax.xlane.f32.xlu0 %v3050_v42  ;;  %v2352_v57 = vpop.f32.mrb[57].mxu1  ;;  %v5556_v52 = vadd.f32 %v5474_v22, %v5449_v4 }
 0x6b2   : > { %v5479_v38 = vadd.f32 %v5449_v4, %v2352_v57 }
 0x6b3   : > { %v2418_v39 = vsel %vm954_vm3, %v5556_v52, -inf  ;;  %v2836_v36 = vsel %vm2808_vm10, %v5556_v52, -inf  ;;  %v3077_v7 = vsel %vm3049_vm11, %v5556_v52, -inf }
 0x6b4   : > { %v4035_v46 = vpop.f32.mrb[58].mxu1  ;;  %2578 = vmax.xlane.f32.xlu1 %v2577_v14  ;;  %v2415_v44 = vsel %vm954_vm3, %v5479_v38, -inf  ;;  %v2592_v18 = vsel %vm2567_vm9, %v5479_v38, -inf  ;;  %v2833_v30 = vsel %vm2808_vm10, %v5479_v38, -inf  ;;  %v3074_v58 = vsel %vm3049_vm11, %v5479_v38, -inf }
 0x6b5   : > { %v5489_v29 = vadd.f32 %v4035_v46, %v5449_v4  ;;  %2401 = vmax.xlane.f32.xlu0 %v2400_v34  ;;  %v2362_v26 = vpop.f32.mrb[59].mxu1 }
 0x6b6   : > { %v5492_v23 = vadd.f32 %v5449_v4, %v2362_v26 }
 0x6b7   : > { %v2424_v32 = vsel %vm954_vm3, %v5489_v29, -inf  ;;  %v2601_v16 = vsel %vm2567_vm9, %v5489_v29, -inf  ;;  %v2842_v12 = vsel %vm2808_vm10, %v5489_v29, -inf  ;;  %v3083_v61 = vsel %vm3049_vm11, %v5489_v29, -inf }
 0x6b8   : > { %v4038_v0 = vpop.f32.mrb[60].mxu1  ;;  %2819 = vmax.xlane.f32.xlu1 %v2818_v63  ;;  %v2421_v45 = vsel %vm954_vm3, %v5492_v23, -inf  ;;  %v2598_v21 = vsel %vm2567_vm9, %v5492_v23, -inf  ;;  %v2839_v22 = vsel %vm2808_vm10, %v5492_v23, -inf  ;;  %v3080_v57 = vsel %vm3049_vm11, %v5492_v23, -inf }
 0x6b9   : > { %v5499_v15 = vadd.f32 %v4038_v0, %v5449_v4  ;;  %2398 = vmax.xlane.f32.xlu0 %v2397_v47  ;;  %v2372_v33 = vpop.f32.mrb[61].mxu1 }
 0x6ba   : > { %v5502_v6 = vadd.f32 %v5449_v4, %v2372_v33 }
 0x6bb   : > { %v2430_v5 = vsel %vm954_vm3, %v5499_v15, -inf  ;;  %v2607_v42 = vsel %vm2567_vm9, %v5499_v15, -inf  ;;  %v2848_v14 = vsel %vm2808_vm10, %v5499_v15, -inf  ;;  %v3089_v34 = vsel %vm3049_vm11, %v5499_v15, -inf }
 0x6bc   : > { %3060 = vmax.xlane.f32.xlu1 %v3059_v48  ;;  %v4041_v24 = vpop.f32.mrb[62].mxu1  ;;  %v2427_v46 = vsel %vm954_vm3, %v5502_v6, -inf  ;;  %v2604_v26 = vsel %vm2567_vm9, %v5502_v6, -inf  ;;  %v2845_v0 = vsel %vm2808_vm10, %v5502_v6, -inf  ;;  %v3086_v33 = vsel %vm3049_vm11, %v5502_v6, -inf }
 0x6bd   : > { %v5512_v50 = vadd.f32 %v4041_v24, %v5449_v4  ;;  %2575 = vmax.xlane.f32.xlu0 %v2574_v54  ;;  %v2382_v40 = vpop.f32.mrb[63].mxu1 }
 0x6be   : > { %v5515_v49 = vadd.f32 %v5449_v4, %v2382_v40  ;;  %v2595_v4 = vsel %vm2567_vm9, %v5556_v52, -inf }
 0x6bf   : > { %v2436_v63 = vsel %vm954_vm3, %v5512_v50, -inf  ;;  %v2613_v47 = vsel %vm2567_vm9, %v5512_v50, -inf  ;;  %v2854_v48 = vsel %vm2808_vm10, %v5512_v50, -inf  ;;  %v3095_v54 = vsel %vm3049_vm11, %v5512_v50, -inf }
 0x6c0   : > { %2407 = vmax.xlane.f32.xlu1 %v2406_v37  ;;  %v2433_v24 = vsel %vm954_vm3, %v5515_v49, -inf  ;;  %v2610_v40 = vsel %vm2567_vm9, %v5515_v49, -inf  ;;  %v2851_v37 = vsel %vm2808_vm10, %v5515_v49, -inf }
 0x6c1   : > { %2816 = vmax.xlane.f32.xlu0 %v2815_v1  ;;  %v3092_v1 = vsel %vm3049_vm11, %v5515_v49, -inf }
 0x6c4   : > { %2584 = vmax.xlane.f32.xlu1 %v2583_v25 }
 0x6c5   : > { %3057 = vmax.xlane.f32.xlu0 %v3056_v59 }
 0x6c8   : > { %2825 = vmax.xlane.f32.xlu1 %v2824_v27 }
 0x6c9   : > { %2404 = vmax.xlane.f32.xlu0 %v2403_v19 }
 0x6cc   : > { %3066 = vmax.xlane.f32.xlu1 %v3065_v20 }
 0x6cd   : > { %2581 = vmax.xlane.f32.xlu0 %v2580_v60 }
 0x6d0   : > { %2413 = vmax.xlane.f32.xlu1 %v2412_v41 }
 0x6d1   : > { %2822 = vmax.xlane.f32.xlu0 %v2821_v35 }
 0x6d4   : > { %2590 = vmax.xlane.f32.xlu1 %v2589_v10 }
 0x6d5   : > { %3063 = vmax.xlane.f32.xlu0 %v3062_v28 }
 0x6d8   : > { %2831 = vmax.xlane.f32.xlu1 %v2830_v55 }
 0x6d9   : > { %2410 = vmax.xlane.f32.xlu0 %v2409_v9 }
 0x6dc   : > { %3072 = vmax.xlane.f32.xlu1 %v3071_v43 }
 0x6dd   : > { %2587 = vmax.xlane.f32.xlu0 %v2586_v3 }
 0x6e0   : > { %2419 = vmax.xlane.f32.xlu1 %v2418_v39 }
 0x6e1   : > { %2828 = vmax.xlane.f32.xlu0 %v2827_v51 }
 0x6e4   : > { %2596 = vmax.xlane.f32.xlu1 %v2595_v4 }
 0x6e5   : > { %3069 = vmax.xlane.f32.xlu0 %v3068_v53 }
 0x6e8   : > { %2837 = vmax.xlane.f32.xlu1 %v2836_v36 }
 0x6e9   : > { %2416 = vmax.xlane.f32.xlu0 %v2415_v44 }
 0x6ec   : > { %3078 = vmax.xlane.f32.xlu1 %v3077_v7 }
 0x6ed   : > { %2593 = vmax.xlane.f32.xlu0 %v2592_v18 }
 0x6f0   : > { %2425 = vmax.xlane.f32.xlu1 %v2424_v32 }
 0x6f1   : > { %2834 = vmax.xlane.f32.xlu0 %v2833_v30 }
 0x6f4   : > { %2602 = vmax.xlane.f32.xlu1 %v2601_v16 }
 0x6f5   : > { %3075 = vmax.xlane.f32.xlu0 %v3074_v58 }
 0x6f8   : > { %2843 = vmax.xlane.f32.xlu1 %v2842_v12 }
 0x6f9   : > { %2422 = vmax.xlane.f32.xlu0 %v2421_v45 }
 0x6fc   : > { %3084 = vmax.xlane.f32.xlu1 %v3083_v61 }
 0x6fd   : > { %2599 = vmax.xlane.f32.xlu0 %v2598_v21 }
 0x700   : > { %2431 = vmax.xlane.f32.xlu1 %v2430_v5 }
 0x701   : > { %2840 = vmax.xlane.f32.xlu0 %v2839_v22 }
 0x704   : > { %2608 = vmax.xlane.f32.xlu1 %v2607_v42 }
 0x705   : > { %3081 = vmax.xlane.f32.xlu0 %v3080_v57 }
 0x708   : > { %2849 = vmax.xlane.f32.xlu1 %v2848_v14 }
 0x709   : > { %2428 = vmax.xlane.f32.xlu0 %v2427_v46 }
 0x70c   : > { %3090 = vmax.xlane.f32.xlu1 %v3089_v34 }
 0x70d   : > { %2605 = vmax.xlane.f32.xlu0 %v2604_v26 }
 0x710   : > { %2437 = vmax.xlane.f32.xlu1 %v2436_v63 }
 0x711   : > { %2846 = vmax.xlane.f32.xlu0 %v2845_v0 }
 0x714   : > { %2614 = vmax.xlane.f32.xlu1 %v2613_v47 }
 0x715   : > { %3087 = vmax.xlane.f32.xlu0 %v3086_v33 }
 0x718   : > { %2855 = vmax.xlane.f32.xlu1 %v2854_v48 }
 0x719   : > { %2434 = vmax.xlane.f32.xlu0 %v2433_v24 }
 0x71c   : > { %3096 = vmax.xlane.f32.xlu1 %v3095_v54 }
 0x71d   : > { %2611 = vmax.xlane.f32.xlu0 %v2610_v40 }
 0x721   : > { %2852 = vmax.xlane.f32.xlu0 %v2851_v37 }
 0x725   : > { %3093 = vmax.xlane.f32.xlu0 %v3092_v1 }
 0x731   : > { %v2396_v25 = vpop.xlane.xlu1 %2395 }
 0x732   : > { %v2393_v59 = vpop.xlane.xlu0 %2392  ;;  %v2440_v61 = vsub.f32 %v5452_v2, %v2396_v25 }
 0x733   : > { %v2439_v45 = vsub.f32 %v5455_v8, %v2393_v59 }
 0x734   : > { %v2457_v22 = vmul.f32 1.442695, %v2440_v61 }
 0x735   : > { %v2573_v27 = vpop.xlane.xlu1 %2572  ;;  %v2455_v21 = vmul.f32 1.442695, %v2439_v45 }
 0x736   : > { %v2617_v19 = vsub.f32 %v5452_v2, %v2573_v27  ;;  %v2570_v20 = vpop.xlane.xlu0 %2569 }
 0x737   : > { %v2616_v60 = vsub.f32 %v5455_v8, %v2570_v20 }
 0x738   : > { %v2634_v41 = vmul.f32 1.442695, %v2617_v19 }
 0x739   : > { %v2632_v35 = vmul.f32 1.442695, %v2616_v60  ;;  %v2814_v10 = vpop.xlane.xlu1 %2813 }
 0x73a   : > { %4293 = vpow2.f32 %v2634_v41  ;;  %v2858_v28 = vsub.f32 %v5452_v2, %v2814_v10  ;;  %v2811_v55 = vpop.xlane.xlu0 %2810 }
 0x73b   : > { %4295 = vpow2.f32 %v2632_v35  ;;  %v2857_v9 = vsub.f32 %v5455_v8, %v2811_v55 }
 0x73c   : > { %v2875_v43 = vmul.f32 1.442695, %v2858_v28 }
 0x73d   : > { %v2873_v3 = vmul.f32 1.442695, %v2857_v9  ;;  %v3055_v39 = vpop.xlane.xlu1 %3054 }
 0x73e   : > { %4297 = vpow2.f32 %v2875_v43  ;;  %v3099_v51 = vsub.f32 %v5452_v2, %v3055_v39  ;;  %v3052_v4 = vpop.xlane.xlu0 %3051 }
 0x73f   : > { %4299 = vpow2.f32 %v2873_v3  ;;  %v3098_v53 = vsub.f32 %v5455_v8, %v3052_v4 }
 0x740   : > { %v3116_v36 = vmul.f32 1.442695, %v3099_v51 }
 0x741   : > { %v3114_v44 = vmul.f32 1.442695, %v3098_v53  ;;  %v2579_v14 = vpop.xlane.xlu1 %2578 }
 0x742   : > { %4301 = vpow2.f32 %v3116_v36  ;;  %v2402_v12 = vpop.xlane.xlu0 %2401  ;;  %v2619_v2 = vsub.f32 %v5470_v11, %v2579_v14 }
 0x743   : > { %4303 = vpow2.f32 %v3114_v44  ;;  %v2442_v41 = vsub.f32 %v5470_v11, %v2402_v12 }
 0x744   : > { %v5636_v7 = vpop.eup %4293  ;;  %4305 = vpow2.f32 %v2455_v21  ;;  %v2638_v33 = vmul.f32 1.442695, %v2619_v2 }
 0x745   : > { %v5638_v18 = vpop.eup %4295  ;;  %2682 = vrot.lane.b32.xlu1 %v5636_v7, %s4561_s10  ;;  %4307 = vpow2.f32 %v2457_v22  ;;  %v2820_v8 = vpop.xlane.xlu1 %2819  ;;  %v2461_v10 = vmul.f32 1.442695, %v2442_v41 }
 0x746   : > { %2680 = vrot.lane.b32.xlu0 %v5638_v18, %s4561_s10  ;;  %v2399_v5 = vpop.xlane.xlu0 %2398  ;;  %v2860_v48 = vsub.f32 %v5470_v11, %v2820_v8  ;;  %4309 = vpow2.f32 %v2638_v33 }
 0x747   : > { %v2441_v20 = vsub.f32 %v5484_v31, %v2399_v5 }
 0x748   : > { %v5644_v32 = vpop.eup %4297  ;;  %v2879_v40 = vmul.f32 1.442695, %v2860_v48 }
 0x749   : > { %v5646_v30 = vpop.eup %4299  ;;  %2923 = vrot.lane.b32.xlu1 %v5644_v32, %s4562_s11  ;;  %v3061_v24 = vpop.xlane.xlu1 %3060  ;;  %v2459_v60 = vmul.f32 1.442695, %v2441_v20 }
 0x74a   : > { %2921 = vrot.lane.b32.xlu0 %v5646_v30, %s4562_s11  ;;  %v2576_v42 = vpop.xlane.xlu0 %2575  ;;  %v3101_v37 = vsub.f32 %v5470_v11, %v3061_v24 }
 0x74b   : > { %v2618_v36 = vsub.f32 %v5484_v31, %v2576_v42 }
 0x74c   : > { %v5652_v16 = vpop.eup %4301  ;;  %v3120_v1 = vmul.f32 1.442695, %v3101_v37 }
 0x74d   : > { %v5654_v58 = vpop.eup %4303  ;;  %3164 = vrot.lane.b32.xlu1 %v5652_v16, %s4563_s12  ;;  %v2408_v39 = vpop.xlane.xlu1 %2407  ;;  %v2636_v21 = vmul.f32 1.442695, %v2618_v36 }
 0x74e   : > { %3162 = vrot.lane.b32.xlu0 %v5654_v58, %s4563_s12  ;;  %v2817_v57 = vpop.xlane.xlu0 %2816  ;;  %v5662_v46 = vpop.eup %4305 }
 0x74f   : > { %v2487_v34 = vsel %vm954_vm3, %v5662_v46, 0.0  ;;  %v5666_v26 = vpop.eup %4307  ;;  %v2859_v5 = vsub.f32 %v5484_v31, %v2817_v57 }
 0x750   : > { %v2490_v47 = vsel %vm954_vm3, %v5666_v26, 0.0  ;;  %v5674_v25 = vpop.eup %4309 }
 0x751   : > { %v2585_v44 = vpop.xlane.xlu1 %2584 }
 0x752   : > { %v3058_v63 = vpop.xlane.xlu0 %3057 }
 0x753   : > { %v3100_v0 = vsub.f32 %v5484_v31, %v3058_v63  ;;  %v2621_v63 = vsub.f32 %v5505_v13, %v2585_v44 }
 0x755   : > { %v3118_v54 = vmul.f32 1.442695, %v3100_v0  ;;  %v2826_v14 = vpop.xlane.xlu1 %2825  ;;  %v2642_v8 = vmul.f32 1.442695, %v2621_v63 }
 0x756   : > { %v2405_v35 = vpop.xlane.xlu0 %2404  ;;  %v2862_v2 = vsub.f32 %v5505_v13, %v2826_v14 }
 0x757   : > { %4311 = vpow2.f32 %v3118_v54  ;;  %v2443_v37 = vsub.f32 %v5524_v56, %v2405_v35 }
 0x758   : > { %4313 = vpow2.f32 %v2879_v40  ;;  %v2883_v31 = vmul.f32 1.442695, %v2862_v2 }
 0x759   : > { %4315 = vpow2.f32 %v3120_v1  ;;  %v3067_v0 = vpop.xlane.xlu1 %3066  ;;  %v2463_v20 = vmul.f32 1.442695, %v2443_v37 }
 0x75a   : > { %4317 = vpow2.f32 %v2459_v60  ;;  %v2582_v55 = vpop.xlane.xlu0 %2581  ;;  %v3103_v57 = vsub.f32 %v5505_v13, %v3067_v0 }
 0x75b   : > { %4319 = vpow2.f32 %v2461_v10  ;;  %v2620_v3 = vsub.f32 %v5524_v56, %v2582_v55 }
 0x75c   : > { %v3124_v24 = vmul.f32 1.442695, %v3103_v57 }
 0x75d   : > { %v2640_v51 = vmul.f32 1.442695, %v2620_v3 }
 0x75e   : > { %v2823_v43 = vpop.xlane.xlu0 %2822 }
 0x75f   : > { %v2861_v4 = vsub.f32 %v5524_v56, %v2823_v43  ;;  %4321 = vpow2.f32 %v2640_v51  ;;  %v2414_v51 = vpop.xlane.xlu1 %2413 }
 0x761   : > { %v5676_v59 = vpop.eup %4311  ;;  %v2881_v12 = vmul.f32 1.442695, %v2861_v4 }
 0x762   : > { %v5682_v27 = vpop.eup %4313  ;;  %v3064_v11 = vpop.xlane.xlu0 %3063 }
 0x763   : > { %v5686_v19 = vpop.eup %4315  ;;  %v3102_v45 = vsub.f32 %v5524_v56, %v3064_v11  ;;  %4323 = vpow2.f32 %v2881_v12  ;;  %v2591_v44 = vpop.xlane.xlu1 %2590 }
 0x764   : > { %v5692_v28 = vpop.eup %4317  ;;  %4325 = vpow2.f32 %v2636_v21  ;;  %v2623_v21 = vsub.f32 %v5533_v62, %v2591_v44 }
 0x765   : > { %v2493_v9 = vsel %vm954_vm3, %v5692_v28, 0.0  ;;  %v5698_v53 = vpop.eup %4319  ;;  %v3122_v22 = vmul.f32 1.442695, %v3102_v45 }
 0x766   : > { %v2496_v61 = vsel %vm954_vm3, %v5698_v53, 0.0  ;;  %v2411_v41 = vpop.xlane.xlu0 %2410  ;;  %v2646_v14 = vmul.f32 1.442695, %v2623_v21 }
 0x767   : > { %4327 = vpow2.f32 %v3122_v22  ;;  %v2445_v37 = vsub.f32 %v5546_v17, %v2411_v41 }
 0x769   : > { %v5706_v42 = vpop.eup %4321 }
 0x76a   : > { %v2588_v55 = vpop.xlane.xlu0 %2587 }
 0x76b   : > { %v2622_v3 = vsub.f32 %v5546_v17, %v2588_v55  ;;  %v2467_v55 = vmul.f32 1.442695, %v2445_v37 }
 0x76d   : > { %2488 = vadd.xlane.f32.xlu0 %v2487_v34  ;;  %v2877_v34 = vmul.f32 1.442695, %v2859_v5  ;;  %v2644_v4 = vmul.f32 1.442695, %v2622_v3  ;;  %v2446_v3 = vsub.f32 %v5533_v62, %v2414_v51 }
 0x76e   : > { %v2829_v43 = vpop.xlane.xlu0 %2828 }
 0x76f   : > { %4329 = vpow2.f32 %v2877_v34  ;;  %v2863_v11 = vsub.f32 %v5546_v17, %v2829_v43  ;;  %v2469_v41 = vmul.f32 1.442695, %v2446_v3 }
 0x770   : > { %4331 = vpow2.f32 %v2642_v8 }
 0x771   : > { %2491 = vadd.xlane.f32.xlu1 %v2490_v47  ;;  %v5711_v47 = vpop.eup %4323  ;;  %4333 = vpow2.f32 %v2883_v31  ;;  %v2885_v12 = vmul.f32 1.442695, %v2863_v11 }
 0x772   : > { %v5716_v33 = vpop.eup %4325  ;;  %4335 = vpow2.f32 %v3124_v24  ;;  %v3070_v36 = vpop.xlane.xlu0 %3069 }
 0x773   : > { %v5718_v48 = vpop.eup %4327  ;;  %4337 = vpow2.f32 %v2463_v20  ;;  %v3104_v45 = vsub.f32 %v5546_v17, %v3070_v36 }
 0x779   : > { %v5724_v54 = vpop.eup %4329 }
 0x77a   : > { %v5728_v40 = vpop.eup %4331 }
 0x77b   : > { %v5733_v1 = vpop.eup %4333 }
 0x77c   : > { %v5737_v60 = vpop.eup %4335 }
 0x77d   : > { %v5741_v10 = vpop.eup %4337 }
 0x77e   : > { %v2499_v56 = vsel %vm954_vm3, %v5741_v10, 0.0 }
 0x782   : > { %2686 = vrot.lane.b32.xlu1 %v5674_v25, %s4561_s10 }
 0x783   : > { %3166 = vrot.lane.b32.xlu0 %v5676_v59, %s4563_s12 }
 0x786   : > { %2927 = vrot.lane.b32.xlu1 %v5682_v27, %s4562_s11 }
 0x78a   : > { %3168 = vrot.lane.b32.xlu1 %v5686_v19, %s4563_s12 }
 0x7a2   : > { %2494 = vadd.xlane.f32.xlu0 %v2493_v9  ;;  %v2444_v9 = vsub.f32 %v5505_v13, %v2408_v39  ;;  %v3126_v13 = vmul.f32 1.442695, %v3104_v45 }
 0x7a4   : > { %v2465_v35 = vmul.f32 1.442695, %v2444_v9 }
 0x7a6   : > { %4339 = vpow2.f32 %v2465_v35 }
 0x7a7   : > { %4341 = vpow2.f32 %v2644_v4 }
 0x7a8   : > { %4343 = vpow2.f32 %v2885_v12 }
 0x7a9   : > { %4345 = vpow2.f32 %v3126_v13 }
 0x7aa   : > { %4347 = vpow2.f32 %v2646_v14 }
 0x7ae   : > { %2497 = vadd.xlane.f32.xlu1 %v2496_v61  ;;  %v2832_v61 = vpop.xlane.xlu1 %2831 }
 0x7af   : > { %v2864_v34 = vsub.f32 %v5533_v62, %v2832_v61 }
 0x7b0   : > { %v5749_v39 = vpop.eup %4339 }
 0x7b1   : > { %v2502_v5 = vsel %vm954_vm3, %v5749_v39, 0.0  ;;  %v5754_v22 = vpop.eup %4341  ;;  %v2887_v2 = vmul.f32 1.442695, %v2864_v34 }
 0x7b2   : > { %v3073_v63 = vpop.xlane.xlu1 %3072  ;;  %v5759_v8 = vpop.eup %4343 }
 0x7b3   : > { %v3105_v0 = vsub.f32 %v5533_v62, %v3073_v63  ;;  %v5764_v31 = vpop.eup %4345  ;;  %4349 = vpow2.f32 %v2887_v2 }
 0x7b4   : > { %6310 = vst [vmem:[#allocation2_spill] sm:$0xff] %v5764_v31  ;;  %v5768_v24 = vpop.eup %4347 }
 0x7b5   : > { %v3128_v57 = vmul.f32 1.442695, %v3105_v0 }
 0x7b6   : > { %v2420_v36 = vpop.xlane.xlu1 %2419 }
 0x7b7   : > { %4351 = vpow2.f32 %v3128_v57 }
 0x7b8   : > { %2688 = vrot.lane.b32.xlu0 %v5706_v42, %s4561_s10  ;;  %4353 = vpow2.f32 %v2467_v55 }
 0x7b9   : > { %4355 = vpow2.f32 %v2469_v41 }
 0x7ba   : > { %v2597_v13 = vpop.xlane.xlu1 %2596 }
 0x7bb   : > { %v2625_v14 = vsub.f32 %v5556_v52, %v2597_v13 }
 0x7bc   : > { %2929 = vrot.lane.b32.xlu0 %v5711_v47, %s4562_s11 }
 0x7bd   : > { %v5773_v20 = vpop.eup %4349  ;;  %v2650_v2 = vmul.f32 1.442695, %v2625_v14 }
 0x7bf   : > { %2684 = vrot.lane.b32.xlu1 %v5716_v33, %s4561_s10 }
 0x7c0   : > { %3170 = vrot.lane.b32.xlu0 %v5718_v48, %s4563_s12 }
 0x7c1   : > { %v5777_v9 = vpop.eup %4351 }
 0x7c2   : > { %6311 = vst [vmem:[#allocation3_spill] sm:$0xff] %v5777_v9  ;;  %v5781_v35 = vpop.eup %4353 }
 0x7c3   : > { %2925 = vrot.lane.b32.xlu1 %v5724_v54, %s4562_s11  ;;  %v2505_v17 = vsel %vm954_vm3, %v5781_v35, 0.0  ;;  %v5789_v51 = vpop.eup %4355 }
 0x7c4   : > { %6312 = vst [vmem:[#allocation4_spill] sm:$0xff] %v5789_v51  ;;  %v2508_v34 = vsel %vm954_vm3, %v5789_v51, 0.0 }
 0x7c7   : > { %2690 = vrot.lane.b32.xlu1 %v5728_v40, %s4561_s10 }
 0x7cb   : > { %2931 = vrot.lane.b32.xlu1 %v5733_v1, %s4562_s11 }
 0x7cf   : > { %3172 = vrot.lane.b32.xlu1 %v5737_v60, %s4563_s12 }
 0x7df   : > { %2500 = vadd.xlane.f32.xlu0 %v2499_v56  ;;  %v2417_v56 = vpop.xlane.xlu0 %2416 }
 0x7e3   : > { %v2594_v43 = vpop.xlane.xlu0 %2593 }
 0x7e4   : > { %v2624_v11 = vsub.f32 %v5479_v38, %v2594_v43 }
 0x7e6   : > { %v2648_v44 = vmul.f32 1.442695, %v2624_v11 }
 0x7e7   : > { %v2835_v4 = vpop.xlane.xlu0 %2834 }
 0x7e8   : > { %v2865_v12 = vsub.f32 %v5479_v38, %v2835_v4  ;;  %4357 = vpow2.f32 %v2648_v44  ;;  %v2447_v4 = vsub.f32 %v5479_v38, %v2417_v56 }
 0x7ea   : > { %v2889_v61 = vmul.f32 1.442695, %v2865_v12  ;;  %v2471_v44 = vmul.f32 1.442695, %v2447_v4 }
 0x7eb   : > { %v3076_v45 = vpop.xlane.xlu0 %3075 }
 0x7ec   : > { %v3106_v21 = vsub.f32 %v5479_v38, %v3076_v45  ;;  %4359 = vpow2.f32 %v2889_v61 }
 0x7ee   : > { %v3130_v62 = vmul.f32 1.442695, %v3106_v21  ;;  %v2448_v21 = vsub.f32 %v5556_v52, %v2420_v36 }
 0x7ef   : > { %v2423_v45 = vpop.xlane.xlu0 %2422 }
 0x7f0   : > { %4361 = vpow2.f32 %v3130_v62  ;;  %v2473_v56 = vmul.f32 1.442695, %v2448_v21 }
 0x7f1   : > { %4363 = vpow2.f32 %v2650_v2 }
 0x7f2   : > { %v5794_v63 = vpop.eup %4357 }
 0x7f3   : > { %2503 = vadd.xlane.f32.xlu1 %v2502_v5  ;;  %v2838_v5 = vpop.xlane.xlu1 %2837  ;;  %6313 = vst [vmem:[#allocation5_spill] sm:$0xff] %v5794_v63  ;;  %v2600_v61 = vpop.xlane.xlu0 %2599 }
 0x7f4   : > { %v2866_v0 = vsub.f32 %v5556_v52, %v2838_v5  ;;  %v2626_v5 = vsub.f32 %v5492_v23, %v2600_v61 }
 0x7f5   : > { %2692 = vrot.lane.b32.xlu0 %v5754_v22, %s4561_s10 }
 0x7f6   : > { %v5799_v37 = vpop.eup %4359  ;;  %v2891_v55 = vmul.f32 1.442695, %v2866_v0 }
 0x7f7   : > { %v3079_v57 = vpop.xlane.xlu1 %3078  ;;  %6314 = vst [vmem:[#allocation6_spill] sm:$0xff] %v5799_v37  ;;  %v2841_v62 = vpop.xlane.xlu0 %2840 }
 0x7f8   : > { %v3107_v43 = vsub.f32 %v5556_v52, %v3079_v57  ;;  %4365 = vpow2.f32 %v2891_v55  ;;  %v2867_v2 = vsub.f32 %v5492_v23, %v2841_v62 }
 0x7f9   : > { %2933 = vrot.lane.b32.xlu0 %v5759_v8, %s4562_s11 }
 0x7fa   : > { %v5804_v3 = vpop.eup %4361  ;;  %v2893_v55 = vmul.f32 1.442695, %v2867_v2 }
 0x7fb   : > { %6315 = vst [vmem:[#allocation7_spill] sm:$0xff] %v5804_v3  ;;  %v5808_v41 = vpop.eup %4363  ;;  %v2426_v14 = vpop.xlane.xlu1 %2425 }
 0x7fc   : > { %6316 = vst [vmem:[#allocation8_spill] sm:$0xff] %v5808_v41  ;;  %v3082_v0 = vpop.xlane.xlu0 %3081 }
 0x7fd   : > { %3174 = vrot.lane.b32.xlu0 %v5764_v31, %s4563_s12 }
 0x7ff   : > { %v2603_v57 = vpop.xlane.xlu1 %2602 }
 0x800   : > { %v2627_v4 = vsub.f32 %v5489_v29, %v2603_v57 }
 0x802   : > { %v5813_v11 = vpop.eup %4365  ;;  %v2654_v21 = vmul.f32 1.442695, %v2627_v4  ;;  %v2429_v4 = vpop.xlane.xlu0 %2428 }
 0x803   : > { %6317 = vst [vmem:[#allocation9_spill] sm:$0xff] %v5813_v11 }
 0x804   : > { %2694 = vrot.lane.b32.xlu1 %v5768_v24, %s4561_s10 }
 0x808   : > { %2935 = vrot.lane.b32.xlu1 %v5773_v20, %s4562_s11 }
 0x80c   : > { %3176 = vrot.lane.b32.xlu1 %v5777_v9, %s4563_s12 }
 0x81c   : > { %2506 = vadd.xlane.f32.xlu0 %v2505_v17  ;;  %v3132_v17 = vmul.f32 1.442695, %v3107_v43  ;;  %v3108_v43 = vsub.f32 %v5492_v23, %v3082_v0 }
 0x81e   : > { %4367 = vpow2.f32 %v3132_v17  ;;  %v3134_v52 = vmul.f32 1.442695, %v3108_v43  ;;  %v2844_v17 = vpop.xlane.xlu1 %2843 }
 0x81f   : > { %4369 = vpow2.f32 %v2471_v44 }
 0x820   : > { %4371 = vpow2.f32 %v2473_v56 }
 0x822   : > { %v3085_v56 = vpop.xlane.xlu1 %3084 }
 0x828   : > { %v5817_v12 = vpop.eup %4367 }
 0x829   : > { %6318 = vst [vmem:[#allocation10_spill] sm:$0xff] %v5817_v12  ;;  %v5821_v13 = vpop.eup %4369 }
 0x82a   : > { %6319 = vst [vmem:[#allocation11_spill] sm:$0xff] %v5821_v13  ;;  %v2511_v38 = vsel %vm954_vm3, %v5821_v13, 0.0  ;;  %v5829_v36 = vpop.eup %4371 }
 0x82b   : > { %6320 = vst [vmem:[#allocation12_spill] sm:$0xff] %v5829_v36  ;;  %v2514_v44 = vsel %vm954_vm3, %v5829_v36, 0.0 }
 0x830   : > { %2509 = vadd.xlane.f32.xlu1 %v2508_v34  ;;  %v2652_v34 = vmul.f32 1.442695, %v2626_v5 }
 0x832   : > { %2696 = vrot.lane.b32.xlu0 %v5794_v63, %s4561_s10  ;;  %4373 = vpow2.f32 %v2652_v34  ;;  %v3109_v34 = vsub.f32 %v5489_v29, %v3085_v56 }
 0x833   : > { %4375 = vpow2.f32 %v2893_v55  ;;  %v2449_v55 = vsub.f32 %v5492_v23, %v2423_v45 }
 0x834   : > { %4377 = vpow2.f32 %v3134_v52  ;;  %v3136_v0 = vmul.f32 1.442695, %v3109_v34  ;;  %v2432_v34 = vpop.xlane.xlu1 %2431 }
 0x835   : > { %4379 = vpow2.f32 %v2654_v21  ;;  %v2475_v52 = vmul.f32 1.442695, %v2449_v55  ;;  %v2606_v21 = vpop.xlane.xlu0 %2605 }
 0x836   : > { %2937 = vrot.lane.b32.xlu0 %v5799_v37, %s4562_s11 }
 0x839   : > { %v2847_v56 = vpop.xlane.xlu0 %2846 }
 0x83a   : > { %3178 = vrot.lane.b32.xlu0 %v5804_v3, %s4563_s12  ;;  %v2869_v55 = vsub.f32 %v5502_v6, %v2847_v56 }
 0x83c   : > { %v5834_v61 = vpop.eup %4373 }
 0x83d   : > { %6321 = vst [vmem:[#allocation13_spill] sm:$0xff] %v5834_v61  ;;  %v5839_v62 = vpop.eup %4375 }
 0x83e   : > { %6322 = vst [vmem:[#allocation14_spill] sm:$0xff] %v5839_v62  ;;  %v5844_v2 = vpop.eup %4377 }
 0x83f   : > { %6323 = vst [vmem:[#allocation15_spill] sm:$0xff] %v5844_v2  ;;  %v5848_v57 = vpop.eup %4379 }
 0x840   : > { %6324 = vst [vmem:[#allocation16_spill] sm:$0xff] %v5848_v57 }
 0x841   : > { %2698 = vrot.lane.b32.xlu1 %v5808_v41, %s4561_s10 }
 0x845   : > { %2939 = vrot.lane.b32.xlu1 %v5813_v11, %s4562_s11 }
 0x849   : > { %3180 = vrot.lane.b32.xlu1 %v5817_v12, %s4563_s12 }
 0x859   : > { %2512 = vadd.xlane.f32.xlu0 %v2511_v38  ;;  %v2868_v38 = vsub.f32 %v5489_v29, %v2844_v17 }
 0x85b   : > { %v2895_v5 = vmul.f32 1.442695, %v2868_v38  ;;  %v2450_v38 = vsub.f32 %v5489_v29, %v2426_v14 }
 0x85d   : > { %4381 = vpow2.f32 %v2895_v5  ;;  %v2477_v45 = vmul.f32 1.442695, %v2450_v38  ;;  %v2628_v5 = vsub.f32 %v5502_v6, %v2606_v21 }
 0x85e   : > { %4383 = vpow2.f32 %v3136_v0 }
 0x85f   : > { %4385 = vpow2.f32 %v2475_v52  ;;  %v2656_v0 = vmul.f32 1.442695, %v2628_v5  ;;  %v3088_v52 = vpop.xlane.xlu0 %3087 }
 0x860   : > { %4387 = vpow2.f32 %v2477_v45 }
 0x861   : > { %4389 = vpow2.f32 %v2656_v0 }
 0x867   : > { %v5853_v43 = vpop.eup %4381 }
 0x868   : > { %6325 = vst [vmem:[#allocation17_spill] sm:$0xff] %v5853_v43  ;;  %v5857_v17 = vpop.eup %4383 }
 0x869   : > { %6326 = vst [vmem:[#allocation18_spill] sm:$0xff] %v5857_v17 }
 0x86d   : > { %2515 = vadd.xlane.f32.xlu1 %v2514_v44  ;;  %v5861_v44 = vpop.eup %4385 }
 0x86e   : > { %6327 = vst [vmem:[#allocation19_spill] sm:$0xff] %v5861_v44  ;;  %v2517_v23 = vsel %vm954_vm3, %v5861_v44, 0.0  ;;  %v5869_v14 = vpop.eup %4387 }
 0x86f   : > { %2700 = vrot.lane.b32.xlu0 %v5834_v61, %s4561_s10  ;;  %6328 = vst [vmem:[#allocation20_spill] sm:$0xff] %v5869_v14  ;;  %v2520_v21 = vsel %vm954_vm3, %v5869_v14, 0.0  ;;  %v5874_v45 = vpop.eup %4389 }
 0x870   : > { %6329 = vst [vmem:[#allocation21_spill] sm:$0xff] %v5874_v45 }
 0x873   : > { %2941 = vrot.lane.b32.xlu0 %v5839_v62, %s4562_s11 }
 0x877   : > { %3182 = vrot.lane.b32.xlu0 %v5844_v2, %s4563_s12  ;;  %v2897_v2 = vmul.f32 1.442695, %v2869_v55 }
 0x879   : > { %4391 = vpow2.f32 %v2897_v2 }
 0x87e   : > { %2702 = vrot.lane.b32.xlu1 %v5848_v57, %s4561_s10 }
 0x882   : > { %2943 = vrot.lane.b32.xlu1 %v5853_v43, %s4562_s11  ;;  %v3110_v43 = vsub.f32 %v5502_v6, %v3088_v52 }
 0x884   : > { %v3138_v29 = vmul.f32 1.442695, %v3110_v43  ;;  %v5879_v43 = vpop.eup %4391 }
 0x885   : > { %6330 = vst [vmem:[#allocation22_spill] sm:$0xff] %v5879_v43 }
 0x886   : > { %3184 = vrot.lane.b32.xlu1 %v5857_v17, %s4563_s12  ;;  %v2609_v17 = vpop.xlane.xlu1 %2608  ;;  %4393 = vpow2.f32 %v3138_v29 }
 0x887   : > { %v2629_v38 = vsub.f32 %v5499_v15, %v2609_v17 }
 0x889   : > { %v2658_v56 = vmul.f32 1.442695, %v2629_v38  ;;  %v2451_v38 = vsub.f32 %v5502_v6, %v2429_v4 }
 0x88b   : > { %4395 = vpow2.f32 %v2658_v56 }
 0x890   : > { %v5884_v55 = vpop.eup %4393 }
 0x891   : > { %6331 = vst [vmem:[#allocation23_spill] sm:$0xff] %v5884_v55 }
 0x895   : > { %v5888_v29 = vpop.eup %4395 }
 0x896   : > { %2518 = vadd.xlane.f32.xlu0 %v2517_v23  ;;  %v2850_v23 = vpop.xlane.xlu1 %2849  ;;  %6332 = vst [vmem:[#allocation24_spill] sm:$0xff] %v5888_v29 }
 0x897   : > { %v2870_v5 = vsub.f32 %v5499_v15, %v2850_v23 }
 0x899   : > { %v2899_v0 = vmul.f32 1.442695, %v2870_v5  ;;  %v2479_v5 = vmul.f32 1.442695, %v2451_v38 }
 0x89a   : > { %v3091_v2 = vpop.xlane.xlu1 %3090 }
 0x89b   : > { %v3111_v17 = vsub.f32 %v5499_v15, %v3091_v2  ;;  %4397 = vpow2.f32 %v2899_v0  ;;  %v2435_v0 = vpop.xlane.xlu0 %2434 }
 0x89d   : > { %v3140_v52 = vmul.f32 1.442695, %v3111_v17 }
 0x89e   : > { %v5890_v23 = vpop.xlane.xlu1 %2437 }
 0x89f   : > { %4399 = vpow2.f32 %v3140_v52  ;;  %v2612_v52 = vpop.xlane.xlu0 %2611 }
 0x8a0   : > { %4401 = vpow2.f32 %v2479_v5 }
 0x8a2   : > { %v2615_v56 = vpop.xlane.xlu1 %2614 }
 0x8a3   : > { %v2853_v6 = vpop.xlane.xlu0 %2852 }
 0x8a4   : > { %v2871_v57 = vsub.f32 %v5515_v49, %v2853_v6 }
 0x8a6   : > { %v2856_v17 = vpop.xlane.xlu1 %2855  ;;  %v2901_v61 = vmul.f32 1.442695, %v2871_v57 }
 0x8aa   : > { %2521 = vadd.xlane.f32.xlu1 %v2520_v21  ;;  %v5895_v21 = vpop.eup %4397 }
 0x8ab   : > { %6333 = vst [vmem:[#allocation25_spill] sm:$0xff] %v5895_v21  ;;  %v5899_v2 = vpop.eup %4399 }
 0x8ac   : > { %2704 = vrot.lane.b32.xlu0 %v5874_v45, %s4561_s10  ;;  %6334 = vst [vmem:[#allocation26_spill] sm:$0xff] %v5899_v2  ;;  %v2630_v45 = vsub.f32 %v5515_v49, %v2612_v52 }
 0x8ae   : > { %v2660_v5 = vmul.f32 1.442695, %v2630_v45 }
 0x8b0   : > { %2945 = vrot.lane.b32.xlu0 %v5879_v43, %s4562_s11  ;;  %v2452_v43 = vsub.f32 %v5499_v15, %v2432_v34 }
 0x8b4   : > { %3186 = vrot.lane.b32.xlu0 %v5884_v55, %s4563_s12  ;;  %v3097_v55 = vpop.xlane.xlu1 %3096 }
 0x8b5   : > { %v3113_v12 = vsub.f32 %v5512_v50, %v3097_v55 }
 0x8b8   : > { %v5905_v4 = vpop.permute.xlu1 %2682 }
 0x8bb   : > { %2706 = vrot.lane.b32.xlu1 %v5888_v29, %s4561_s10  ;;  %v5903_v29 = vpop.eup %4401 }
 0x8bc   : > { %6335 = vst [vmem:[#allocation27_spill] sm:$0xff] %v5903_v29  ;;  %v2523_v38 = vsel %vm954_vm3, %v5903_v29, 0.0  ;;  %v5911_v14 = vpop.permute.xlu1 %2923 }
 0x8bf   : > { %2947 = vrot.lane.b32.xlu1 %v5895_v21, %s4562_s11  ;;  %v2481_v21 = vmul.f32 1.442695, %v2452_v43 }
 0x8c0   : > { %v5914_v62 = vpop.permute.xlu1 %3164 }
 0x8c1   : > { %4403 = vpow2.f32 %v2481_v21 }
 0x8c2   : > { %4405 = vpow2.f32 %v2660_v5 }
 0x8c3   : > { %3188 = vrot.lane.b32.xlu1 %v5899_v2, %s4563_s12  ;;  %v3094_v2 = vpop.xlane.xlu0 %3093  ;;  %4407 = vpow2.f32 %v2901_v61 }
 0x8c4   : > { %v3112_v15 = vsub.f32 %v5515_v49, %v3094_v2  ;;  %v5917_v29 = vpop.xlane.xlu1 %2491  ;;  %v2872_v2 = vsub.f32 %v5512_v50, %v2856_v17  ;;  %v3144_v17 = vmul.f32 1.442695, %v3113_v12 }
 0x8c6   : > { %v3142_v43 = vmul.f32 1.442695, %v3112_v15 }
 0x8c7   : > { %v2681_v44 = vpop.permute.xlu0 %2680 }
 0x8c8   : > { %4409 = vpow2.f32 %v3142_v43  ;;  %v2687_v21 = vpop.permute.xlu1 %2686  ;;  %v2903_v43 = vmul.f32 1.442695, %v2872_v2  ;;  %v2453_v2 = vsub.f32 %v5515_v49, %v2435_v0  ;;  %v2454_v0 = vsub.f32 %v5512_v50, %v5890_v23 }
 0x8ca   : > { %v2485_v37 = vmul.f32 1.442695, %v2454_v0 }
 0x8cb   : > { %v2922_v34 = vpop.permute.xlu0 %2921  ;;  %v5919_v52 = vpop.eup %4403 }
 0x8cc   : > { %6336 = vst [vmem:[#allocation28_spill] sm:$0xff] %v5919_v52  ;;  %v2526_v6 = vsel %vm954_vm3, %v5919_v52, 0.0  ;;  %v5924_v5 = vpop.eup %4405  ;;  %v2969_v9 = vsel %vm954_vm3, %v2922_v34, 0.0 }
 0x8cd   : > { %6337 = vst [vmem:[#allocation29_spill] sm:$0xff] %v5924_v5  ;;  %v5931_v15 = vpop.eup %4407 }
 0x8ce   : > { %6338 = vst [vmem:[#allocation30_spill] sm:$0xff] %v5931_v15 }
 0x8cf   : > { %v3163_v45 = vpop.permute.xlu0 %3162 }
 0x8d3   : > { %2524 = vadd.xlane.f32.xlu0 %v2523_v38  ;;  %v2631_v38 = vsub.f32 %v5512_v50, %v2615_v56  ;;  %v5929_v61 = vpop.xlane.xlu0 %2488  ;;  %v2928_v56 = vpop.permute.xlu1 %2927  ;;  %v3210_v50 = vsel %vm954_vm3, %v3163_v45, 0.0  ;;  %v2731_v45 = vsel %vm954_vm3, %v5905_v4, 0.0 }
 0x8d5   : > { %v2662_v57 = vmul.f32 1.442695, %v2631_v38 }
 0x8d7   : > { %4411 = vpow2.f32 %v2662_v57  ;;  %v5938_v38 = vpop.permute.xlu0 %3166 }
 0x8d8   : > { %4413 = vpow2.f32 %v2903_v43 }
 0x8d9   : > { %4415 = vpow2.f32 %v3144_v17 }
 0x8db   : > { %v5944_v52 = vpop.xlane.xlu0 %2494 }
 0x8e7   : > { %2527 = vadd.xlane.f32.xlu1 %v2526_v6  ;;  %v5936_v6 = vpop.eup %4409 }
 0x8e8   : > { %6339 = vst [vmem:[#allocation31_spill] sm:$0xff] %v5936_v6  ;;  %v5948_v55 = vpop.eup %4411 }
 0x8e9   : > { %2708 = vrot.lane.b32.xlu0 %v5924_v5, %s4561_s10  ;;  %v5942_v5 = vpop.permute.xlu1 %3168  ;;  %6340 = vst [vmem:[#allocation32_spill] sm:$0xff] %v5948_v55  ;;  %v5953_v43 = vpop.eup %4413 }
 0x8ea   : > { %6341 = vst [vmem:[#allocation33_spill] sm:$0xff] %v5953_v43  ;;  %v5957_v36 = vpop.eup %4415 }
 0x8eb   : > { %6342 = vst [vmem:[#allocation34_spill] sm:$0xff] %v5957_v36 }
 0x8ed   : > { %2949 = vrot.lane.b32.xlu0 %v5931_v15, %s4562_s11  ;;  %v5946_v57 = vpop.xlane.xlu1 %2497  ;;  %v2689_v15 = vpop.permute.xlu0 %2688 }
 0x8f1   : > { %3190 = vrot.lane.b32.xlu0 %v5936_v6, %s4563_s12  ;;  %v2685_v12 = vpop.permute.xlu1 %2684  ;;  %v2483_v6 = vmul.f32 1.442695, %v2453_v2  ;;  %v2930_v17 = vpop.permute.xlu0 %2929 }
 0x8f2   : > { %v2734_v34 = vsel %vm954_vm3, %v2685_v12, 0.0  ;;  %v3216_v12 = vsel %vm954_vm3, %v5938_v38, 0.0 }
 0x8f3   : > { %4417 = vpow2.f32 %v2483_v6 }
 0x8f4   : > { %4419 = vpow2.f32 %v2485_v37 }
 0x8f5   : > { %v2926_v3 = vpop.permute.xlu1 %2925  ;;  %v3171_v11 = vpop.permute.xlu0 %3170 }
 0x8f8   : > { %2710 = vrot.lane.b32.xlu1 %v5948_v55, %s4561_s10 }
 0x8f9   : > { %v2691_v55 = vpop.permute.xlu1 %2690  ;;  %v5961_v41 = vpop.xlane.xlu0 %2500 }
 0x8fc   : > { %2951 = vrot.lane.b32.xlu1 %v5953_v43, %s4562_s11 }
 0x8fd   : > { %v5963_v49 = vpop.eup %4417  ;;  %v2932_v13 = vpop.permute.xlu1 %2931 }
 0x8fe   : > { %6343 = vst [vmem:[#allocation35_spill] sm:$0xff] %v5963_v49  ;;  %v2529_v2 = vsel %vm954_vm3, %v5963_v49, 0.0  ;;  %v2693_v43 = vpop.permute.xlu0 %2692  ;;  %v2737_v49 = vsel %vm954_vm3, %v2687_v21, 0.0 }
 0x900   : > { %3192 = vrot.lane.b32.xlu1 %v5957_v36, %s4563_s12  ;;  %v2728_v36 = vsel %vm954_vm3, %v2681_v44, 0.0 }
 0x901   : > { %v3173_v6 = vpop.permute.xlu1 %3172 }
 0x902   : > { %v2934_v63 = vpop.permute.xlu0 %2933 }
 0x905   : > { %v5971_v51 = vpop.xlane.xlu1 %2503 }
 0x906   : > { %v3175_v23 = vpop.permute.xlu0 %3174 }
 0x909   : > { %v2695_v31 = vpop.permute.xlu1 %2694 }
 0x90a   : > { %v5977_v0 = vpop.xlane.xlu0 %2506 }
 0x90d   : > { %v2936_v44 = vpop.permute.xlu1 %2935 }
 0x910   : > { %2530 = vadd.xlane.f32.xlu0 %v2529_v2  ;;  %v5975_v2 = vpop.eup %4419 }
 0x911   : > { %6344 = vst [vmem:[#allocation36_spill] sm:$0xff] %v5975_v2  ;;  %v2532_v37 = vsel %vm954_vm3, %v5975_v2, 0.0  ;;  %v3177_v21 = vpop.permute.xlu1 %3176 }
 0x914   : > { %2729 = vadd.xlane.f32.xlu0 %v2728_v36  ;;  %v2978_v36 = vsel %vm954_vm3, %v2928_v56, 0.0 }
 0x915   : > { %v5988_v56 = vpop.xlane.xlu1 %2509 }
 0x918   : > { %2970 = vadd.xlane.f32.xlu0 %v2969_v9  ;;  %v2697_v9 = vpop.permute.xlu0 %2696 }
 0x91c   : > { %3211 = vadd.xlane.f32.xlu0 %v3210_v50  ;;  %v2975_v50 = vsel %vm954_vm3, %v2926_v3, 0.0  ;;  %v2938_v2 = vpop.permute.xlu0 %2937  ;;  %v3219_v3 = vsel %vm954_vm3, %v5942_v5, 0.0  ;;  %v3225_v5 = vsel %vm954_vm3, %v3173_v6, 0.0  ;;  %v3231_v6 = vsel %vm954_vm3, %v3177_v21, 0.0 }
 0x920   : > { %2738 = vadd.xlane.f32.xlu0 %v2737_v49  ;;  %v2972_v49 = vsel %vm954_vm3, %v5911_v14, 0.0  ;;  %v3179_v4 = vpop.permute.xlu0 %3178  ;;  %v2699_v14 = vpop.permute.xlu1 %2698 }
 0x924   : > { %2533 = vadd.xlane.f32.xlu1 %v2532_v37  ;;  %2979 = vadd.xlane.f32.xlu0 %v2978_v36  ;;  %v3213_v37 = vsel %vm954_vm3, %v5914_v62, 0.0  ;;  %v2740_v36 = vsel %vm954_vm3, %v2689_v15, 0.0  ;;  %v2743_v62 = vsel %vm954_vm3, %v2691_v55, 0.0  ;;  %v2940_v38 = vpop.permute.xlu1 %2939  ;;  %v2746_v15 = vsel %vm954_vm3, %v2693_v43, 0.0 }
 0x925   : > { %v2987_v55 = vsel %vm954_vm3, %v2934_v63, 0.0  ;;  %v2755_v63 = vsel %vm954_vm3, %v2699_v14, 0.0 }
 0x928   : > { %2732 = vadd.xlane.f32.xlu1 %v2731_v45  ;;  %2735 = vadd.xlane.f32.xlu0 %v2734_v34  ;;  %v5997_v34 = vpop.xlane.xlu0 %2512  ;;  %v2981_v45 = vsel %vm954_vm3, %v2930_v17, 0.0 }
 0x92c   : > { %2973 = vadd.xlane.f32.xlu1 %v2972_v49  ;;  %2976 = vadd.xlane.f32.xlu0 %v2975_v50  ;;  %v3222_v50 = vsel %vm954_vm3, %v3171_v11, 0.0  ;;  %v2984_v49 = vsel %vm954_vm3, %v2932_v13, 0.0  ;;  %v3228_v11 = vsel %vm954_vm3, %v3175_v23, 0.0  ;;  %v2990_v13 = vsel %vm954_vm3, %v2936_v44, 0.0 }
 0x92d   : > { %v3234_v44 = vsel %vm954_vm3, %v3179_v4, 0.0 }
 0x930   : > { %3214 = vadd.xlane.f32.xlu1 %v3213_v37  ;;  %3217 = vadd.xlane.f32.xlu0 %v3216_v12  ;;  %v2701_v37 = vpop.permute.xlu0 %2700  ;;  %v3181_v12 = vpop.permute.xlu1 %3180 }
 0x934   : > { %3220 = vadd.xlane.f32.xlu1 %v3219_v3  ;;  %2741 = vadd.xlane.f32.xlu0 %v2740_v36  ;;  %v2942_v17 = vpop.permute.xlu0 %2941  ;;  %v2749_v3 = vsel %vm954_vm3, %v2695_v31, 0.0  ;;  %v6007_v36 = vpop.xlane.xlu1 %2515  ;;  %v2993_v31 = vsel %vm954_vm3, %v2938_v2, 0.0 }
 0x935   : > { %v2999_v14 = vsel %vm954_vm3, %v2942_v17, 0.0 }
 0x938   : > { %2744 = vadd.xlane.f32.xlu1 %v2743_v62  ;;  %2982 = vadd.xlane.f32.xlu0 %v2981_v45  ;;  %v3183_v45 = vpop.permute.xlu0 %3182  ;;  %v2703_v43 = vpop.permute.xlu1 %2702  ;;  %v2752_v62 = vsel %vm954_vm3, %v2697_v9, 0.0  ;;  %v3237_v9 = vsel %vm954_vm3, %v3181_v12, 0.0 }
 0x93c   : > { %2985 = vadd.xlane.f32.xlu1 %v2984_v49  ;;  %3223 = vadd.xlane.f32.xlu0 %v3222_v50  ;;  %v6013_v50 = vpop.xlane.xlu0 %2518  ;;  %v2944_v49 = vpop.permute.xlu1 %2943 }
 0x940   : > { %3226 = vadd.xlane.f32.xlu1 %v3225_v5  ;;  %2747 = vadd.xlane.f32.xlu0 %v2746_v15  ;;  %v2705_v23 = vpop.permute.xlu0 %2704  ;;  %v2996_v5 = vsel %vm954_vm3, %v2940_v38, 0.0  ;;  %v3185_v21 = vpop.permute.xlu1 %3184  ;;  %v2758_v15 = vsel %vm954_vm3, %v2701_v37, 0.0  ;;  %v3240_v38 = vsel %vm954_vm3, %v3183_v45, 0.0 }
 0x941   : > { %v3243_v12 = vsel %vm954_vm3, %v3185_v21, 0.0 }
 0x944   : > { %2750 = vadd.xlane.f32.xlu1 %v2749_v3  ;;  %2988 = vadd.xlane.f32.xlu0 %v2987_v55  ;;  %v2946_v55 = vpop.permute.xlu0 %2945  ;;  %v6021_v2 = vpop.xlane.xlu1 %2521  ;;  %v2761_v3 = vsel %vm954_vm3, %v2703_v43, 0.0 }
 0x945   : > { %v3005_v43 = vsel %vm954_vm3, %v2946_v55, 0.0 }
 0x948   : > { %2991 = vadd.xlane.f32.xlu1 %v2990_v13  ;;  %3229 = vadd.xlane.f32.xlu0 %v3228_v11  ;;  %v3187_v4 = vpop.permute.xlu0 %3186  ;;  %v3002_v11 = vsel %vm954_vm3, %v2944_v49, 0.0  ;;  %v2707_v13 = vpop.permute.xlu1 %2706 }
 0x949   : > { %v3246_v45 = vsel %vm954_vm3, %v3187_v4, 0.0 }
 0x94c   : > { %3232 = vadd.xlane.f32.xlu1 %v3231_v6  ;;  %2753 = vadd.xlane.f32.xlu0 %v2752_v62  ;;  %v2764_v6 = vsel %vm954_vm3, %v2705_v23, 0.0  ;;  %v2948_v17 = vpop.permute.xlu1 %2947  ;;  %v2767_v62 = vsel %vm954_vm3, %v2707_v13, 0.0 }
 0x950   : > { %2756 = vadd.xlane.f32.xlu1 %v2755_v63  ;;  %2994 = vadd.xlane.f32.xlu0 %v2993_v31  ;;  %v3008_v63 = vsel %vm954_vm3, %v2948_v17, 0.0  ;;  %v3189_v49 = vpop.permute.xlu1 %3188 }
 0x951   : > { %v3249_v23 = vsel %vm954_vm3, %v3189_v49, 0.0 }
 0x954   : > { %2997 = vadd.xlane.f32.xlu1 %v2996_v5  ;;  %3235 = vadd.xlane.f32.xlu0 %v3234_v44 }
 0x958   : > { %3238 = vadd.xlane.f32.xlu1 %v3237_v9  ;;  %2759 = vadd.xlane.f32.xlu0 %v2758_v15 }
 0x95c   : > { %2762 = vadd.xlane.f32.xlu1 %v2761_v3  ;;  %3000 = vadd.xlane.f32.xlu0 %v2999_v14 }
 0x960   : > { %3003 = vadd.xlane.f32.xlu1 %v3002_v11  ;;  %3241 = vadd.xlane.f32.xlu0 %v3240_v38  ;;  %v6027_v37 = vpop.xlane.xlu0 %2524 }
 0x964   : > { %3244 = vadd.xlane.f32.xlu1 %v3243_v12  ;;  %2765 = vadd.xlane.f32.xlu0 %v2764_v6  ;;  %v2709_v31 = vpop.permute.xlu0 %2708 }
 0x965   : > { %v2770_v5 = vsel %vm954_vm3, %v2709_v31, 0.0 }
 0x968   : > { %2768 = vadd.xlane.f32.xlu1 %v2767_v62  ;;  %3006 = vadd.xlane.f32.xlu0 %v3005_v43  ;;  %v2950_v44 = vpop.permute.xlu0 %2949 }
 0x969   : > { %v3011_v21 = vsel %vm954_vm3, %v2950_v44, 0.0 }
 0x96c   : > { %3009 = vadd.xlane.f32.xlu1 %v3008_v63  ;;  %3247 = vadd.xlane.f32.xlu0 %v3246_v45  ;;  %v3191_v9 = vpop.permute.xlu0 %3190 }
 0x96d   : > { %v3252_v55 = vsel %vm954_vm3, %v3191_v9, 0.0 }
 0x970   : > { %3250 = vadd.xlane.f32.xlu1 %v3249_v23  ;;  %2771 = vadd.xlane.f32.xlu0 %v2770_v5 }
 0x974   : > { %v6038_v15 = vpop.xlane.xlu1 %2527  ;;  %3012 = vadd.xlane.f32.xlu0 %v3011_v21 }
 0x978   : > { %v2711_v14 = vpop.permute.xlu1 %2710  ;;  %3253 = vadd.xlane.f32.xlu0 %v3252_v55 }
 0x979   : > { %v2773_v3 = vsel %vm954_vm3, %v2711_v14, 0.0 }
 0x97a   : > { %2774 = vadd.xlane.f32.xlu1 %v2773_v3 }
 0x97c   : > { %v2952_v4 = vpop.permute.xlu1 %2951 }
 0x97d   : > { %v3014_v38 = vsel %vm954_vm3, %v2952_v4, 0.0 }
 0x97e   : > { %3015 = vadd.xlane.f32.xlu1 %v3014_v38 }
 0x980   : > { %v3193_v11 = vpop.permute.xlu1 %3192 }
 0x981   : > { %v3255_v13 = vsel %vm954_vm3, %v3193_v11, 0.0 }
 0x982   : > { %3256 = vadd.xlane.f32.xlu1 %v3255_v13 }
 0x99d   : > { %v6044_v12 = vpop.xlane.xlu0 %2530 }
 0x9a1   : > { %v2730_v6 = vpop.xlane.xlu0 %2729 }
 0x9a2   : > { %4421 = vrcp.f32 %v2730_v6 }
 0x9a3   : > { %4423 = vrcp.f32 %v5929_v61 }
 0x9a5   : > { %v2971_v17 = vpop.xlane.xlu0 %2970 }
 0x9a6   : > { %4425 = vrcp.f32 %v2971_v17 }
 0x9a9   : > { %v3212_v43 = vpop.xlane.xlu0 %3211 }
 0x9aa   : > { %4427 = vrcp.f32 %v3212_v43 }
 0x9ab   : > { %4429 = vrcp.f32 %v5917_v29 }
 0x9ac   : > { %v4422_v31 = vpop.eup %4421  ;;  %4431 = vrcp.f32 %v5944_v52 }
 0x9ad   : > { %v2739_v62 = vpop.xlane.xlu0 %2738  ;;  %v4424_v45 = vpop.eup %4423  ;;  %v2777_v49 = vmul.f32 %v4422_v31, %v5638_v18 }
 0x9ae   : > { %v2536_v21 = vmul.f32 %v4424_v45, %v5662_v46  ;;  %4433 = vrcp.f32 %v2739_v62 }
 0x9b0   : > { %v4426_v63 = vpop.eup %4425  ;;  %v3290_v61 = vsel %vm954_vm3, %v2536_v21, %v2777_v49 }
 0x9b1   : > { %v6048_v44 = vpop.xlane.xlu1 %2533  ;;  %v2980_v23 = vpop.xlane.xlu0 %2979  ;;  %v3018_v5 = vmul.f32 %v4426_v63, %v5646_v30 }
 0x9b3   : > { %v3306_v30 = vsel %vm327_vm0, %v3290_v61, %v3018_v5 }
 0x9b4   : > { %v4428_v9 = vpop.eup %4427 }
 0x9b5   : > { %v3259_v18 = vmul.f32 %v4428_v9, %v5654_v58  ;;  %v2733_v55 = vpop.xlane.xlu1 %2732  ;;  %v2736_v14 = vpop.xlane.xlu0 %2735 }
 0x9b6   : > { %4435 = vrcp.f32 %v2733_v55  ;;  %v4430_v52 = vpop.eup %4429 }
 0x9b7   : > { %v3323_v46 = vsel %vm3322_vm12, %v3306_v30, %v3259_v18  ;;  %4437 = vrcp.f32 %v2736_v14  ;;  %v4432_v38 = vpop.eup %4431  ;;  %v2538_v9 = vmul.f32 %v4430_v52, %v5666_v26 }
 0x9b8   : > { %3339 = vst.msk [vmem:[%s6056_s15] sm:$0xff] %vm546_vm1, %v3323_v46  ;;  %v4434_v11 = vpop.eup %4433  ;;  %v2540_v18 = vmul.f32 %v4432_v38, %v5692_v28 }
 0x9b9   : > { %v2974_v3 = vpop.xlane.xlu1 %2973  ;;  %v2977_v4 = vpop.xlane.xlu0 %2976  ;;  %v2783_v55 = vmul.f32 %v4434_v11, %v5674_v25 }
 0x9ba   : > { %4439 = vrcp.f32 %v2974_v3 }
 0x9bb   : > { %4441 = vrcp.f32 %v2977_v4 }
 0x9bc   : > { %4443 = vrcp.f32 %v2980_v23 }
 0x9bd   : > { %4445 = vrcp.f32 %v5946_v57  ;;  %v3215_v58 = vpop.xlane.xlu1 %3214  ;;  %v3218_v29 = vpop.xlane.xlu0 %3217 }
 0x9be   : > { %4447 = vrcp.f32 %v3215_v58 }
 0x9bf   : > { %4449 = vrcp.f32 %v3218_v29 }
 0x9c0   : > { %v4436_v17 = vpop.eup %4435 }
 0x9c1   : > { %v3221_v13 = vpop.xlane.xlu1 %3220  ;;  %v2742_v6 = vpop.xlane.xlu0 %2741  ;;  %v2779_v45 = vmul.f32 %v4436_v17, %v5636_v7 }
 0x9c2   : > { %4451 = vrcp.f32 %v3221_v13  ;;  %v4438_v43 = vpop.eup %4437 }
 0x9c3   : > { %4453 = vrcp.f32 %v5961_v41  ;;  %v2781_v23 = vmul.f32 %v4438_v43, %v5716_v33  ;;  %v3291_v33 = vsel %vm954_vm3, %v2538_v9, %v2779_v45 }
 0x9c4   : > { %v4440_v62 = vpop.eup %4439  ;;  %4455 = vrcp.f32 %v2742_v6 }
 0x9c5   : > { %v4442_v31 = vpop.eup %4441  ;;  %v2745_v57 = vpop.xlane.xlu1 %2744  ;;  %4457 = vrcp.f32 %v5971_v51  ;;  %v3020_v5 = vmul.f32 %v4440_v62, %v5644_v32 }
 0x9c6   : > { %v2983_v63 = vpop.xlane.xlu0 %2982  ;;  %v4444_v49 = vpop.eup %4443  ;;  %v3022_v61 = vmul.f32 %v4442_v31, %v5724_v54  ;;  %v3292_v54 = vsel %vm954_vm3, %v2540_v18, %v2781_v23 }
 0x9c7   : > { %v4446_v21 = vpop.eup %4445  ;;  %4459 = vrcp.f32 %v2983_v63  ;;  %v3024_v51 = vmul.f32 %v4444_v49, %v5682_v27  ;;  %v3307_v30 = vsel %vm327_vm0, %v3291_v33, %v3020_v5 }
 0x9c8   : > { %v4448_v41 = vpop.eup %4447  ;;  %4461 = vrcp.f32 %v2745_v57  ;;  %v2542_v46 = vmul.f32 %v4446_v21, %v5698_v53  ;;  %v3308_v25 = vsel %vm327_vm0, %v3292_v54, %v3022_v61 }
 0x9c9   : > { %v4450_v7 = vpop.eup %4449  ;;  %v3261_v32 = vmul.f32 %v4448_v41, %v5652_v16  ;;  %v2986_v14 = vpop.xlane.xlu1 %2985 }
 0x9ca   : > { %v3224_v26 = vpop.xlane.xlu0 %3223  ;;  %v3263_v28 = vmul.f32 %v4450_v7, %v5676_v59  ;;  %4463 = vrcp.f32 %v2986_v14  ;;  %v3293_v4 = vsel %vm954_vm3, %v2542_v46, %v2783_v55 }
 0x9cb   : > { %v3324_v27 = vsel %vm3322_vm12, %v3307_v30, %v3261_v32  ;;  %4465 = vrcp.f32 %v3224_v26  ;;  %v3309_v52 = vsel %vm327_vm0, %v3293_v4, %v3024_v51 }
 0x9cc   : > { %v4452_v3 = vpop.eup %4451  ;;  %3340 = vst.msk [vmem:[%s6056_s15 + $0x8] sm:$0xff] %vm546_vm1, %v3324_v27  ;;  %v3325_v16 = vsel %vm3322_vm12, %v3308_v25, %v3263_v28 }
 0x9cd   : > { %3341 = vst.msk [vmem:[%s6056_s15 + $0x10] sm:$0xff] %vm546_vm1, %v3325_v16  ;;  %v3265_v59 = vmul.f32 %v4452_v3, %v5686_v19  ;;  %v3227_v58 = vpop.xlane.xlu1 %3226  ;;  %v4454_v53 = vpop.eup %4453  ;;  %v6345_v3 = vld [vmem:[#allocation2_spill] sm:$0xff] }
 0x9ce   : > { %v2748_v29 = vpop.xlane.xlu0 %2747  ;;  %4467 = vrcp.f32 %v3227_v58  ;;  %v4456_v38 = vpop.eup %4455  ;;  %v2544_v57 = vmul.f32 %v4454_v53, %v5741_v10  ;;  %v6347_v58 = vld [vmem:[#allocation3_spill] sm:$0xff] }
 0x9cf   : > { %v3326_v11 = vsel %vm3322_vm12, %v3309_v52, %v3265_v59  ;;  %v4458_v13 = vpop.eup %4457  ;;  %4469 = vrcp.f32 %v2748_v29  ;;  %v2785_v19 = vmul.f32 %v4456_v38, %v5706_v42 }
 0x9d0   : > { %3342 = vst.msk [vmem:[%s6056_s15 + $0x18] sm:$0xff] %vm546_vm1, %v3326_v11  ;;  %4471 = vrcp.f32 %v5977_v0 }
 0x9d1   : > { %v4460_v6 = vpop.eup %4459  ;;  %v2751_v17 = vpop.xlane.xlu1 %2750  ;;  %v3294_v21 = vsel %vm954_vm3, %v2544_v57, %v2785_v19  ;;  %v6348_v19 = vld [vmem:[#allocation5_spill] sm:$0xff]  ;;  %v6349_v57 = vld [vmem:[#allocation6_spill] sm:$0xff] }
 0x9d2   : > { %v2989_v43 = vpop.xlane.xlu0 %2988  ;;  %v4462_v62 = vpop.eup %4461  ;;  %v3026_v31 = vmul.f32 %v4460_v6, %v5711_v47  ;;  %v2546_v47 = vmul.f32 %v4458_v13, %v5749_v39 }
 0x9d3   : > { %4473 = vrcp.f32 %v2989_v43  ;;  %v2787_v49 = vmul.f32 %v4462_v62, %v5728_v40 }
 0x9d4   : > { %v4464_v45 = vpop.eup %4463  ;;  %4475 = vrcp.f32 %v2751_v17  ;;  %v3310_v10 = vsel %vm327_vm0, %v3294_v21, %v3026_v31 }
 0x9d5   : > { %v4466_v63 = vpop.eup %4465  ;;  %4477 = vrcp.f32 %v5988_v56  ;;  %v2992_v23 = vpop.xlane.xlu1 %2991  ;;  %v3028_v0 = vmul.f32 %v4464_v45, %v5733_v1  ;;  %v3295_v40 = vsel %vm954_vm3, %v2546_v47, %v2787_v49 }
 0x9d6   : > { %v3230_v5 = vpop.xlane.xlu0 %3229  ;;  %v3267_v42 = vmul.f32 %v4466_v63, %v5718_v48  ;;  %4479 = vrcp.f32 %v2992_v23  ;;  %v6350_v23 = vld [vmem:[#allocation11_spill] sm:$0xff] }
 0x9d7   : > { %4481 = vrcp.f32 %v3230_v5  ;;  %v3311_v48 = vsel %vm327_vm0, %v3295_v40, %v3028_v0  ;;  %v6351_v0 = vld [vmem:[#allocation8_spill] sm:$0xff]  ;;  %v6353_v40 = vld [vmem:[#allocation7_spill] sm:$0xff] }
 0x9d8   : > { %v4468_v9 = vpop.eup %4467  ;;  %v3327_v56 = vsel %vm3322_vm12, %v3310_v10, %v3267_v42 }
 0x9d9   : > { %3343 = vst.msk [vmem:[%s6056_s15 + $0x20] sm:$0xff] %vm546_vm1, %v3327_v56  ;;  %v3269_v61 = vmul.f32 %v4468_v9, %v5737_v60  ;;  %v3233_v41 = vpop.xlane.xlu1 %3232  ;;  %v4470_v18 = vpop.eup %4469  ;;  %v6352_v9 = vld [vmem:[#allocation9_spill] sm:$0xff] }
 0x9da   : > { %v2754_v1 = vpop.xlane.xlu0 %2753  ;;  %4483 = vrcp.f32 %v3233_v41  ;;  %v4472_v7 = vpop.eup %4471  ;;  %v2789_v60 = vmul.f32 %v4470_v18, %v5754_v22  ;;  %v6354_v41 = vld [vmem:[#allocation12_spill] sm:$0xff] }
 0x9db   : > { %v3328_v39 = vsel %vm3322_vm12, %v3311_v48, %v3269_v61  ;;  %4485 = vrcp.f32 %v2754_v1  ;;  %v2548_v30 = vmul.f32 %v4472_v7, %v5781_v35  ;;  %v6355_v7 = vld [vmem:[#allocation10_spill] sm:$0xff] }
 0x9dc   : > { %3344 = vst.msk [vmem:[%s6056_s15 + $0x28] sm:$0xff] %vm546_vm1, %v3328_v39  ;;  %4487 = vrcp.f32 %v5997_v34 }
 0x9dd   : > { %v4474_v55 = vpop.eup %4473  ;;  %v2757_v51 = vpop.xlane.xlu1 %2756  ;;  %v3296_v34 = vsel %vm954_vm3, %v2548_v30, %v2789_v60 }
 0x9de   : > { %v2995_v33 = vpop.xlane.xlu0 %2994  ;;  %v4476_v32 = vpop.eup %4475  ;;  %v3030_v26 = vmul.f32 %v4474_v55, %v5759_v8  ;;  %v6346_v8 = vld [vmem:[#allocation4_spill] sm:$0xff] }
 0x9df   : > { %v4478_v14 = vpop.eup %4477  ;;  %4489 = vrcp.f32 %v2995_v33  ;;  %v2791_v46 = vmul.f32 %v4476_v32, %v5768_v24 }
 0x9e0   : > { %v4480_v54 = vpop.eup %4479  ;;  %4491 = vrcp.f32 %v2757_v51  ;;  %v2550_v4 = vmul.f32 %v4478_v14, %v6346_v8  ;;  %v3312_v35 = vsel %vm327_vm0, %v3296_v34, %v3030_v26  ;;  %v6358_v8 = vld [vmem:[#allocation19_spill] sm:$0xff] }
 0x9e1   : > { %v4482_v28 = vpop.eup %4481  ;;  %4493 = vrcp.f32 %v6007_v36  ;;  %v2998_v25 = vpop.xlane.xlu1 %2997  ;;  %v3032_v22 = vmul.f32 %v4480_v54, %v5773_v20 }
 0x9e2   : > { %v3236_v27 = vpop.xlane.xlu0 %3235  ;;  %v3271_v16 = vmul.f32 %v4482_v28, %v6345_v3  ;;  %4495 = vrcp.f32 %v2998_v25  ;;  %v3297_v24 = vsel %vm954_vm3, %v2550_v4, %v2791_v46  ;;  %v6356_v25 = vld [vmem:[#allocation13_spill] sm:$0xff] }
 0x9e3   : > { %4497 = vrcp.f32 %v3236_v27  ;;  %v3313_v52 = vsel %vm327_vm0, %v3297_v24, %v3032_v22  ;;  %v6357_v22 = vld [vmem:[#allocation14_spill] sm:$0xff] }
 0x9e4   : > { %v4484_v59 = vpop.eup %4483  ;;  %v3329_v36 = vsel %vm3322_vm12, %v3312_v35, %v3271_v16 }
 0x9e5   : > { %3345 = vst.msk [vmem:[%s6056_s15 + $0x30] sm:$0xff] %vm546_vm1, %v3329_v36  ;;  %v3273_v29 = vmul.f32 %v4484_v59, %v6347_v58  ;;  %v3239_v53 = vpop.xlane.xlu1 %3238  ;;  %v4486_v38 = vpop.eup %4485  ;;  %v6359_v59 = vld [vmem:[#allocation16_spill] sm:$0xff] }
 0x9e6   : > { %v2760_v20 = vpop.xlane.xlu0 %2759  ;;  %4499 = vrcp.f32 %v3239_v53  ;;  %v4488_v13 = vpop.eup %4487  ;;  %v2793_v31 = vmul.f32 %v4486_v38, %v6348_v19  ;;  %v6362_v38 = vld [vmem:[#allocation20_spill] sm:$0xff] }
 0x9e7   : > { %v3330_v11 = vsel %vm3322_vm12, %v3313_v52, %v3273_v29  ;;  %4501 = vrcp.f32 %v2760_v20  ;;  %v2552_v5 = vmul.f32 %v4488_v13, %v6350_v23  ;;  %v6360_v29 = vld [vmem:[#allocation17_spill] sm:$0xff]  ;;  %v6361_v20 = vld [vmem:[#allocation15_spill] sm:$0xff] }
 0x9e8   : > { %3346 = vst.msk [vmem:[%s6056_s15 + $0x38] sm:$0xff] %vm546_vm1, %v3330_v11  ;;  %4503 = vrcp.f32 %v6013_v50 }
 0x9e9   : > { %v4490_v6 = vpop.eup %4489  ;;  %v2763_v17 = vpop.xlane.xlu1 %2762  ;;  %v3298_v50 = vsel %vm954_vm3, %v2552_v5, %v2793_v31 }
 0x9ea   : > { %v3001_v43 = vpop.xlane.xlu0 %3000  ;;  %v4492_v62 = vpop.eup %4491  ;;  %v3034_v63 = vmul.f32 %v4490_v6, %v6349_v57 }
 0x9eb   : > { %v4494_v45 = vpop.eup %4493  ;;  %4505 = vrcp.f32 %v3001_v43  ;;  %v2795_v42 = vmul.f32 %v4492_v62, %v6351_v0  ;;  %v6363_v43 = vld [vmem:[#allocation18_spill] sm:$0xff]  ;;  %v6364_v0 = vld [vmem:[#allocation21_spill] sm:$0xff] }
 0x9ec   : > { %v4496_v49 = vpop.eup %4495  ;;  %4507 = vrcp.f32 %v2763_v17  ;;  %v2554_v1 = vmul.f32 %v4494_v45, %v6354_v41  ;;  %v3314_v48 = vsel %vm327_vm0, %v3298_v50, %v3034_v63  ;;  %v6367_v41 = vld [vmem:[#allocation24_spill] sm:$0xff] }
 0x9ed   : > { %v4498_v21 = vpop.eup %4497  ;;  %4509 = vrcp.f32 %v6021_v2  ;;  %v3004_v47 = vpop.xlane.xlu1 %3003  ;;  %v3036_v56 = vmul.f32 %v4496_v49, %v6352_v9 }
 0x9ee   : > { %v3242_v10 = vpop.xlane.xlu0 %3241  ;;  %v3275_v61 = vmul.f32 %v4498_v21, %v6353_v40  ;;  %4511 = vrcp.f32 %v3004_v47  ;;  %v3299_v39 = vsel %vm954_vm3, %v2554_v1, %v2795_v42 }
 0x9ef   : > { %4513 = vrcp.f32 %v3242_v10  ;;  %v3315_v32 = vsel %vm327_vm0, %v3299_v39, %v3036_v56  ;;  %v6365_v10 = vld [vmem:[#allocation22_spill] sm:$0xff]  ;;  %v6366_v56 = vld [vmem:[#allocation27_spill] sm:$0xff] }
 0x9f0   : > { %v4500_v18 = vpop.eup %4499  ;;  %v3331_v2 = vsel %vm3322_vm12, %v3314_v48, %v3275_v61  ;;  %v6369_v39 = vld [vmem:[#allocation23_spill] sm:$0xff] }
 0x9f1   : > { %3347 = vst.msk [vmem:[%s6056_s15 + $0x40] sm:$0xff] %vm546_vm1, %v3331_v2  ;;  %v3277_v55 = vmul.f32 %v4500_v18, %v6355_v7  ;;  %v3245_v51 = vpop.xlane.xlu1 %3244  ;;  %v4502_v60 = vpop.eup %4501  ;;  %v6368_v2 = vld [vmem:[#allocation25_spill] sm:$0xff] }
 0x9f2   : > { %v2766_v33 = vpop.xlane.xlu0 %2765  ;;  %4515 = vrcp.f32 %v3245_v51  ;;  %v4504_v26 = vpop.eup %4503  ;;  %v2797_v27 = vmul.f32 %v4502_v60, %v6356_v25 }
 0x9f3   : > { %v3332_v14 = vsel %vm3322_vm12, %v3315_v32, %v3277_v55  ;;  %4517 = vrcp.f32 %v2766_v33  ;;  %v2556_v4 = vmul.f32 %v4504_v26, %v6358_v8  ;;  %v6370_v55 = vld [vmem:[#allocation28_spill] sm:$0xff]  ;;  %v6373_v8 = vld [vmem:[#allocation30_spill] sm:$0xff] }
 0x9f4   : > { %3348 = vst.msk [vmem:[%s6056_s15 + $0x48] sm:$0xff] %vm546_vm1, %v3332_v14  ;;  %4519 = vrcp.f32 %v6027_v37 }
 0x9f5   : > { %v4506_v54 = vpop.eup %4505  ;;  %v2769_v30 = vpop.xlane.xlu1 %2768  ;;  %v3300_v37 = vsel %vm954_vm3, %v2556_v4, %v2797_v27 }
 0x9f6   : > { %v3007_v28 = vpop.xlane.xlu0 %3006  ;;  %v4508_v46 = vpop.eup %4507  ;;  %v3038_v3 = vmul.f32 %v4506_v54, %v6357_v22  ;;  %v6371_v54 = vld [vmem:[#allocation26_spill] sm:$0xff] }
 0x9f7   : > { %v4510_v34 = vpop.eup %4509  ;;  %4521 = vrcp.f32 %v3007_v28  ;;  %v2799_v36 = vmul.f32 %v4508_v46, %v6359_v59 }
 0x9f8   : > { %v4512_v16 = vpop.eup %4511  ;;  %4523 = vrcp.f32 %v2769_v30  ;;  %v2558_v11 = vmul.f32 %v4510_v34, %v6362_v38  ;;  %v3316_v13 = vsel %vm327_vm0, %v3300_v37, %v3038_v3  ;;  %v6372_v3 = vld [vmem:[#allocation29_spill] sm:$0xff] }
 0x9f9   : > { %v4514_v35 = vpop.eup %4513  ;;  %4525 = vrcp.f32 %v6038_v15  ;;  %v3010_v24 = vpop.xlane.xlu1 %3009  ;;  %v3040_v53 = vmul.f32 %v4512_v16, %v6360_v29 }
 0x9fa   : > { %v3248_v58 = vpop.xlane.xlu0 %3247  ;;  %v3279_v52 = vmul.f32 %v4514_v35, %v6361_v20  ;;  %4527 = vrcp.f32 %v3010_v24  ;;  %v3301_v17 = vsel %vm954_vm3, %v2558_v11, %v2799_v36  ;;  %v6374_v35 = vld [vmem:[#allocation35_spill] sm:$0xff]  ;;  %v6376_v11 = vld [vmem:[#allocation32_spill] sm:$0xff] }
 0x9fb   : > { %4529 = vrcp.f32 %v3248_v58  ;;  %v3317_v45 = vsel %vm327_vm0, %v3301_v17, %v3040_v53  ;;  %v6378_v17 = vld [vmem:[#allocation36_spill] sm:$0xff] }
 0x9fc   : > { %v4516_v6 = vpop.eup %4515  ;;  %v3333_v15 = vsel %vm3322_vm12, %v3316_v13, %v3279_v52 }
 0x9fd   : > { %3349 = vst.msk [vmem:[%s6056_s15 + $0x50] sm:$0xff] %vm546_vm1, %v3333_v15  ;;  %v3281_v62 = vmul.f32 %v4516_v6, %v6363_v43  ;;  %v3251_v19 = vpop.xlane.xlu1 %3250  ;;  %v4518_v57 = vpop.eup %4517  ;;  %v6377_v6 = vld [vmem:[#allocation33_spill] sm:$0xff] }
 0x9fe   : > { %v2772_v31 = vpop.xlane.xlu0 %2771  ;;  %4531 = vrcp.f32 %v3251_v19  ;;  %v4520_v49 = vpop.eup %4519  ;;  %v2801_v42 = vmul.f32 %v4518_v57, %v6364_v0 }
 0x9ff   : > { %v3334_v63 = vsel %vm3322_vm12, %v3317_v45, %v3281_v62  ;;  %4533 = vrcp.f32 %v2772_v31  ;;  %v2560_v40 = vmul.f32 %v4520_v49, %v6366_v56  ;;  %v6379_v31 = vld [vmem:[#allocation34_spill] sm:$0xff] }
 0xa00   : > { %3350 = vst.msk [vmem:[%s6056_s15 + $0x58] sm:$0xff] %vm546_vm1, %v3334_v63  ;;  %4535 = vrcp.f32 %v6044_v12 }
 0xa01   : > { %v4522_v23 = vpop.eup %4521  ;;  %v3302_v18 = vsel %vm954_vm3, %v2560_v40, %v2801_v42 }
 0xa02   : > { %v3013_v5 = vpop.xlane.xlu0 %3012  ;;  %v4524_v21 = vpop.eup %4523  ;;  %v3042_v50 = vmul.f32 %v4522_v23, %v6365_v10 }
 0xa03   : > { %4537 = vrcp.f32 %v3013_v5  ;;  %v4526_v47 = vpop.eup %4525  ;;  %v2803_v1 = vmul.f32 %v4524_v21, %v6367_v41 }
 0xa04   : > { %v4528_v9 = vpop.eup %4527  ;;  %v2562_v51 = vmul.f32 %v4526_v47, %v6370_v55  ;;  %v3318_v33 = vsel %vm327_vm0, %v3302_v18, %v3042_v50 }
 0xa05   : > { %v4530_v61 = vpop.eup %4529  ;;  %v3044_v12 = vmul.f32 %v4528_v9, %v6368_v2 }
 0xa06   : > { %v3254_v48 = vpop.xlane.xlu0 %3253  ;;  %v3283_v7 = vmul.f32 %v4530_v61, %v6369_v39  ;;  %v3303_v26 = vsel %vm954_vm3, %v2562_v51, %v2803_v1 }
 0xa07   : > { %4539 = vrcp.f32 %v3254_v48  ;;  %v2775_v32 = vpop.xlane.xlu1 %2774  ;;  %v3319_v46 = vsel %vm327_vm0, %v3303_v26, %v3044_v12 }
 0xa08   : > { %v4532_v60 = vpop.eup %4531  ;;  %v3335_v14 = vsel %vm3322_vm12, %v3318_v33, %v3283_v7  ;;  %4541 = vrcp.f32 %v2775_v32 }
 0xa09   : > { %3351 = vst.msk [vmem:[%s6056_s15 + $0x60] sm:$0xff] %vm546_vm1, %v3335_v14  ;;  %v3285_v30 = vmul.f32 %v4532_v60, %v6371_v54  ;;  %v4534_v28 = vpop.eup %4533  ;;  %4543 = vrcp.f32 %v6048_v44  ;;  %v6375_v44 = vld [vmem:[#allocation31_spill] sm:$0xff] }
 0xa0a   : > { %v4536_v25 = vpop.eup %4535  ;;  %v2805_v16 = vmul.f32 %v4534_v28, %v6372_v3 }
 0xa0b   : > { %v3336_v27 = vsel %vm3322_vm12, %v3319_v46, %v3285_v30  ;;  %v3016_v34 = vpop.xlane.xlu1 %3015  ;;  %v2564_v59 = vmul.f32 %v4536_v25, %v6374_v35 }
 0xa0c   : > { %3352 = vst.msk [vmem:[%s6056_s15 + $0x68] sm:$0xff] %vm546_vm1, %v3336_v27  ;;  %4545 = vrcp.f32 %v3016_v34 }
 0xa0d   : > { %v4538_v22 = vpop.eup %4537  ;;  %v3304_v58 = vsel %vm954_vm3, %v2564_v59, %v2805_v16 }
 0xa0e   : > { %v3046_v4 = vmul.f32 %v4538_v22, %v6373_v8 }
 0xa0f   : > { %v3257_v36 = vpop.xlane.xlu1 %3256 }
 0xa10   : > { %4547 = vrcp.f32 %v3257_v36  ;;  %v3320_v29 = vsel %vm327_vm0, %v3304_v58, %v3046_v4 }
 0xa11   : > { %v4540_v24 = vpop.eup %4539 }
 0xa12   : > { %v3287_v37 = vmul.f32 %v4540_v24, %v6375_v44  ;;  %v4542_v20 = vpop.eup %4541 }
 0xa13   : > { %v4544_v52 = vpop.eup %4543  ;;  %v2807_v13 = vmul.f32 %v4542_v20, %v6376_v11 }
 0xa14   : > { %v3337_v53 = vsel %vm3322_vm12, %v3320_v29, %v3287_v37  ;;  %v2566_v43 = vmul.f32 %v4544_v52, %v6378_v17 }
 0xa15   : > { %3353 = vst.msk [vmem:[%s6056_s15 + $0x70] sm:$0xff] %vm546_vm1, %v3337_v53 }
 0xa16   : > { %v4546_v38 = vpop.eup %4545  ;;  %v3305_v19 = vsel %vm954_vm3, %v2566_v43, %v2807_v13 }
 0xa17   : > { %v3048_v15 = vmul.f32 %v4546_v38, %v6377_v6 }
 0xa19   : > { %v3321_v57 = vsel %vm327_vm0, %v3305_v19, %v3048_v15 }
 0xa1a   : > { %v4548_v62 = vpop.eup %4547 }
 0xa1b   : > { %v3289_v45 = vmul.f32 %v4548_v62, %v6379_v31 }
 0xa1d   : > { %v3338_v63 = vsel %vm3322_vm12, %v3321_v57, %v3289_v45 }
 0xa1e   : > { %3354 = vst.msk [vmem:[%s6056_s15 + $0x78] sm:$0xff] %vm546_vm1, %v3338_v63 }
 0xa1f PF: > { %s15_s18 = sadd.s32 1, %s4555_s18  }
 0xa20   : > { %p12_p4 = scmp.ge.s32.totalorder %s15_s18, 4  }
 0xa22   :  { %14 = sbr.rel (!%p12_p4) target bundleno = 1 (0x1), region = 76 }

</bundles_post_ra>
